<compile_context>
chip_gen: v7x
topology: tpu7x:2x2x1
jax: 0.10.0
libtpu: 0.0.40
codegen_flags: <defaults>
</compile_context>

<pallas_src>
import functools

import jax
import jax.numpy as jnp
from jax.experimental import pallas as pl
from jax.experimental.pallas import tpu as pltpu


def _round_up(n, m):
    return ((n + m - 1) // m) * m


def _vmem_limit_bytes():
    # ~3/4 of physical VMEM per core: ~48 MiB on v7x (64 MiB), ~96 MiB on
    # v5e/v6e (128 MiB); conservative 48 MiB fallback if the query fails.
    cap = 64 * 1024 * 1024
    try:
        info = pltpu.get_tpu_info()
        cap = int(getattr(info, "vmem_capacity_bytes", cap) or cap)
    except Exception:
        cap = 64 * 1024 * 1024
    return int(min((cap * 3) // 4, 96 * 1024 * 1024))


# ----------------------------------------------------------------------------
# Pallas kernel
# ----------------------------------------------------------------------------
def ncs_kernel(x_ref, coords_ref, c1w_ref, dw_ref, c3w_ref, scaw_ref,
               wx1_ref, wsf1_ref, wsf2_ref, waA_ref,
               c4w_ref, c5w_ref, linw_ref, bias_ref,
               out_ref, stk_ref,
               *, C, H, W, Cp_full, Cp_half, boffs):
    HW = H * W
    Ch = C // 2
    f32 = jnp.float32
    sdt = stk_ref.dtype                              # stacked-shift dtype

    inp = x_ref[0]                                   # (C, HW) f32
    ball = bias_ref[...]                             # packed biases (NB, 1) f32

    def getb(name):
        o, n = boffs[name]
        return ball[o:o + n]                         # (n, 1)

    def mm(w_ref_, act):
        # 1x1 conv / Linear: bf16-stored weight, f32 activation.  At default
        # precision this is a single bf16 MXU pass (same numerics as feeding
        # bf16 operands), with only the tiny weight upcast on the VPU.
        return jnp.dot(w_ref_[...].astype(f32), act, preferred_element_type=f32)

    # ---- boundary masks for the 8 non-centre taps, computed in-kernel ------
    row = coords_ref[0:1, :]                         # (1, HW) f32 row index
    col = coords_ref[1:2, :]                         # (1, HW) f32 col index
    maskf = {}
    for dy in (-1, 0, 1):
        for dx in (-1, 0, 1):
            k = (dy + 1) * 3 + (dx + 1)
            if k == 4:
                continue
            conds = []
            if dy < 0:
                conds.append(row >= float(-dy))
            if dy > 0:
                conds.append(row < float(H - dy))
            if dx < 0:
                conds.append(col >= float(-dx))
            if dx > 0:
                conds.append(col < float(W - dx))
            m = conds[0]
            for cnd in conds[1:]:
                m = m & cnd
            maskf[k] = m.astype(f32)                 # (1, HW)

    def shift(x, k):
        # zero-padded spatial shift of a (Cc, HW) slab for tap k=(dy+1)*3+(dx+1)
        if k == 4:
            return x
        ky, kx = divmod(k, 3)
        s = (ky - 1) * W + (kx - 1)
        return pltpu.roll(x, (-s) % HW, 1) * maskf[k]

    def conv3x3(x, w_ref_, b, Cp):
        # Big-K 3x3 conv: stack the 9 shifted copies into the shared VMEM
        # scratch (tap k occupies rows [k*Cp, (k+1)*Cp), fully rewritten every
        # call so there is no cross-iteration state) and run ONE matmul with
        # the (Co, 9*Cp) stacked weights.
        Ci = x.shape[0]
        if Ci < Cp:
            zpad = jnp.zeros((Cp - Ci, HW), sdt)     # hoisted: no per-tap bcast
        for k in range(9):
            stk_ref[k * Cp:k * Cp + Ci, :] = shift(x, k).astype(sdt)
            if Ci < Cp:
                stk_ref[k * Cp + Ci:(k + 1) * Cp, :] = zpad
        stk = stk_ref[0:9 * Cp, :]
        return jnp.dot(w_ref_[...], stk, preferred_element_type=f32) + b

    def ln(x, eps=1e-6):                             # channel LN (affine folded)
        mu = jnp.mean(x, axis=0, keepdims=True)
        xc = x - mu
        var = jnp.mean(xc * xc, axis=0, keepdims=True)
        return xc * jax.lax.rsqrt(var + eps)

    # ---------------- NAFNet-style attention branch ----------------
    t = mm(c1w_ref, ln(inp)) + getb('c1b')           # conv1 (norm1 folded), (2C, HW)

    acc = dw_ref[4] * t                              # depthwise 3x3 -> VPU MACs (f32)
    for k in (0, 1, 2, 3, 5, 6, 7, 8):
        acc += dw_ref[k] * shift(t, k)
    acc += getb('c2b')

    xg = acc[:C] * acc[C:]                           # SimpleGate -> (C, HW)
    pooled = jnp.mean(xg, axis=1, keepdims=True)     # pool BEFORE the 1x1 (C, 1)
    xg = xg * (mm(scaw_ref, pooled) + getb('scab'))
    x1 = mm(c3w_ref, xg) + getb('c3b')               # (C, HW); dropout1 = identity

    # fused big-K 3x3 over x1's shifts: [style1 ; style2 ; att_B] -> (C+1, HW)
    f = conv3x3(x1, wx1_ref, getb('bx1'), Cp_full)
    sf1 = jnp.maximum(f[:Ch], 0.0)
    sf2 = jnp.maximum(f[Ch:C], 0.0)
    att_B = jax.nn.sigmoid(f[C:C + 1])

    gfeat = jnp.mean(sf1, axis=1, keepdims=True)     # pool BEFORE the Linear (C/2, 1)
    style = mm(linw_ref, gfeat) + getb('linb')       # (2C, 1)
    s_mean = style[:C]
    s_std = style[C:]

    gb_t = conv3x3(sf2, wsf2_ref, getb('bsf2'), Cp_half)   # fused [gamma_t ; beta_t]
    gamma_t, beta_t = gb_t[:C], gb_t[C:]

    out_T = x1 * (1.0 + gamma_t) + beta_t
    out_style = s_std * inp + s_mean                 # AdaIn
    step1 = (1.0 - att_B) * out_T + att_B * out_style
    y = step1 + inp

    # ---------------- FFN branch ----------------
    z = mm(c4w_ref, ln(y)) + getb('c4b')             # conv4 (norm2 folded), (2C, HW)
    z = z[:C] * z[C:]                                # SimpleGate
    z = mm(c5w_ref, z) + getb('c5b')                 # (C, HW); dropout2 = identity

    # conv_att_A (C -> 1): per-tap VPU MACs into a (C, HW) accumulator,
    # ONE cross-sublane reduction at the end.
    a_acc = waA_ref[4] * z
    for k in (0, 1, 2, 3, 5, 6, 7, 8):
        a_acc += waA_ref[k] * shift(z, k)
    att_A = jax.nn.sigmoid(jnp.sum(a_acc, axis=0, keepdims=True) + getb('aAb'))

    # gamma_r/beta_r computed here (its only use is out_R) so that only sf1
    # (C/2, HW) stays live across the FFN instead of a (2C, HW) slab.
    gb_r = conv3x3(sf1, wsf1_ref, getb('bsf1'), Cp_half)   # fused [gamma_r ; beta_r]
    gamma_r, beta_r = gb_r[:C], gb_r[C:]

    out_R = z * (1.0 + gamma_r) + beta_r
    step2 = att_A * out_R + (1.0 - att_A) * step1
    out_ref[0] = (step2 + y).astype(out_ref.dtype)


# ----------------------------------------------------------------------------
# Wrapper: weight prep (fusion / folding / packing) + pallas_call
# ----------------------------------------------------------------------------
def ncs_block_pallas(inp, p, c):
    B, C, H, W = inp.shape
    assert C == c and C % 2 == 0
    HW = H * W
    assert HW % 128 == 0, "H*W must be a multiple of 128"

    f32 = jnp.float32
    bf16 = jnp.bfloat16
    x2 = inp.reshape(B, C, HW).astype(f32)

    # Flattened-position (row, col) coordinates for the in-kernel masks.
    pos = jnp.arange(HW, dtype=jnp.int32)
    coords = jnp.stack([pos // W, pos % W], axis=0).astype(f32)   # (2, HW)

    # Stacked-shift dtype: bf16 only when per-tap row blocks are sublane-pack
    # aligned (C and C/2 multiples of 16); f32 otherwise (e.g. tiny test C).
    stack_dt = bf16 if (C % 32 == 0) else f32
    pack = 16 if stack_dt == bf16 else 8
    Cp_full = _round_up(C, pack)
    Cp_half = _round_up(C // 2, pack)

    def r1x1(w):                                      # (Co,Ci,1,1) -> (Co,Ci)
        return w[:, :, 0, 0].astype(f32)

    def pack3x3(w, Cp):
        # (Co,Ci,3,3) -> (Co, 9*Cp): tap-major columns (k = ky*3+kx), each tap
        # block zero-padded from Ci to Cp channels to match the VMEM scratch.
        Co, Ci = w.shape[0], w.shape[1]
        wt = jnp.transpose(w, (0, 2, 3, 1))           # (Co, 3, 3, Ci)
        wt = jnp.pad(wt, ((0, 0), (0, 0), (0, 0), (0, Cp - Ci)))
        return wt.reshape(Co, 9 * Cp).astype(stack_dt)

    # Fold LayerNorm affine into the following 1x1 convs (host side, f32).
    c1w = r1x1(p['conv1_w'])
    c1w_f = (c1w * p['norm1_w'][None, :]).astype(bf16)
    c1b_f = c1w @ p['norm1_b'] + p['conv1_b']
    c4w = r1x1(p['conv4_w'])
    c4w_f = (c4w * p['norm2_w'][None, :]).astype(bf16)
    c4b_f = c4w @ p['norm2_b'] + p['conv4_b']

    # Depthwise 3x3: (2C,1,3,3) -> (9, 2C, 1) per-tap channel scales (f32, tiny)
    dw_w = jnp.transpose(p['conv2_w'][:, 0], (1, 2, 0)).reshape(9, -1)[:, :, None].astype(f32)

    # Fused big-K 3x3 weights over shared shifted inputs.
    wx1 = pack3x3(jnp.concatenate([p['style1_w'], p['style2_w'], p['attB_w']], axis=0), Cp_full)
    wsf1 = pack3x3(jnp.concatenate([p['gr_w'], p['br_w']], axis=0), Cp_half)
    wsf2 = pack3x3(jnp.concatenate([p['gt_w'], p['bt_w']], axis=0), Cp_half)
    # conv_att_A as per-tap channel columns for the VPU path: (9, C, 1) f32
    waA = jnp.transpose(p['attA_w'], (2, 3, 1, 0)).reshape(9, C, 1).astype(f32)

    c3w = r1x1(p['conv3_w']).astype(bf16)
    scaw = r1x1(p['sca_w']).astype(bf16)
    c5w = r1x1(p['conv5_w']).astype(bf16)
    linw = p['lin_w'].astype(bf16)

    # Pack all biases into one slab (segments 8-row aligned) -> single DMA.
    segs = [
        ('c1b', c1b_f),
        ('c2b', p['conv2_b']),
        ('c3b', p['conv3_b']),
        ('scab', p['sca_b']),
        ('bx1', jnp.concatenate([p['style1_b'], p['style2_b'], p['attB_b']])),
        ('bsf1', jnp.concatenate([p['gr_b'], p['br_b']])),
        ('bsf2', jnp.concatenate([p['gt_b'], p['bt_b']])),
        ('aAb', p['attA_b']),
        ('linb', p['lin_b']),
        ('c4b', c4b_f),
        ('c5b', p['conv5_b']),
    ]
    boffs = {}
    rows = []
    off = 0
    for name, v in segs:
        n = v.shape[0]
        npad = _round_up(n, 8)
        boffs[name] = (off, n)
        rows.append(jnp.pad(v.astype(f32), (0, npad - n)))
        off += npad
    bias_pack = jnp.concatenate(rows).reshape(off, 1)

    plist = [coords, c1w_f, dw_w, c3w, scaw, wx1, wsf1, wsf2, waA,
             c4w_f, c5w, linw, bias_pack]

    in_specs = [pl.BlockSpec((1, C, HW), lambda b: (b, 0, 0))]
    # Grid-invariant weights / coords / biases: whole-array blocks with a
    # constant index map (DMA'd once; negligible footprint now that the masks
    # are computed in-kernel and the matmul weights are bf16).
    for arr in plist:
        in_specs.append(pl.BlockSpec(arr.shape, lambda b, n=arr.ndim: (0,) * n))

    kern = functools.partial(ncs_kernel, C=C, H=H, W=W,
                             Cp_full=Cp_full, Cp_half=Cp_half, boffs=boffs)
    out = pl.pallas_call(
        kern,
        out_shape=jax.ShapeDtypeStruct((B, C, HW), jnp.float32),
        grid_spec=pltpu.PrefetchScalarGridSpec(
            num_scalar_prefetch=0,
            grid=(B,),
            in_specs=in_specs,
            out_specs=pl.BlockSpec((1, C, HW), lambda b: (b, 0, 0)),
            scratch_shapes=[pltpu.VMEM((9 * Cp_full, HW), stack_dt)],
        ),
        compiler_params=pltpu.CompilerParams(
            dimension_semantics=("parallel",),        # megacore sharding on v7x
            vmem_limit_bytes=_vmem_limit_bytes(),     # per-generation budget
        ),
    )(x2, *plist)
    return out.reshape(B, C, H, W)


# ----------------------------------------------------------------------------
# Deterministic parameter init (synthetic weights, PyTorch shapes)
# ----------------------------------------------------------------------------
def init_params(key, c):
    dw = 2 * c
    ffn = 2 * c
    keys = iter(jax.random.split(key, 40))

    def w(shape, scale=0.2):
        return jax.random.normal(next(keys), shape, jnp.float32) * scale

    p = {}
    p['norm1_w'] = 1.0 + 0.1 * jax.random.normal(next(keys), (c,), jnp.float32)
    p['norm1_b'] = 0.1 * jax.random.normal(next(keys), (c,), jnp.float32)
    p['norm2_w'] = 1.0 + 0.1 * jax.random.normal(next(keys), (c,), jnp.float32)
    p['norm2_b'] = 0.1 * jax.random.normal(next(keys), (c,), jnp.float32)
    p['conv1_w'] = w((dw, c, 1, 1));   p['conv1_b'] = w((dw,), 0.1)
    p['conv2_w'] = w((dw, 1, 3, 3));   p['conv2_b'] = w((dw,), 0.1)
    p['conv3_w'] = w((c, c, 1, 1));    p['conv3_b'] = w((c,), 0.1)
    p['sca_w'] = w((c, c, 1, 1));      p['sca_b'] = w((c,), 0.1)
    p['conv4_w'] = w((ffn, c, 1, 1));  p['conv4_b'] = w((ffn,), 0.1)
    p['conv5_w'] = w((c, c, 1, 1));    p['conv5_b'] = w((c,), 0.1)
    p['gr_w'] = w((c, c // 2, 3, 3));  p['gr_b'] = w((c,), 0.1)
    p['br_w'] = w((c, c // 2, 3, 3));  p['br_b'] = w((c,), 0.1)
    p['gt_w'] = w((c, c // 2, 3, 3));  p['gt_b'] = w((c,), 0.1)
    p['bt_w'] = w((c, c // 2, 3, 3));  p['bt_b'] = w((c,), 0.1)
    p['attA_w'] = w((1, c, 3, 3));     p['attA_b'] = w((1,), 0.1)
    p['attB_w'] = w((1, c, 3, 3));     p['attB_b'] = w((1,), 0.1)
    p['style1_w'] = w((c // 2, c, 3, 3)); p['style1_b'] = w((c // 2,), 0.1)
    p['style2_w'] = w((c // 2, c, 3, 3)); p['style2_b'] = w((c // 2,), 0.1)
    p['lin_w'] = w((2 * c, c // 2));   p['lin_b'] = w((2 * c,), 0.1)
    return p


# ----------------------------------------------------------------------------
# Pure-JAX NCHW reference (mirrors the PyTorch forward)
# ----------------------------------------------------------------------------
def ref_forward(inp, p, c):
    eps = 1e-6

    def ln2d(x, w, b):
        mu = jnp.mean(x, axis=1, keepdims=True)
        var = jnp.mean((x - mu) ** 2, axis=1, keepdims=True)
        return (x - mu) / jnp.sqrt(var + eps) * w[None, :, None, None] + b[None, :, None, None]

    def conv(x, w, b, groups=1, pad=0):
        y = jax.lax.conv_general_dilated(
            x, w, window_strides=(1, 1), padding=[(pad, pad), (pad, pad)],
            dimension_numbers=('NCHW', 'OIHW', 'NCHW'),
            feature_group_count=groups)
        return y + b[None, :, None, None]

    x = ln2d(inp, p['norm1_w'], p['norm1_b'])
    x = conv(x, p['conv1_w'], p['conv1_b'])
    x = conv(x, p['conv2_w'], p['conv2_b'], groups=2 * c, pad=1)
    a, bb = jnp.split(x, 2, axis=1)
    x = a * bb
    pooled = jnp.mean(x, axis=(2, 3), keepdims=True)
    x = x * conv(pooled, p['sca_w'], p['sca_b'])
    x1 = conv(x, p['conv3_w'], p['conv3_b'])

    sf1 = jax.nn.relu(conv(x1, p['style1_w'], p['style1_b'], pad=1))
    sf2 = jax.nn.relu(conv(x1, p['style2_w'], p['style2_b'], pad=1))
    gfeat = jnp.mean(sf1, axis=(2, 3))
    style = jnp.dot(gfeat, p['lin_w'].T) + p['lin_b']
    s_mean = style[:, :c]
    s_std = style[:, c:]

    gamma_r = conv(sf1, p['gr_w'], p['gr_b'], pad=1)
    beta_r = conv(sf1, p['br_w'], p['br_b'], pad=1)
    gamma_t = conv(sf2, p['gt_w'], p['gt_b'], pad=1)
    beta_t = conv(sf2, p['bt_w'], p['bt_b'], pad=1)

    out_T = x1 * (1.0 + gamma_t) + beta_t
    out_style = s_std[:, :, None, None] * inp + s_mean[:, :, None, None]
    att_B = jax.nn.sigmoid(conv(x1, p['attB_w'], p['attB_b'], pad=1))
    step1 = (1.0 - att_B) * out_T + att_B * out_style
    y = step1 + inp

    z = conv(ln2d(y, p['norm2_w'], p['norm2_b']), p['conv4_w'], p['conv4_b'])
    a, bb = jnp.split(z, 2, axis=1)
    z = conv(a * bb, p['conv5_w'], p['conv5_b'])
    att_A = jax.nn.sigmoid(conv(z, p['attA_w'], p['attA_b'], pad=1))
    out_R = z * (1.0 + gamma_r) + beta_r
    step2 = att_A * out_R + (1.0 - att_A) * step1
    return step2 + y


if __name__ == "__main__":
    key = jax.random.PRNGKey(0)
    B, c, H, W = 2, 4, 16, 16
    kx, kp = jax.random.split(key)
    inp = jax.random.normal(kx, (B, c, H, W), jnp.float32)
    params = init_params(kp, c)

    out = jax.block_until_ready(ncs_block_pallas(inp, params, c))
    ref = ref_forward(inp, params, c)

    err = float(jnp.max(jnp.abs(out - ref)))
    assert bool(jnp.isfinite(out).all()), "non-finite output"
    assert err < 3e-2, f"mismatch vs reference, max abs err = {err}"
    print("KERNEL_OK")
</pallas_src>

<mosaic_0001>
module attributes {stable_mosaic.version = 11 : i64} {
  func.func @ncs_kernel(%arg0: i32, %arg1: memref<1x4x256xf32, #tpu.memory_space<vmem>>, %arg2: memref<2x256xf32, #tpu.memory_space<vmem>>, %arg3: memref<8x4xbf16, #tpu.memory_space<vmem>>, %arg4: memref<9x8x1xf32, #tpu.memory_space<vmem>>, %arg5: memref<4x4xbf16, #tpu.memory_space<vmem>>, %arg6: memref<4x4xbf16, #tpu.memory_space<vmem>>, %arg7: memref<5x72xf32, #tpu.memory_space<vmem>>, %arg8: memref<8x72xf32, #tpu.memory_space<vmem>>, %arg9: memref<8x72xf32, #tpu.memory_space<vmem>>, %arg10: memref<9x4x1xf32, #tpu.memory_space<vmem>>, %arg11: memref<8x4xbf16, #tpu.memory_space<vmem>>, %arg12: memref<4x4xbf16, #tpu.memory_space<vmem>>, %arg13: memref<8x2xbf16, #tpu.memory_space<vmem>>, %arg14: memref<88x1xf32, #tpu.memory_space<vmem>>, %arg15: memref<1x4x256xf32, #tpu.memory_space<vmem>>, %arg16: memref<72x256xf32, #tpu.memory_space<vmem>>) attributes {dimension_semantics = [#tpu.dimension_semantics<parallel>], iteration_bounds = array<i64: 2>, scalar_prefetch = 0 : i64, scratch_operands = 1 : i64, tpu.core_type = #tpu.core_type<tc>, window_params = [{transform_indices = @transform_0, window_bounds = array<i64: 1, 4, 256>}, {pipeline_mode = #tpu.pipeline_mode<synchronous>, transform_indices = @transform_1, window_bounds = array<i64: 2, 256>}, {pipeline_mode = #tpu.pipeline_mode<synchronous>, transform_indices = @transform_2, window_bounds = array<i64: 8, 4>}, {pipeline_mode = #tpu.pipeline_mode<synchronous>, transform_indices = @transform_3, window_bounds = array<i64: 9, 8, 1>}, {pipeline_mode = #tpu.pipeline_mode<synchronous>, transform_indices = @transform_4, window_bounds = array<i64: 4, 4>}, {pipeline_mode = #tpu.pipeline_mode<synchronous>, transform_indices = @transform_5, window_bounds = array<i64: 4, 4>}, {pipeline_mode = #tpu.pipeline_mode<synchronous>, transform_indices = @transform_6, window_bounds = array<i64: 5, 72>}, {pipeline_mode = #tpu.pipeline_mode<synchronous>, transform_indices = @transform_7, window_bounds = array<i64: 8, 72>}, {pipeline_mode = #tpu.pipeline_mode<synchronous>, transform_indices = @transform_8, window_bounds = array<i64: 8, 72>}, {pipeline_mode = #tpu.pipeline_mode<synchronous>, transform_indices = @transform_9, window_bounds = array<i64: 9, 4, 1>}, {pipeline_mode = #tpu.pipeline_mode<synchronous>, transform_indices = @transform_10, window_bounds = array<i64: 8, 4>}, {pipeline_mode = #tpu.pipeline_mode<synchronous>, transform_indices = @transform_11, window_bounds = array<i64: 4, 4>}, {pipeline_mode = #tpu.pipeline_mode<synchronous>, transform_indices = @transform_12, window_bounds = array<i64: 8, 2>}, {pipeline_mode = #tpu.pipeline_mode<synchronous>, transform_indices = @transform_13, window_bounds = array<i64: 88, 1>}, {transform_indices = @transform_14, window_bounds = array<i64: 1, 4, 256>}]} {
    %c0 = arith.constant 0 : index
    %c0_0 = arith.constant 0 : index
    %c0_1 = arith.constant 0 : index
    %0 = vector.load %arg1[%c0, %c0_0, %c0_1] : memref<1x4x256xf32, #tpu.memory_space<vmem>>, vector<1x4x256xf32>
    %1 = vector.shape_cast %0 : vector<1x4x256xf32> to vector<4x256xf32>
    %c0_2 = arith.constant 0 : index
    %c0_3 = arith.constant 0 : index
    %2 = vector.load %arg14[%c0_2, %c0_3] : memref<88x1xf32, #tpu.memory_space<vmem>>, vector<88x1xf32>
    %c0_4 = arith.constant 0 : index
    %c0_5 = arith.constant 0 : index
    %3 = vector.load %arg2[%c0_4, %c0_5] : memref<2x256xf32, #tpu.memory_space<vmem>>, vector<1x256xf32>
    %c1 = arith.constant 1 : index
    %c0_6 = arith.constant 0 : index
    %4 = vector.load %arg2[%c1, %c0_6] : memref<2x256xf32, #tpu.memory_space<vmem>>, vector<1x256xf32>
    %cst = arith.constant 1.000000e+00 : f32
    %5 = vector.broadcast %cst : f32 to vector<1x256xf32>
    %6 = arith.cmpf oge, %3, %5 : vector<1x256xf32>
    %cst_7 = arith.constant 1.000000e+00 : f32
    %7 = vector.broadcast %cst_7 : f32 to vector<1x256xf32>
    %8 = arith.cmpf oge, %4, %7 : vector<1x256xf32>
    %9 = arith.andi %6, %8 : vector<1x256xi1>
    %10 = arith.extui %9 : vector<1x256xi1> to vector<1x256xi32>
    %11 = arith.sitofp %10 : vector<1x256xi32> to vector<1x256xf32>
    %cst_8 = arith.constant 1.000000e+00 : f32
    %12 = vector.broadcast %cst_8 : f32 to vector<1x256xf32>
    %13 = arith.cmpf oge, %3, %12 : vector<1x256xf32>
    %14 = arith.extui %13 : vector<1x256xi1> to vector<1x256xi32>
    %15 = arith.sitofp %14 : vector<1x256xi32> to vector<1x256xf32>
    %cst_9 = arith.constant 1.000000e+00 : f32
    %16 = vector.broadcast %cst_9 : f32 to vector<1x256xf32>
    %17 = arith.cmpf oge, %3, %16 : vector<1x256xf32>
    %cst_10 = arith.constant 1.500000e+01 : f32
    %18 = vector.broadcast %cst_10 : f32 to vector<1x256xf32>
    %19 = arith.cmpf olt, %4, %18 : vector<1x256xf32>
    %20 = arith.andi %17, %19 : vector<1x256xi1>
    %21 = arith.extui %20 : vector<1x256xi1> to vector<1x256xi32>
    %22 = arith.sitofp %21 : vector<1x256xi32> to vector<1x256xf32>
    %cst_11 = arith.constant 1.000000e+00 : f32
    %23 = vector.broadcast %cst_11 : f32 to vector<1x256xf32>
    %24 = arith.cmpf oge, %4, %23 : vector<1x256xf32>
    %25 = arith.extui %24 : vector<1x256xi1> to vector<1x256xi32>
    %26 = arith.sitofp %25 : vector<1x256xi32> to vector<1x256xf32>
    %cst_12 = arith.constant 1.500000e+01 : f32
    %27 = vector.broadcast %cst_12 : f32 to vector<1x256xf32>
    %28 = arith.cmpf olt, %4, %27 : vector<1x256xf32>
    %29 = arith.extui %28 : vector<1x256xi1> to vector<1x256xi32>
    %30 = arith.sitofp %29 : vector<1x256xi32> to vector<1x256xf32>
    %cst_13 = arith.constant 1.500000e+01 : f32
    %31 = vector.broadcast %cst_13 : f32 to vector<1x256xf32>
    %32 = arith.cmpf olt, %3, %31 : vector<1x256xf32>
    %cst_14 = arith.constant 1.000000e+00 : f32
    %33 = vector.broadcast %cst_14 : f32 to vector<1x256xf32>
    %34 = arith.cmpf oge, %4, %33 : vector<1x256xf32>
    %35 = arith.andi %32, %34 : vector<1x256xi1>
    %36 = arith.extui %35 : vector<1x256xi1> to vector<1x256xi32>
    %37 = arith.sitofp %36 : vector<1x256xi32> to vector<1x256xf32>
    %cst_15 = arith.constant 1.500000e+01 : f32
    %38 = vector.broadcast %cst_15 : f32 to vector<1x256xf32>
    %39 = arith.cmpf olt, %3, %38 : vector<1x256xf32>
    %40 = arith.extui %39 : vector<1x256xi1> to vector<1x256xi32>
    %41 = arith.sitofp %40 : vector<1x256xi32> to vector<1x256xf32>
    %cst_16 = arith.constant 1.500000e+01 : f32
    %42 = vector.broadcast %cst_16 : f32 to vector<1x256xf32>
    %43 = arith.cmpf olt, %3, %42 : vector<1x256xf32>
    %cst_17 = arith.constant 1.500000e+01 : f32
    %44 = vector.broadcast %cst_17 : f32 to vector<1x256xf32>
    %45 = arith.cmpf olt, %4, %44 : vector<1x256xf32>
    %46 = arith.andi %43, %45 : vector<1x256xi1>
    %47 = arith.extui %46 : vector<1x256xi1> to vector<1x256xi32>
    %48 = arith.sitofp %47 : vector<1x256xi32> to vector<1x256xf32>
    %cst_18 = arith.constant dense<0.000000e+00> : vector<256xf32>
    %49 = vector.multi_reduction <add>, %1, %cst_18 [0] : vector<4x256xf32> to vector<256xf32>
    %50 = vector.shape_cast %49 : vector<256xf32> to vector<1x256xf32>
    %cst_19 = arith.constant 4.000000e+00 : f32
    %51 = vector.broadcast %cst_19 : f32 to vector<1x256xf32>
    %52 = arith.divf %50, %51 : vector<1x256xf32>
    %53 = vector.broadcast %52 : vector<1x256xf32> to vector<4x256xf32>
    %54 = arith.subf %1, %53 : vector<4x256xf32>
    %55 = arith.mulf %54, %54 : vector<4x256xf32>
    %cst_20 = arith.constant dense<0.000000e+00> : vector<256xf32>
    %56 = vector.multi_reduction <add>, %55, %cst_20 [0] : vector<4x256xf32> to vector<256xf32>
    %57 = vector.shape_cast %56 : vector<256xf32> to vector<1x256xf32>
    %cst_21 = arith.constant 4.000000e+00 : f32
    %58 = vector.broadcast %cst_21 : f32 to vector<1x256xf32>
    %59 = arith.divf %57, %58 : vector<1x256xf32>
    %cst_22 = arith.constant 9.99999997E-7 : f32
    %60 = vector.broadcast %cst_22 : f32 to vector<1x256xf32>
    %61 = arith.addf %59, %60 : vector<1x256xf32>
    %62 = math.rsqrt %61 : vector<1x256xf32>
    %63 = vector.broadcast %62 : vector<1x256xf32> to vector<4x256xf32>
    %64 = arith.mulf %54, %63 : vector<4x256xf32>
    %c0_23 = arith.constant 0 : index
    %c0_24 = arith.constant 0 : index
    %65 = vector.load %arg3[%c0_23, %c0_24] : memref<8x4xbf16, #tpu.memory_space<vmem>>, vector<8x4xbf16>
    %66 = arith.extf %65 : vector<8x4xbf16> to vector<8x4xf32>
    %cst_25 = arith.constant dense<0.000000e+00> : vector<8x256xf32>
    %67 = tpu.matmul %66, %64, %cst_25 {dimension_numbers = #tpu.dot_dimension_numbers<[1], [0], [0], [1], [0, 0, 1, 1], [], []>} : vector<8x4xf32>, vector<4x256xf32>, vector<8x256xf32> -> vector<8x256xf32>
    %68 = vector.extract_strided_slice %2 {offsets = [0, 0], sizes = [8, 1], strides = [1, 1]} : vector<88x1xf32> to vector<8x1xf32>
    %69 = vector.broadcast %68 : vector<8x1xf32> to vector<8x256xf32>
    %70 = arith.addf %67, %69 : vector<8x256xf32>
    %c4 = arith.constant 4 : index
    %c0_26 = arith.constant 0 : index
    %c0_27 = arith.constant 0 : index
    %71 = vector.load %arg4[%c4, %c0_26, %c0_27] : memref<9x8x1xf32, #tpu.memory_space<vmem>>, vector<1x8x1xf32>
    %72 = vector.shape_cast %71 : vector<1x8x1xf32> to vector<8x1xf32>
    %73 = vector.broadcast %72 : vector<8x1xf32> to vector<8x256xf32>
    %74 = arith.mulf %73, %70 : vector<8x256xf32>
    %c0_28 = arith.constant 0 : index
    %c0_29 = arith.constant 0 : index
    %c0_30 = arith.constant 0 : index
    %75 = vector.load %arg4[%c0_28, %c0_29, %c0_30] : memref<9x8x1xf32, #tpu.memory_space<vmem>>, vector<1x8x1xf32>
    %76 = vector.shape_cast %75 : vector<1x8x1xf32> to vector<8x1xf32>
    %c17_i32 = arith.constant 17 : i32
    %77 = tpu.dynamic_rotate %70 by %c17_i32 dim 1 : vector<8x256xf32>, i32 -> vector<8x256xf32>
    %78 = vector.broadcast %11 : vector<1x256xf32> to vector<8x256xf32>
    %79 = arith.mulf %77, %78 : vector<8x256xf32>
    %80 = vector.broadcast %76 : vector<8x1xf32> to vector<8x256xf32>
    %81 = arith.mulf %80, %79 : vector<8x256xf32>
    %82 = arith.addf %74, %81 : vector<8x256xf32>
    %c1_31 = arith.constant 1 : index
    %c0_32 = arith.constant 0 : index
    %c0_33 = arith.constant 0 : index
    %83 = vector.load %arg4[%c1_31, %c0_32, %c0_33] : memref<9x8x1xf32, #tpu.memory_space<vmem>>, vector<1x8x1xf32>
    %84 = vector.shape_cast %83 : vector<1x8x1xf32> to vector<8x1xf32>
    %c16_i32 = arith.constant 16 : i32
    %85 = tpu.dynamic_rotate %70 by %c16_i32 dim 1 : vector<8x256xf32>, i32 -> vector<8x256xf32>
    %86 = vector.broadcast %15 : vector<1x256xf32> to vector<8x256xf32>
    %87 = arith.mulf %85, %86 : vector<8x256xf32>
    %88 = vector.broadcast %84 : vector<8x1xf32> to vector<8x256xf32>
    %89 = arith.mulf %88, %87 : vector<8x256xf32>
    %90 = arith.addf %82, %89 : vector<8x256xf32>
    %c2 = arith.constant 2 : index
    %c0_34 = arith.constant 0 : index
    %c0_35 = arith.constant 0 : index
    %91 = vector.load %arg4[%c2, %c0_34, %c0_35] : memref<9x8x1xf32, #tpu.memory_space<vmem>>, vector<1x8x1xf32>
    %92 = vector.shape_cast %91 : vector<1x8x1xf32> to vector<8x1xf32>
    %c15_i32 = arith.constant 15 : i32
    %93 = tpu.dynamic_rotate %70 by %c15_i32 dim 1 : vector<8x256xf32>, i32 -> vector<8x256xf32>
    %94 = vector.broadcast %22 : vector<1x256xf32> to vector<8x256xf32>
    %95 = arith.mulf %93, %94 : vector<8x256xf32>
    %96 = vector.broadcast %92 : vector<8x1xf32> to vector<8x256xf32>
    %97 = arith.mulf %96, %95 : vector<8x256xf32>
    %98 = arith.addf %90, %97 : vector<8x256xf32>
    %c3 = arith.constant 3 : index
    %c0_36 = arith.constant 0 : index
    %c0_37 = arith.constant 0 : index
    %99 = vector.load %arg4[%c3, %c0_36, %c0_37] : memref<9x8x1xf32, #tpu.memory_space<vmem>>, vector<1x8x1xf32>
    %100 = vector.shape_cast %99 : vector<1x8x1xf32> to vector<8x1xf32>
    %c1_i32 = arith.constant 1 : i32
    %101 = tpu.dynamic_rotate %70 by %c1_i32 dim 1 : vector<8x256xf32>, i32 -> vector<8x256xf32>
    %102 = vector.broadcast %26 : vector<1x256xf32> to vector<8x256xf32>
    %103 = arith.mulf %101, %102 : vector<8x256xf32>
    %104 = vector.broadcast %100 : vector<8x1xf32> to vector<8x256xf32>
    %105 = arith.mulf %104, %103 : vector<8x256xf32>
    %106 = arith.addf %98, %105 : vector<8x256xf32>
    %c5 = arith.constant 5 : index
    %c0_38 = arith.constant 0 : index
    %c0_39 = arith.constant 0 : index
    %107 = vector.load %arg4[%c5, %c0_38, %c0_39] : memref<9x8x1xf32, #tpu.memory_space<vmem>>, vector<1x8x1xf32>
    %108 = vector.shape_cast %107 : vector<1x8x1xf32> to vector<8x1xf32>
    %c255_i32 = arith.constant 255 : i32
    %109 = tpu.dynamic_rotate %70 by %c255_i32 dim 1 : vector<8x256xf32>, i32 -> vector<8x256xf32>
    %110 = vector.broadcast %30 : vector<1x256xf32> to vector<8x256xf32>
    %111 = arith.mulf %109, %110 : vector<8x256xf32>
    %112 = vector.broadcast %108 : vector<8x1xf32> to vector<8x256xf32>
    %113 = arith.mulf %112, %111 : vector<8x256xf32>
    %114 = arith.addf %106, %113 : vector<8x256xf32>
    %c6 = arith.constant 6 : index
    %c0_40 = arith.constant 0 : index
    %c0_41 = arith.constant 0 : index
    %115 = vector.load %arg4[%c6, %c0_40, %c0_41] : memref<9x8x1xf32, #tpu.memory_space<vmem>>, vector<1x8x1xf32>
    %116 = vector.shape_cast %115 : vector<1x8x1xf32> to vector<8x1xf32>
    %c241_i32 = arith.constant 241 : i32
    %117 = tpu.dynamic_rotate %70 by %c241_i32 dim 1 : vector<8x256xf32>, i32 -> vector<8x256xf32>
    %118 = vector.broadcast %37 : vector<1x256xf32> to vector<8x256xf32>
    %119 = arith.mulf %117, %118 : vector<8x256xf32>
    %120 = vector.broadcast %116 : vector<8x1xf32> to vector<8x256xf32>
    %121 = arith.mulf %120, %119 : vector<8x256xf32>
    %122 = arith.addf %114, %121 : vector<8x256xf32>
    %c7 = arith.constant 7 : index
    %c0_42 = arith.constant 0 : index
    %c0_43 = arith.constant 0 : index
    %123 = vector.load %arg4[%c7, %c0_42, %c0_43] : memref<9x8x1xf32, #tpu.memory_space<vmem>>, vector<1x8x1xf32>
    %124 = vector.shape_cast %123 : vector<1x8x1xf32> to vector<8x1xf32>
    %c240_i32 = arith.constant 240 : i32
    %125 = tpu.dynamic_rotate %70 by %c240_i32 dim 1 : vector<8x256xf32>, i32 -> vector<8x256xf32>
    %126 = vector.broadcast %41 : vector<1x256xf32> to vector<8x256xf32>
    %127 = arith.mulf %125, %126 : vector<8x256xf32>
    %128 = vector.broadcast %124 : vector<8x1xf32> to vector<8x256xf32>
    %129 = arith.mulf %128, %127 : vector<8x256xf32>
    %130 = arith.addf %122, %129 : vector<8x256xf32>
    %c8 = arith.constant 8 : index
    %c0_44 = arith.constant 0 : index
    %c0_45 = arith.constant 0 : index
    %131 = vector.load %arg4[%c8, %c0_44, %c0_45] : memref<9x8x1xf32, #tpu.memory_space<vmem>>, vector<1x8x1xf32>
    %132 = vector.shape_cast %131 : vector<1x8x1xf32> to vector<8x1xf32>
    %c239_i32 = arith.constant 239 : i32
    %133 = tpu.dynamic_rotate %70 by %c239_i32 dim 1 : vector<8x256xf32>, i32 -> vector<8x256xf32>
    %134 = vector.broadcast %48 : vector<1x256xf32> to vector<8x256xf32>
    %135 = arith.mulf %133, %134 : vector<8x256xf32>
    %136 = vector.broadcast %132 : vector<8x1xf32> to vector<8x256xf32>
    %137 = arith.mulf %136, %135 : vector<8x256xf32>
    %138 = arith.addf %130, %137 : vector<8x256xf32>
    %139 = vector.extract_strided_slice %2 {offsets = [8, 0], sizes = [8, 1], strides = [1, 1]} : vector<88x1xf32> to vector<8x1xf32>
    %140 = vector.broadcast %139 : vector<8x1xf32> to vector<8x256xf32>
    %141 = arith.addf %138, %140 : vector<8x256xf32>
    %142 = vector.extract_strided_slice %141 {offsets = [0, 0], sizes = [4, 256], strides = [1, 1]} : vector<8x256xf32> to vector<4x256xf32>
    %143 = vector.extract_strided_slice %141 {offsets = [4, 0], sizes = [4, 256], strides = [1, 1]} : vector<8x256xf32> to vector<4x256xf32>
    %144 = arith.mulf %142, %143 : vector<4x256xf32>
    %cst_46 = arith.constant dense<0.000000e+00> : vector<4xf32>
    %145 = vector.multi_reduction <add>, %144, %cst_46 [1] : vector<4x256xf32> to vector<4xf32>
    %146 = vector.shape_cast %145 : vector<4xf32> to vector<4x1xf32>
    %cst_47 = arith.constant 2.560000e+02 : f32
    %147 = vector.broadcast %cst_47 : f32 to vector<4x1xf32>
    %148 = arith.divf %146, %147 : vector<4x1xf32>
    %c0_48 = arith.constant 0 : index
    %c0_49 = arith.constant 0 : index
    %149 = vector.load %arg6[%c0_48, %c0_49] : memref<4x4xbf16, #tpu.memory_space<vmem>>, vector<4x4xbf16>
    %150 = arith.extf %149 : vector<4x4xbf16> to vector<4x4xf32>
    %cst_50 = arith.constant dense<0.000000e+00> : vector<4x1xf32>
    %151 = tpu.matmul %150, %148, %cst_50 {dimension_numbers = #tpu.dot_dimension_numbers<[1], [0], [0], [1], [0, 0, 1, 1], [], []>} : vector<4x4xf32>, vector<4x1xf32>, vector<4x1xf32> -> vector<4x1xf32>
    %152 = vector.extract_strided_slice %2 {offsets = [24, 0], sizes = [4, 1], strides = [1, 1]} : vector<88x1xf32> to vector<4x1xf32>
    %153 = arith.addf %151, %152 : vector<4x1xf32>
    %154 = vector.broadcast %153 : vector<4x1xf32> to vector<4x256xf32>
    %155 = arith.mulf %144, %154 : vector<4x256xf32>
    %c0_51 = arith.constant 0 : index
    %c0_52 = arith.constant 0 : index
    %156 = vector.load %arg5[%c0_51, %c0_52] : memref<4x4xbf16, #tpu.memory_space<vmem>>, vector<4x4xbf16>
    %157 = arith.extf %156 : vector<4x4xbf16> to vector<4x4xf32>
    %cst_53 = arith.constant dense<0.000000e+00> : vector<4x256xf32>
    %158 = tpu.matmul %157, %155, %cst_53 {dimension_numbers = #tpu.dot_dimension_numbers<[1], [0], [0], [1], [0, 0, 1, 1], [], []>} : vector<4x4xf32>, vector<4x256xf32>, vector<4x256xf32> -> vector<4x256xf32>
    %159 = vector.extract_strided_slice %2 {offsets = [16, 0], sizes = [4, 1], strides = [1, 1]} : vector<88x1xf32> to vector<4x1xf32>
    %160 = vector.broadcast %159 : vector<4x1xf32> to vector<4x256xf32>
    %161 = arith.addf %158, %160 : vector<4x256xf32>
    %162 = vector.extract_strided_slice %2 {offsets = [32, 0], sizes = [5, 1], strides = [1, 1]} : vector<88x1xf32> to vector<5x1xf32>
    %cst_54 = arith.constant 0.000000e+00 : f32
    %163 = vector.broadcast %cst_54 : f32 to vector<4x256xf32>
    %c17_i32_55 = arith.constant 17 : i32
    %164 = tpu.dynamic_rotate %161 by %c17_i32_55 dim 1 : vector<4x256xf32>, i32 -> vector<4x256xf32>
    %165 = vector.broadcast %11 : vector<1x256xf32> to vector<4x256xf32>
    %166 = arith.mulf %164, %165 : vector<4x256xf32>
    %c0_56 = arith.constant 0 : index
    %c0_57 = arith.constant 0 : index
    %167 = vector.load %arg16[%c0_56, %c0_57] : memref<72x256xf32, #tpu.memory_space<vmem>>, vector<4x256xf32>
    tpu.vector_store %arg16[%c0_56, %c0_57], %166 {strides = array<i32>} : memref<72x256xf32, #tpu.memory_space<vmem>>, vector<4x256xf32>,
    %c4_58 = arith.constant 4 : index
    %c0_59 = arith.constant 0 : index
    %168 = vector.load %arg16[%c4_58, %c0_59] : memref<72x256xf32, #tpu.memory_space<vmem>>, vector<4x256xf32>
    tpu.vector_store %arg16[%c4_58, %c0_59], %163 {strides = array<i32>} : memref<72x256xf32, #tpu.memory_space<vmem>>, vector<4x256xf32>,
    %c16_i32_60 = arith.constant 16 : i32
    %169 = tpu.dynamic_rotate %161 by %c16_i32_60 dim 1 : vector<4x256xf32>, i32 -> vector<4x256xf32>
    %170 = vector.broadcast %15 : vector<1x256xf32> to vector<4x256xf32>
    %171 = arith.mulf %169, %170 : vector<4x256xf32>
    %c8_61 = arith.constant 8 : index
    %c0_62 = arith.constant 0 : index
    %172 = vector.load %arg16[%c8_61, %c0_62] : memref<72x256xf32, #tpu.memory_space<vmem>>, vector<4x256xf32>
    tpu.vector_store %arg16[%c8_61, %c0_62], %171 {strides = array<i32>} : memref<72x256xf32, #tpu.memory_space<vmem>>, vector<4x256xf32>,
    %c12 = arith.constant 12 : index
    %c0_63 = arith.constant 0 : index
    %173 = vector.load %arg16[%c12, %c0_63] : memref<72x256xf32, #tpu.memory_space<vmem>>, vector<4x256xf32>
    tpu.vector_store %arg16[%c12, %c0_63], %163 {strides = array<i32>} : memref<72x256xf32, #tpu.memory_space<vmem>>, vector<4x256xf32>,
    %c15_i32_64 = arith.constant 15 : i32
    %174 = tpu.dynamic_rotate %161 by %c15_i32_64 dim 1 : vector<4x256xf32>, i32 -> vector<4x256xf32>
    %175 = vector.broadcast %22 : vector<1x256xf32> to vector<4x256xf32>
    %176 = arith.mulf %174, %175 : vector<4x256xf32>
    %c16 = arith.constant 16 : index
    %c0_65 = arith.constant 0 : index
    %177 = vector.load %arg16[%c16, %c0_65] : memref<72x256xf32, #tpu.memory_space<vmem>>, vector<4x256xf32>
    tpu.vector_store %arg16[%c16, %c0_65], %176 {strides = array<i32>} : memref<72x256xf32, #tpu.memory_space<vmem>>, vector<4x256xf32>,
    %c20 = arith.constant 20 : index
    %c0_66 = arith.constant 0 : index
    %178 = vector.load %arg16[%c20, %c0_66] : memref<72x256xf32, #tpu.memory_space<vmem>>, vector<4x256xf32>
    tpu.vector_store %arg16[%c20, %c0_66], %163 {strides = array<i32>} : memref<72x256xf32, #tpu.memory_space<vmem>>, vector<4x256xf32>,
    %c1_i32_67 = arith.constant 1 : i32
    %179 = tpu.dynamic_rotate %161 by %c1_i32_67 dim 1 : vector<4x256xf32>, i32 -> vector<4x256xf32>
    %180 = vector.broadcast %26 : vector<1x256xf32> to vector<4x256xf32>
    %181 = arith.mulf %179, %180 : vector<4x256xf32>
    %c24 = arith.constant 24 : index
    %c0_68 = arith.constant 0 : index
    %182 = vector.load %arg16[%c24, %c0_68] : memref<72x256xf32, #tpu.memory_space<vmem>>, vector<4x256xf32>
    tpu.vector_store %arg16[%c24, %c0_68], %181 {strides = array<i32>} : memref<72x256xf32, #tpu.memory_space<vmem>>, vector<4x256xf32>,
    %c28 = arith.constant 28 : index
    %c0_69 = arith.constant 0 : index
    %183 = vector.load %arg16[%c28, %c0_69] : memref<72x256xf32, #tpu.memory_space<vmem>>, vector<4x256xf32>
    tpu.vector_store %arg16[%c28, %c0_69], %163 {strides = array<i32>} : memref<72x256xf32, #tpu.memory_space<vmem>>, vector<4x256xf32>,
    %c32 = arith.constant 32 : index
    %c0_70 = arith.constant 0 : index
    %184 = vector.load %arg16[%c32, %c0_70] : memref<72x256xf32, #tpu.memory_space<vmem>>, vector<4x256xf32>
    tpu.vector_store %arg16[%c32, %c0_70], %161 {strides = array<i32>} : memref<72x256xf32, #tpu.memory_space<vmem>>, vector<4x256xf32>,
    %c36 = arith.constant 36 : index
    %c0_71 = arith.constant 0 : index
    %185 = vector.load %arg16[%c36, %c0_71] : memref<72x256xf32, #tpu.memory_space<vmem>>, vector<4x256xf32>
    tpu.vector_store %arg16[%c36, %c0_71], %163 {strides = array<i32>} : memref<72x256xf32, #tpu.memory_space<vmem>>, vector<4x256xf32>,
    %c255_i32_72 = arith.constant 255 : i32
    %186 = tpu.dynamic_rotate %161 by %c255_i32_72 dim 1 : vector<4x256xf32>, i32 -> vector<4x256xf32>
    %187 = vector.broadcast %30 : vector<1x256xf32> to vector<4x256xf32>
    %188 = arith.mulf %186, %187 : vector<4x256xf32>
    %c40 = arith.constant 40 : index
    %c0_73 = arith.constant 0 : index
    %189 = vector.load %arg16[%c40, %c0_73] : memref<72x256xf32, #tpu.memory_space<vmem>>, vector<4x256xf32>
    tpu.vector_store %arg16[%c40, %c0_73], %188 {strides = array<i32>} : memref<72x256xf32, #tpu.memory_space<vmem>>, vector<4x256xf32>,
    %c44 = arith.constant 44 : index
    %c0_74 = arith.constant 0 : index
    %190 = vector.load %arg16[%c44, %c0_74] : memref<72x256xf32, #tpu.memory_space<vmem>>, vector<4x256xf32>
    tpu.vector_store %arg16[%c44, %c0_74], %163 {strides = array<i32>} : memref<72x256xf32, #tpu.memory_space<vmem>>, vector<4x256xf32>,
    %c241_i32_75 = arith.constant 241 : i32
    %191 = tpu.dynamic_rotate %161 by %c241_i32_75 dim 1 : vector<4x256xf32>, i32 -> vector<4x256xf32>
    %192 = vector.broadcast %37 : vector<1x256xf32> to vector<4x256xf32>
    %193 = arith.mulf %191, %192 : vector<4x256xf32>
    %c48 = arith.constant 48 : index
    %c0_76 = arith.constant 0 : index
    %194 = vector.load %arg16[%c48, %c0_76] : memref<72x256xf32, #tpu.memory_space<vmem>>, vector<4x256xf32>
    tpu.vector_store %arg16[%c48, %c0_76], %193 {strides = array<i32>} : memref<72x256xf32, #tpu.memory_space<vmem>>, vector<4x256xf32>,
    %c52 = arith.constant 52 : index
    %c0_77 = arith.constant 0 : index
    %195 = vector.load %arg16[%c52, %c0_77] : memref<72x256xf32, #tpu.memory_space<vmem>>, vector<4x256xf32>
    tpu.vector_store %arg16[%c52, %c0_77], %163 {strides = array<i32>} : memref<72x256xf32, #tpu.memory_space<vmem>>, vector<4x256xf32>,
    %c240_i32_78 = arith.constant 240 : i32
    %196 = tpu.dynamic_rotate %161 by %c240_i32_78 dim 1 : vector<4x256xf32>, i32 -> vector<4x256xf32>
    %197 = vector.broadcast %41 : vector<1x256xf32> to vector<4x256xf32>
    %198 = arith.mulf %196, %197 : vector<4x256xf32>
    %c56 = arith.constant 56 : index
    %c0_79 = arith.constant 0 : index
    %199 = vector.load %arg16[%c56, %c0_79] : memref<72x256xf32, #tpu.memory_space<vmem>>, vector<4x256xf32>
    tpu.vector_store %arg16[%c56, %c0_79], %198 {strides = array<i32>} : memref<72x256xf32, #tpu.memory_space<vmem>>, vector<4x256xf32>,
    %c60 = arith.constant 60 : index
    %c0_80 = arith.constant 0 : index
    %200 = vector.load %arg16[%c60, %c0_80] : memref<72x256xf32, #tpu.memory_space<vmem>>, vector<4x256xf32>
    tpu.vector_store %arg16[%c60, %c0_80], %163 {strides = array<i32>} : memref<72x256xf32, #tpu.memory_space<vmem>>, vector<4x256xf32>,
    %c239_i32_81 = arith.constant 239 : i32
    %201 = tpu.dynamic_rotate %161 by %c239_i32_81 dim 1 : vector<4x256xf32>, i32 -> vector<4x256xf32>
    %202 = vector.broadcast %48 : vector<1x256xf32> to vector<4x256xf32>
    %203 = arith.mulf %201, %202 : vector<4x256xf32>
    %c64 = arith.constant 64 : index
    %c0_82 = arith.constant 0 : index
    %204 = vector.load %arg16[%c64, %c0_82] : memref<72x256xf32, #tpu.memory_space<vmem>>, vector<4x256xf32>
    tpu.vector_store %arg16[%c64, %c0_82], %203 {strides = array<i32>} : memref<72x256xf32, #tpu.memory_space<vmem>>, vector<4x256xf32>,
    %c68 = arith.constant 68 : index
    %c0_83 = arith.constant 0 : index
    %205 = vector.load %arg16[%c68, %c0_83] : memref<72x256xf32, #tpu.memory_space<vmem>>, vector<4x256xf32>
    tpu.vector_store %arg16[%c68, %c0_83], %163 {strides = array<i32>} : memref<72x256xf32, #tpu.memory_space<vmem>>, vector<4x256xf32>,
    %c0_84 = arith.constant 0 : index
    %c0_85 = arith.constant 0 : index
    %206 = vector.load %arg16[%c0_84, %c0_85] : memref<72x256xf32, #tpu.memory_space<vmem>>, vector<72x256xf32>
    %c0_86 = arith.constant 0 : index
    %c0_87 = arith.constant 0 : index
    %207 = vector.load %arg7[%c0_86, %c0_87] : memref<5x72xf32, #tpu.memory_space<vmem>>, vector<5x72xf32>
    %cst_88 = arith.constant dense<0.000000e+00> : vector<5x256xf32>
    %208 = tpu.matmul %207, %206, %cst_88 {dimension_numbers = #tpu.dot_dimension_numbers<[1], [0], [0], [1], [0, 0, 1, 1], [], []>} : vector<5x72xf32>, vector<72x256xf32>, vector<5x256xf32> -> vector<5x256xf32>
    %209 = vector.broadcast %162 : vector<5x1xf32> to vector<5x256xf32>
    %210 = arith.addf %208, %209 : vector<5x256xf32>
    %211 = vector.extract_strided_slice %210 {offsets = [0, 0], sizes = [2, 256], strides = [1, 1]} : vector<5x256xf32> to vector<2x256xf32>
    %cst_89 = arith.constant 0.000000e+00 : f32
    %212 = vector.broadcast %cst_89 : f32 to vector<2x256xf32>
    %213 = arith.maximumf %211, %212 : vector<2x256xf32>
    %214 = vector.extract_strided_slice %210 {offsets = [2, 0], sizes = [2, 256], strides = [1, 1]} : vector<5x256xf32> to vector<2x256xf32>
    %cst_90 = arith.constant 0.000000e+00 : f32
    %215 = vector.broadcast %cst_90 : f32 to vector<2x256xf32>
    %216 = arith.maximumf %214, %215 : vector<2x256xf32>
    %217 = vector.extract_strided_slice %210 {offsets = [4, 0], sizes = [1, 256], strides = [1, 1]} : vector<5x256xf32> to vector<1x256xf32>
    %218 = arith.negf %217 : vector<1x256xf32>
    %219 = math.exp %218 : vector<1x256xf32>
    %cst_91 = arith.constant 1.000000e+00 : f32
    %220 = vector.broadcast %cst_91 : f32 to vector<1x256xf32>
    %221 = arith.addf %220, %219 : vector<1x256xf32>
    %222 = arith.divf %220, %221 : vector<1x256xf32>
    %cst_92 = arith.constant dense<0.000000e+00> : vector<2xf32>
    %223 = vector.multi_reduction <add>, %213, %cst_92 [1] : vector<2x256xf32> to vector<2xf32>
    %224 = vector.shape_cast %223 : vector<2xf32> to vector<2x1xf32>
    %cst_93 = arith.constant 2.560000e+02 : f32
    %225 = vector.broadcast %cst_93 : f32 to vector<2x1xf32>
    %226 = arith.divf %224, %225 : vector<2x1xf32>
    %c0_94 = arith.constant 0 : index
    %c0_95 = arith.constant 0 : index
    %227 = vector.load %arg13[%c0_94, %c0_95] : memref<8x2xbf16, #tpu.memory_space<vmem>>, vector<8x2xbf16>
    %228 = arith.extf %227 : vector<8x2xbf16> to vector<8x2xf32>
    %cst_96 = arith.constant dense<0.000000e+00> : vector<8x1xf32>
    %229 = tpu.matmul %228, %226, %cst_96 {dimension_numbers = #tpu.dot_dimension_numbers<[1], [0], [0], [1], [0, 0, 1, 1], [], []>} : vector<8x2xf32>, vector<2x1xf32>, vector<8x1xf32> -> vector<8x1xf32>
    %230 = vector.extract_strided_slice %2 {offsets = [64, 0], sizes = [8, 1], strides = [1, 1]} : vector<88x1xf32> to vector<8x1xf32>
    %231 = arith.addf %229, %230 : vector<8x1xf32>
    %232 = vector.extract_strided_slice %231 {offsets = [0, 0], sizes = [4, 1], strides = [1, 1]} : vector<8x1xf32> to vector<4x1xf32>
    %233 = vector.extract_strided_slice %231 {offsets = [4, 0], sizes = [4, 1], strides = [1, 1]} : vector<8x1xf32> to vector<4x1xf32>
    %234 = vector.extract_strided_slice %2 {offsets = [48, 0], sizes = [8, 1], strides = [1, 1]} : vector<88x1xf32> to vector<8x1xf32>
    %cst_97 = arith.constant 0.000000e+00 : f32
    %235 = vector.broadcast %cst_97 : f32 to vector<6x256xf32>
    %c17_i32_98 = arith.constant 17 : i32
    %236 = tpu.dynamic_rotate %216 by %c17_i32_98 dim 1 : vector<2x256xf32>, i32 -> vector<2x256xf32>
    %237 = vector.broadcast %11 : vector<1x256xf32> to vector<2x256xf32>
    %238 = arith.mulf %236, %237 : vector<2x256xf32>
    %c0_99 = arith.constant 0 : index
    %c0_100 = arith.constant 0 : index
    %239 = vector.load %arg16[%c0_99, %c0_100] : memref<72x256xf32, #tpu.memory_space<vmem>>, vector<2x256xf32>
    tpu.vector_store %arg16[%c0_99, %c0_100], %238 {strides = array<i32>} : memref<72x256xf32, #tpu.memory_space<vmem>>, vector<2x256xf32>,
    %c2_101 = arith.constant 2 : index
    %c0_102 = arith.constant 0 : index
    %240 = vector.load %arg16[%c2_101, %c0_102] : memref<72x256xf32, #tpu.memory_space<vmem>>, vector<6x256xf32>
    tpu.vector_store %arg16[%c2_101, %c0_102], %235 {strides = array<i32>} : memref<72x256xf32, #tpu.memory_space<vmem>>, vector<6x256xf32>,
    %c16_i32_103 = arith.constant 16 : i32
    %241 = tpu.dynamic_rotate %216 by %c16_i32_103 dim 1 : vector<2x256xf32>, i32 -> vector<2x256xf32>
    %242 = vector.broadcast %15 : vector<1x256xf32> to vector<2x256xf32>
    %243 = arith.mulf %241, %242 : vector<2x256xf32>
    %c8_104 = arith.constant 8 : index
    %c0_105 = arith.constant 0 : index
    %244 = vector.load %arg16[%c8_104, %c0_105] : memref<72x256xf32, #tpu.memory_space<vmem>>, vector<2x256xf32>
    tpu.vector_store %arg16[%c8_104, %c0_105], %243 {strides = array<i32>} : memref<72x256xf32, #tpu.memory_space<vmem>>, vector<2x256xf32>,
    %c10 = arith.constant 10 : index
    %c0_106 = arith.constant 0 : index
    %245 = vector.load %arg16[%c10, %c0_106] : memref<72x256xf32, #tpu.memory_space<vmem>>, vector<6x256xf32>
    tpu.vector_store %arg16[%c10, %c0_106], %235 {strides = array<i32>} : memref<72x256xf32, #tpu.memory_space<vmem>>, vector<6x256xf32>,
    %c15_i32_107 = arith.constant 15 : i32
    %246 = tpu.dynamic_rotate %216 by %c15_i32_107 dim 1 : vector<2x256xf32>, i32 -> vector<2x256xf32>
    %247 = vector.broadcast %22 : vector<1x256xf32> to vector<2x256xf32>
    %248 = arith.mulf %246, %247 : vector<2x256xf32>
    %c16_108 = arith.constant 16 : index
    %c0_109 = arith.constant 0 : index
    %249 = vector.load %arg16[%c16_108, %c0_109] : memref<72x256xf32, #tpu.memory_space<vmem>>, vector<2x256xf32>
    tpu.vector_store %arg16[%c16_108, %c0_109], %248 {strides = array<i32>} : memref<72x256xf32, #tpu.memory_space<vmem>>, vector<2x256xf32>,
    %c18 = arith.constant 18 : index
    %c0_110 = arith.constant 0 : index
    %250 = vector.load %arg16[%c18, %c0_110] : memref<72x256xf32, #tpu.memory_space<vmem>>, vector<6x256xf32>
    tpu.vector_store %arg16[%c18, %c0_110], %235 {strides = array<i32>} : memref<72x256xf32, #tpu.memory_space<vmem>>, vector<6x256xf32>,
    %c1_i32_111 = arith.constant 1 : i32
    %251 = tpu.dynamic_rotate %216 by %c1_i32_111 dim 1 : vector<2x256xf32>, i32 -> vector<2x256xf32>
    %252 = vector.broadcast %26 : vector<1x256xf32> to vector<2x256xf32>
    %253 = arith.mulf %251, %252 : vector<2x256xf32>
    %c24_112 = arith.constant 24 : index
    %c0_113 = arith.constant 0 : index
    %254 = vector.load %arg16[%c24_112, %c0_113] : memref<72x256xf32, #tpu.memory_space<vmem>>, vector<2x256xf32>
    tpu.vector_store %arg16[%c24_112, %c0_113], %253 {strides = array<i32>} : memref<72x256xf32, #tpu.memory_space<vmem>>, vector<2x256xf32>,
    %c26 = arith.constant 26 : index
    %c0_114 = arith.constant 0 : index
    %255 = vector.load %arg16[%c26, %c0_114] : memref<72x256xf32, #tpu.memory_space<vmem>>, vector<6x256xf32>
    tpu.vector_store %arg16[%c26, %c0_114], %235 {strides = array<i32>} : memref<72x256xf32, #tpu.memory_space<vmem>>, vector<6x256xf32>,
    %c32_115 = arith.constant 32 : index
    %c0_116 = arith.constant 0 : index
    %256 = vector.load %arg16[%c32_115, %c0_116] : memref<72x256xf32, #tpu.memory_space<vmem>>, vector<2x256xf32>
    tpu.vector_store %arg16[%c32_115, %c0_116], %216 {strides = array<i32>} : memref<72x256xf32, #tpu.memory_space<vmem>>, vector<2x256xf32>,
    %c34 = arith.constant 34 : index
    %c0_117 = arith.constant 0 : index
    %257 = vector.load %arg16[%c34, %c0_117] : memref<72x256xf32, #tpu.memory_space<vmem>>, vector<6x256xf32>
    tpu.vector_store %arg16[%c34, %c0_117], %235 {strides = array<i32>} : memref<72x256xf32, #tpu.memory_space<vmem>>, vector<6x256xf32>,
    %c255_i32_118 = arith.constant 255 : i32
    %258 = tpu.dynamic_rotate %216 by %c255_i32_118 dim 1 : vector<2x256xf32>, i32 -> vector<2x256xf32>
    %259 = vector.broadcast %30 : vector<1x256xf32> to vector<2x256xf32>
    %260 = arith.mulf %258, %259 : vector<2x256xf32>
    %c40_119 = arith.constant 40 : index
    %c0_120 = arith.constant 0 : index
    %261 = vector.load %arg16[%c40_119, %c0_120] : memref<72x256xf32, #tpu.memory_space<vmem>>, vector<2x256xf32>
    tpu.vector_store %arg16[%c40_119, %c0_120], %260 {strides = array<i32>} : memref<72x256xf32, #tpu.memory_space<vmem>>, vector<2x256xf32>,
    %c42 = arith.constant 42 : index
    %c0_121 = arith.constant 0 : index
    %262 = vector.load %arg16[%c42, %c0_121] : memref<72x256xf32, #tpu.memory_space<vmem>>, vector<6x256xf32>
    tpu.vector_store %arg16[%c42, %c0_121], %235 {strides = array<i32>} : memref<72x256xf32, #tpu.memory_space<vmem>>, vector<6x256xf32>,
    %c241_i32_122 = arith.constant 241 : i32
    %263 = tpu.dynamic_rotate %216 by %c241_i32_122 dim 1 : vector<2x256xf32>, i32 -> vector<2x256xf32>
    %264 = vector.broadcast %37 : vector<1x256xf32> to vector<2x256xf32>
    %265 = arith.mulf %263, %264 : vector<2x256xf32>
    %c48_123 = arith.constant 48 : index
    %c0_124 = arith.constant 0 : index
    %266 = vector.load %arg16[%c48_123, %c0_124] : memref<72x256xf32, #tpu.memory_space<vmem>>, vector<2x256xf32>
    tpu.vector_store %arg16[%c48_123, %c0_124], %265 {strides = array<i32>} : memref<72x256xf32, #tpu.memory_space<vmem>>, vector<2x256xf32>,
    %c50 = arith.constant 50 : index
    %c0_125 = arith.constant 0 : index
    %267 = vector.load %arg16[%c50, %c0_125] : memref<72x256xf32, #tpu.memory_space<vmem>>, vector<6x256xf32>
    tpu.vector_store %arg16[%c50, %c0_125], %235 {strides = array<i32>} : memref<72x256xf32, #tpu.memory_space<vmem>>, vector<6x256xf32>,
    %c240_i32_126 = arith.constant 240 : i32
    %268 = tpu.dynamic_rotate %216 by %c240_i32_126 dim 1 : vector<2x256xf32>, i32 -> vector<2x256xf32>
    %269 = vector.broadcast %41 : vector<1x256xf32> to vector<2x256xf32>
    %270 = arith.mulf %268, %269 : vector<2x256xf32>
    %c56_127 = arith.constant 56 : index
    %c0_128 = arith.constant 0 : index
    %271 = vector.load %arg16[%c56_127, %c0_128] : memref<72x256xf32, #tpu.memory_space<vmem>>, vector<2x256xf32>
    tpu.vector_store %arg16[%c56_127, %c0_128], %270 {strides = array<i32>} : memref<72x256xf32, #tpu.memory_space<vmem>>, vector<2x256xf32>,
    %c58 = arith.constant 58 : index
    %c0_129 = arith.constant 0 : index
    %272 = vector.load %arg16[%c58, %c0_129] : memref<72x256xf32, #tpu.memory_space<vmem>>, vector<6x256xf32>
    tpu.vector_store %arg16[%c58, %c0_129], %235 {strides = array<i32>} : memref<72x256xf32, #tpu.memory_space<vmem>>, vector<6x256xf32>,
    %c239_i32_130 = arith.constant 239 : i32
    %273 = tpu.dynamic_rotate %216 by %c239_i32_130 dim 1 : vector<2x256xf32>, i32 -> vector<2x256xf32>
    %274 = vector.broadcast %48 : vector<1x256xf32> to vector<2x256xf32>
    %275 = arith.mulf %273, %274 : vector<2x256xf32>
    %c64_131 = arith.constant 64 : index
    %c0_132 = arith.constant 0 : index
    %276 = vector.load %arg16[%c64_131, %c0_132] : memref<72x256xf32, #tpu.memory_space<vmem>>, vector<2x256xf32>
    tpu.vector_store %arg16[%c64_131, %c0_132], %275 {strides = array<i32>} : memref<72x256xf32, #tpu.memory_space<vmem>>, vector<2x256xf32>,
    %c66 = arith.constant 66 : index
    %c0_133 = arith.constant 0 : index
    %277 = vector.load %arg16[%c66, %c0_133] : memref<72x256xf32, #tpu.memory_space<vmem>>, vector<6x256xf32>
    tpu.vector_store %arg16[%c66, %c0_133], %235 {strides = array<i32>} : memref<72x256xf32, #tpu.memory_space<vmem>>, vector<6x256xf32>,
    %c0_134 = arith.constant 0 : index
    %c0_135 = arith.constant 0 : index
    %278 = vector.load %arg16[%c0_134, %c0_135] : memref<72x256xf32, #tpu.memory_space<vmem>>, vector<72x256xf32>
    %c0_136 = arith.constant 0 : index
    %c0_137 = arith.constant 0 : index
    %279 = vector.load %arg9[%c0_136, %c0_137] : memref<8x72xf32, #tpu.memory_space<vmem>>, vector<8x72xf32>
    %cst_138 = arith.constant dense<0.000000e+00> : vector<8x256xf32>
    %280 = tpu.matmul %279, %278, %cst_138 {dimension_numbers = #tpu.dot_dimension_numbers<[1], [0], [0], [1], [0, 0, 1, 1], [], []>} : vector<8x72xf32>, vector<72x256xf32>, vector<8x256xf32> -> vector<8x256xf32>
    %281 = vector.broadcast %234 : vector<8x1xf32> to vector<8x256xf32>
    %282 = arith.addf %280, %281 : vector<8x256xf32>
    %283 = vector.extract_strided_slice %282 {offsets = [0, 0], sizes = [4, 256], strides = [1, 1]} : vector<8x256xf32> to vector<4x256xf32>
    %284 = vector.extract_strided_slice %282 {offsets = [4, 0], sizes = [4, 256], strides = [1, 1]} : vector<8x256xf32> to vector<4x256xf32>
    %cst_139 = arith.constant 1.000000e+00 : f32
    %285 = vector.broadcast %cst_139 : f32 to vector<4x256xf32>
    %286 = arith.addf %285, %283 : vector<4x256xf32>
    %287 = arith.mulf %161, %286 : vector<4x256xf32>
    %288 = arith.addf %287, %284 : vector<4x256xf32>
    %289 = vector.broadcast %233 : vector<4x1xf32> to vector<4x256xf32>
    %290 = arith.mulf %289, %1 : vector<4x256xf32>
    %291 = vector.broadcast %232 : vector<4x1xf32> to vector<4x256xf32>
    %292 = arith.addf %290, %291 : vector<4x256xf32>
    %cst_140 = arith.constant 1.000000e+00 : f32
    %293 = vector.broadcast %cst_140 : f32 to vector<1x256xf32>
    %294 = arith.subf %293, %222 : vector<1x256xf32>
    %295 = vector.broadcast %294 : vector<1x256xf32> to vector<4x256xf32>
    %296 = arith.mulf %295, %288 : vector<4x256xf32>
    %297 = vector.broadcast %222 : vector<1x256xf32> to vector<4x256xf32>
    %298 = arith.mulf %297, %292 : vector<4x256xf32>
    %299 = arith.addf %296, %298 : vector<4x256xf32>
    %300 = arith.addf %299, %1 : vector<4x256xf32>
    %cst_141 = arith.constant dense<0.000000e+00> : vector<256xf32>
    %301 = vector.multi_reduction <add>, %300, %cst_141 [0] : vector<4x256xf32> to vector<256xf32>
    %302 = vector.shape_cast %301 : vector<256xf32> to vector<1x256xf32>
    %cst_142 = arith.constant 4.000000e+00 : f32
    %303 = vector.broadcast %cst_142 : f32 to vector<1x256xf32>
    %304 = arith.divf %302, %303 : vector<1x256xf32>
    %305 = vector.broadcast %304 : vector<1x256xf32> to vector<4x256xf32>
    %306 = arith.subf %300, %305 : vector<4x256xf32>
    %307 = arith.mulf %306, %306 : vector<4x256xf32>
    %cst_143 = arith.constant dense<0.000000e+00> : vector<256xf32>
    %308 = vector.multi_reduction <add>, %307, %cst_143 [0] : vector<4x256xf32> to vector<256xf32>
    %309 = vector.shape_cast %308 : vector<256xf32> to vector<1x256xf32>
    %cst_144 = arith.constant 4.000000e+00 : f32
    %310 = vector.broadcast %cst_144 : f32 to vector<1x256xf32>
    %311 = arith.divf %309, %310 : vector<1x256xf32>
    %cst_145 = arith.constant 9.99999997E-7 : f32
    %312 = vector.broadcast %cst_145 : f32 to vector<1x256xf32>
    %313 = arith.addf %311, %312 : vector<1x256xf32>
    %314 = math.rsqrt %313 : vector<1x256xf32>
    %315 = vector.broadcast %314 : vector<1x256xf32> to vector<4x256xf32>
    %316 = arith.mulf %306, %315 : vector<4x256xf32>
    %c0_146 = arith.constant 0 : index
    %c0_147 = arith.constant 0 : index
    %317 = vector.load %arg11[%c0_146, %c0_147] : memref<8x4xbf16, #tpu.memory_space<vmem>>, vector<8x4xbf16>
    %318 = arith.extf %317 : vector<8x4xbf16> to vector<8x4xf32>
    %cst_148 = arith.constant dense<0.000000e+00> : vector<8x256xf32>
    %319 = tpu.matmul %318, %316, %cst_148 {dimension_numbers = #tpu.dot_dimension_numbers<[1], [0], [0], [1], [0, 0, 1, 1], [], []>} : vector<8x4xf32>, vector<4x256xf32>, vector<8x256xf32> -> vector<8x256xf32>
    %320 = vector.extract_strided_slice %2 {offsets = [72, 0], sizes = [8, 1], strides = [1, 1]} : vector<88x1xf32> to vector<8x1xf32>
    %321 = vector.broadcast %320 : vector<8x1xf32> to vector<8x256xf32>
    %322 = arith.addf %319, %321 : vector<8x256xf32>
    %323 = vector.extract_strided_slice %322 {offsets = [0, 0], sizes = [4, 256], strides = [1, 1]} : vector<8x256xf32> to vector<4x256xf32>
    %324 = vector.extract_strided_slice %322 {offsets = [4, 0], sizes = [4, 256], strides = [1, 1]} : vector<8x256xf32> to vector<4x256xf32>
    %325 = arith.mulf %323, %324 : vector<4x256xf32>
    %c0_149 = arith.constant 0 : index
    %c0_150 = arith.constant 0 : index
    %326 = vector.load %arg12[%c0_149, %c0_150] : memref<4x4xbf16, #tpu.memory_space<vmem>>, vector<4x4xbf16>
    %327 = arith.extf %326 : vector<4x4xbf16> to vector<4x4xf32>
    %cst_151 = arith.constant dense<0.000000e+00> : vector<4x256xf32>
    %328 = tpu.matmul %327, %325, %cst_151 {dimension_numbers = #tpu.dot_dimension_numbers<[1], [0], [0], [1], [0, 0, 1, 1], [], []>} : vector<4x4xf32>, vector<4x256xf32>, vector<4x256xf32> -> vector<4x256xf32>
    %329 = vector.extract_strided_slice %2 {offsets = [80, 0], sizes = [4, 1], strides = [1, 1]} : vector<88x1xf32> to vector<4x1xf32>
    %330 = vector.broadcast %329 : vector<4x1xf32> to vector<4x256xf32>
    %331 = arith.addf %328, %330 : vector<4x256xf32>
    %c4_152 = arith.constant 4 : index
    %c0_153 = arith.constant 0 : index
    %c0_154 = arith.constant 0 : index
    %332 = vector.load %arg10[%c4_152, %c0_153, %c0_154] : memref<9x4x1xf32, #tpu.memory_space<vmem>>, vector<1x4x1xf32>
    %333 = vector.shape_cast %332 : vector<1x4x1xf32> to vector<4x1xf32>
    %334 = vector.broadcast %333 : vector<4x1xf32> to vector<4x256xf32>
    %335 = arith.mulf %334, %331 : vector<4x256xf32>
    %c0_155 = arith.constant 0 : index
    %c0_156 = arith.constant 0 : index
    %c0_157 = arith.constant 0 : index
    %336 = vector.load %arg10[%c0_155, %c0_156, %c0_157] : memref<9x4x1xf32, #tpu.memory_space<vmem>>, vector<1x4x1xf32>
    %337 = vector.shape_cast %336 : vector<1x4x1xf32> to vector<4x1xf32>
    %c17_i32_158 = arith.constant 17 : i32
    %338 = tpu.dynamic_rotate %331 by %c17_i32_158 dim 1 : vector<4x256xf32>, i32 -> vector<4x256xf32>
    %339 = vector.broadcast %11 : vector<1x256xf32> to vector<4x256xf32>
    %340 = arith.mulf %338, %339 : vector<4x256xf32>
    %341 = vector.broadcast %337 : vector<4x1xf32> to vector<4x256xf32>
    %342 = arith.mulf %341, %340 : vector<4x256xf32>
    %343 = arith.addf %335, %342 : vector<4x256xf32>
    %c1_159 = arith.constant 1 : index
    %c0_160 = arith.constant 0 : index
    %c0_161 = arith.constant 0 : index
    %344 = vector.load %arg10[%c1_159, %c0_160, %c0_161] : memref<9x4x1xf32, #tpu.memory_space<vmem>>, vector<1x4x1xf32>
    %345 = vector.shape_cast %344 : vector<1x4x1xf32> to vector<4x1xf32>
    %c16_i32_162 = arith.constant 16 : i32
    %346 = tpu.dynamic_rotate %331 by %c16_i32_162 dim 1 : vector<4x256xf32>, i32 -> vector<4x256xf32>
    %347 = vector.broadcast %15 : vector<1x256xf32> to vector<4x256xf32>
    %348 = arith.mulf %346, %347 : vector<4x256xf32>
    %349 = vector.broadcast %345 : vector<4x1xf32> to vector<4x256xf32>
    %350 = arith.mulf %349, %348 : vector<4x256xf32>
    %351 = arith.addf %343, %350 : vector<4x256xf32>
    %c2_163 = arith.constant 2 : index
    %c0_164 = arith.constant 0 : index
    %c0_165 = arith.constant 0 : index
    %352 = vector.load %arg10[%c2_163, %c0_164, %c0_165] : memref<9x4x1xf32, #tpu.memory_space<vmem>>, vector<1x4x1xf32>
    %353 = vector.shape_cast %352 : vector<1x4x1xf32> to vector<4x1xf32>
    %c15_i32_166 = arith.constant 15 : i32
    %354 = tpu.dynamic_rotate %331 by %c15_i32_166 dim 1 : vector<4x256xf32>, i32 -> vector<4x256xf32>
    %355 = vector.broadcast %22 : vector<1x256xf32> to vector<4x256xf32>
    %356 = arith.mulf %354, %355 : vector<4x256xf32>
    %357 = vector.broadcast %353 : vector<4x1xf32> to vector<4x256xf32>
    %358 = arith.mulf %357, %356 : vector<4x256xf32>
    %359 = arith.addf %351, %358 : vector<4x256xf32>
    %c3_167 = arith.constant 3 : index
    %c0_168 = arith.constant 0 : index
    %c0_169 = arith.constant 0 : index
    %360 = vector.load %arg10[%c3_167, %c0_168, %c0_169] : memref<9x4x1xf32, #tpu.memory_space<vmem>>, vector<1x4x1xf32>
    %361 = vector.shape_cast %360 : vector<1x4x1xf32> to vector<4x1xf32>
    %c1_i32_170 = arith.constant 1 : i32
    %362 = tpu.dynamic_rotate %331 by %c1_i32_170 dim 1 : vector<4x256xf32>, i32 -> vector<4x256xf32>
    %363 = vector.broadcast %26 : vector<1x256xf32> to vector<4x256xf32>
    %364 = arith.mulf %362, %363 : vector<4x256xf32>
    %365 = vector.broadcast %361 : vector<4x1xf32> to vector<4x256xf32>
    %366 = arith.mulf %365, %364 : vector<4x256xf32>
    %367 = arith.addf %359, %366 : vector<4x256xf32>
    %c5_171 = arith.constant 5 : index
    %c0_172 = arith.constant 0 : index
    %c0_173 = arith.constant 0 : index
    %368 = vector.load %arg10[%c5_171, %c0_172, %c0_173] : memref<9x4x1xf32, #tpu.memory_space<vmem>>, vector<1x4x1xf32>
    %369 = vector.shape_cast %368 : vector<1x4x1xf32> to vector<4x1xf32>
    %c255_i32_174 = arith.constant 255 : i32
    %370 = tpu.dynamic_rotate %331 by %c255_i32_174 dim 1 : vector<4x256xf32>, i32 -> vector<4x256xf32>
    %371 = vector.broadcast %30 : vector<1x256xf32> to vector<4x256xf32>
    %372 = arith.mulf %370, %371 : vector<4x256xf32>
    %373 = vector.broadcast %369 : vector<4x1xf32> to vector<4x256xf32>
    %374 = arith.mulf %373, %372 : vector<4x256xf32>
    %375 = arith.addf %367, %374 : vector<4x256xf32>
    %c6_175 = arith.constant 6 : index
    %c0_176 = arith.constant 0 : index
    %c0_177 = arith.constant 0 : index
    %376 = vector.load %arg10[%c6_175, %c0_176, %c0_177] : memref<9x4x1xf32, #tpu.memory_space<vmem>>, vector<1x4x1xf32>
    %377 = vector.shape_cast %376 : vector<1x4x1xf32> to vector<4x1xf32>
    %c241_i32_178 = arith.constant 241 : i32
    %378 = tpu.dynamic_rotate %331 by %c241_i32_178 dim 1 : vector<4x256xf32>, i32 -> vector<4x256xf32>
    %379 = vector.broadcast %37 : vector<1x256xf32> to vector<4x256xf32>
    %380 = arith.mulf %378, %379 : vector<4x256xf32>
    %381 = vector.broadcast %377 : vector<4x1xf32> to vector<4x256xf32>
    %382 = arith.mulf %381, %380 : vector<4x256xf32>
    %383 = arith.addf %375, %382 : vector<4x256xf32>
    %c7_179 = arith.constant 7 : index
    %c0_180 = arith.constant 0 : index
    %c0_181 = arith.constant 0 : index
    %384 = vector.load %arg10[%c7_179, %c0_180, %c0_181] : memref<9x4x1xf32, #tpu.memory_space<vmem>>, vector<1x4x1xf32>
    %385 = vector.shape_cast %384 : vector<1x4x1xf32> to vector<4x1xf32>
    %c240_i32_182 = arith.constant 240 : i32
    %386 = tpu.dynamic_rotate %331 by %c240_i32_182 dim 1 : vector<4x256xf32>, i32 -> vector<4x256xf32>
    %387 = vector.broadcast %41 : vector<1x256xf32> to vector<4x256xf32>
    %388 = arith.mulf %386, %387 : vector<4x256xf32>
    %389 = vector.broadcast %385 : vector<4x1xf32> to vector<4x256xf32>
    %390 = arith.mulf %389, %388 : vector<4x256xf32>
    %391 = arith.addf %383, %390 : vector<4x256xf32>
    %c8_183 = arith.constant 8 : index
    %c0_184 = arith.constant 0 : index
    %c0_185 = arith.constant 0 : index
    %392 = vector.load %arg10[%c8_183, %c0_184, %c0_185] : memref<9x4x1xf32, #tpu.memory_space<vmem>>, vector<1x4x1xf32>
    %393 = vector.shape_cast %392 : vector<1x4x1xf32> to vector<4x1xf32>
    %c239_i32_186 = arith.constant 239 : i32
    %394 = tpu.dynamic_rotate %331 by %c239_i32_186 dim 1 : vector<4x256xf32>, i32 -> vector<4x256xf32>
    %395 = vector.broadcast %48 : vector<1x256xf32> to vector<4x256xf32>
    %396 = arith.mulf %394, %395 : vector<4x256xf32>
    %397 = vector.broadcast %393 : vector<4x1xf32> to vector<4x256xf32>
    %398 = arith.mulf %397, %396 : vector<4x256xf32>
    %399 = arith.addf %391, %398 : vector<4x256xf32>
    %cst_187 = arith.constant dense<0.000000e+00> : vector<256xf32>
    %400 = vector.multi_reduction <add>, %399, %cst_187 [0] : vector<4x256xf32> to vector<256xf32>
    %401 = vector.shape_cast %400 : vector<256xf32> to vector<1x256xf32>
    %402 = vector.extract_strided_slice %2 {offsets = [56, 0], sizes = [1, 1], strides = [1, 1]} : vector<88x1xf32> to vector<1x1xf32>
    %403 = vector.broadcast %402 : vector<1x1xf32> to vector<1x256xf32>
    %404 = arith.addf %401, %403 : vector<1x256xf32>
    %405 = arith.negf %404 : vector<1x256xf32>
    %406 = math.exp %405 : vector<1x256xf32>
    %cst_188 = arith.constant 1.000000e+00 : f32
    %407 = vector.broadcast %cst_188 : f32 to vector<1x256xf32>
    %408 = arith.addf %407, %406 : vector<1x256xf32>
    %409 = arith.divf %407, %408 : vector<1x256xf32>
    %410 = vector.extract_strided_slice %2 {offsets = [40, 0], sizes = [8, 1], strides = [1, 1]} : vector<88x1xf32> to vector<8x1xf32>
    %cst_189 = arith.constant 0.000000e+00 : f32
    %411 = vector.broadcast %cst_189 : f32 to vector<6x256xf32>
    %c17_i32_190 = arith.constant 17 : i32
    %412 = tpu.dynamic_rotate %213 by %c17_i32_190 dim 1 : vector<2x256xf32>, i32 -> vector<2x256xf32>
    %413 = vector.broadcast %11 : vector<1x256xf32> to vector<2x256xf32>
    %414 = arith.mulf %412, %413 : vector<2x256xf32>
    %c0_191 = arith.constant 0 : index
    %c0_192 = arith.constant 0 : index
    %415 = vector.load %arg16[%c0_191, %c0_192] : memref<72x256xf32, #tpu.memory_space<vmem>>, vector<2x256xf32>
    tpu.vector_store %arg16[%c0_191, %c0_192], %414 {strides = array<i32>} : memref<72x256xf32, #tpu.memory_space<vmem>>, vector<2x256xf32>,
    %c2_193 = arith.constant 2 : index
    %c0_194 = arith.constant 0 : index
    %416 = vector.load %arg16[%c2_193, %c0_194] : memref<72x256xf32, #tpu.memory_space<vmem>>, vector<6x256xf32>
    tpu.vector_store %arg16[%c2_193, %c0_194], %411 {strides = array<i32>} : memref<72x256xf32, #tpu.memory_space<vmem>>, vector<6x256xf32>,
    %c16_i32_195 = arith.constant 16 : i32
    %417 = tpu.dynamic_rotate %213 by %c16_i32_195 dim 1 : vector<2x256xf32>, i32 -> vector<2x256xf32>
    %418 = vector.broadcast %15 : vector<1x256xf32> to vector<2x256xf32>
    %419 = arith.mulf %417, %418 : vector<2x256xf32>
    %c8_196 = arith.constant 8 : index
    %c0_197 = arith.constant 0 : index
    %420 = vector.load %arg16[%c8_196, %c0_197] : memref<72x256xf32, #tpu.memory_space<vmem>>, vector<2x256xf32>
    tpu.vector_store %arg16[%c8_196, %c0_197], %419 {strides = array<i32>} : memref<72x256xf32, #tpu.memory_space<vmem>>, vector<2x256xf32>,
    %c10_198 = arith.constant 10 : index
    %c0_199 = arith.constant 0 : index
    %421 = vector.load %arg16[%c10_198, %c0_199] : memref<72x256xf32, #tpu.memory_space<vmem>>, vector<6x256xf32>
    tpu.vector_store %arg16[%c10_198, %c0_199], %411 {strides = array<i32>} : memref<72x256xf32, #tpu.memory_space<vmem>>, vector<6x256xf32>,
    %c15_i32_200 = arith.constant 15 : i32
    %422 = tpu.dynamic_rotate %213 by %c15_i32_200 dim 1 : vector<2x256xf32>, i32 -> vector<2x256xf32>
    %423 = vector.broadcast %22 : vector<1x256xf32> to vector<2x256xf32>
    %424 = arith.mulf %422, %423 : vector<2x256xf32>
    %c16_201 = arith.constant 16 : index
    %c0_202 = arith.constant 0 : index
    %425 = vector.load %arg16[%c16_201, %c0_202] : memref<72x256xf32, #tpu.memory_space<vmem>>, vector<2x256xf32>
    tpu.vector_store %arg16[%c16_201, %c0_202], %424 {strides = array<i32>} : memref<72x256xf32, #tpu.memory_space<vmem>>, vector<2x256xf32>,
    %c18_203 = arith.constant 18 : index
    %c0_204 = arith.constant 0 : index
    %426 = vector.load %arg16[%c18_203, %c0_204] : memref<72x256xf32, #tpu.memory_space<vmem>>, vector<6x256xf32>
    tpu.vector_store %arg16[%c18_203, %c0_204], %411 {strides = array<i32>} : memref<72x256xf32, #tpu.memory_space<vmem>>, vector<6x256xf32>,
    %c1_i32_205 = arith.constant 1 : i32
    %427 = tpu.dynamic_rotate %213 by %c1_i32_205 dim 1 : vector<2x256xf32>, i32 -> vector<2x256xf32>
    %428 = vector.broadcast %26 : vector<1x256xf32> to vector<2x256xf32>
    %429 = arith.mulf %427, %428 : vector<2x256xf32>
    %c24_206 = arith.constant 24 : index
    %c0_207 = arith.constant 0 : index
    %430 = vector.load %arg16[%c24_206, %c0_207] : memref<72x256xf32, #tpu.memory_space<vmem>>, vector<2x256xf32>
    tpu.vector_store %arg16[%c24_206, %c0_207], %429 {strides = array<i32>} : memref<72x256xf32, #tpu.memory_space<vmem>>, vector<2x256xf32>,
    %c26_208 = arith.constant 26 : index
    %c0_209 = arith.constant 0 : index
    %431 = vector.load %arg16[%c26_208, %c0_209] : memref<72x256xf32, #tpu.memory_space<vmem>>, vector<6x256xf32>
    tpu.vector_store %arg16[%c26_208, %c0_209], %411 {strides = array<i32>} : memref<72x256xf32, #tpu.memory_space<vmem>>, vector<6x256xf32>,
    %c32_210 = arith.constant 32 : index
    %c0_211 = arith.constant 0 : index
    %432 = vector.load %arg16[%c32_210, %c0_211] : memref<72x256xf32, #tpu.memory_space<vmem>>, vector<2x256xf32>
    tpu.vector_store %arg16[%c32_210, %c0_211], %213 {strides = array<i32>} : memref<72x256xf32, #tpu.memory_space<vmem>>, vector<2x256xf32>,
    %c34_212 = arith.constant 34 : index
    %c0_213 = arith.constant 0 : index
    %433 = vector.load %arg16[%c34_212, %c0_213] : memref<72x256xf32, #tpu.memory_space<vmem>>, vector<6x256xf32>
    tpu.vector_store %arg16[%c34_212, %c0_213], %411 {strides = array<i32>} : memref<72x256xf32, #tpu.memory_space<vmem>>, vector<6x256xf32>,
    %c255_i32_214 = arith.constant 255 : i32
    %434 = tpu.dynamic_rotate %213 by %c255_i32_214 dim 1 : vector<2x256xf32>, i32 -> vector<2x256xf32>
    %435 = vector.broadcast %30 : vector<1x256xf32> to vector<2x256xf32>
    %436 = arith.mulf %434, %435 : vector<2x256xf32>
    %c40_215 = arith.constant 40 : index
    %c0_216 = arith.constant 0 : index
    %437 = vector.load %arg16[%c40_215, %c0_216] : memref<72x256xf32, #tpu.memory_space<vmem>>, vector<2x256xf32>
    tpu.vector_store %arg16[%c40_215, %c0_216], %436 {strides = array<i32>} : memref<72x256xf32, #tpu.memory_space<vmem>>, vector<2x256xf32>,
    %c42_217 = arith.constant 42 : index
    %c0_218 = arith.constant 0 : index
    %438 = vector.load %arg16[%c42_217, %c0_218] : memref<72x256xf32, #tpu.memory_space<vmem>>, vector<6x256xf32>
    tpu.vector_store %arg16[%c42_217, %c0_218], %411 {strides = array<i32>} : memref<72x256xf32, #tpu.memory_space<vmem>>, vector<6x256xf32>,
    %c241_i32_219 = arith.constant 241 : i32
    %439 = tpu.dynamic_rotate %213 by %c241_i32_219 dim 1 : vector<2x256xf32>, i32 -> vector<2x256xf32>
    %440 = vector.broadcast %37 : vector<1x256xf32> to vector<2x256xf32>
    %441 = arith.mulf %439, %440 : vector<2x256xf32>
    %c48_220 = arith.constant 48 : index
    %c0_221 = arith.constant 0 : index
    %442 = vector.load %arg16[%c48_220, %c0_221] : memref<72x256xf32, #tpu.memory_space<vmem>>, vector<2x256xf32>
    tpu.vector_store %arg16[%c48_220, %c0_221], %441 {strides = array<i32>} : memref<72x256xf32, #tpu.memory_space<vmem>>, vector<2x256xf32>,
    %c50_222 = arith.constant 50 : index
    %c0_223 = arith.constant 0 : index
    %443 = vector.load %arg16[%c50_222, %c0_223] : memref<72x256xf32, #tpu.memory_space<vmem>>, vector<6x256xf32>
    tpu.vector_store %arg16[%c50_222, %c0_223], %411 {strides = array<i32>} : memref<72x256xf32, #tpu.memory_space<vmem>>, vector<6x256xf32>,
    %c240_i32_224 = arith.constant 240 : i32
    %444 = tpu.dynamic_rotate %213 by %c240_i32_224 dim 1 : vector<2x256xf32>, i32 -> vector<2x256xf32>
    %445 = vector.broadcast %41 : vector<1x256xf32> to vector<2x256xf32>
    %446 = arith.mulf %444, %445 : vector<2x256xf32>
    %c56_225 = arith.constant 56 : index
    %c0_226 = arith.constant 0 : index
    %447 = vector.load %arg16[%c56_225, %c0_226] : memref<72x256xf32, #tpu.memory_space<vmem>>, vector<2x256xf32>
    tpu.vector_store %arg16[%c56_225, %c0_226], %446 {strides = array<i32>} : memref<72x256xf32, #tpu.memory_space<vmem>>, vector<2x256xf32>,
    %c58_227 = arith.constant 58 : index
    %c0_228 = arith.constant 0 : index
    %448 = vector.load %arg16[%c58_227, %c0_228] : memref<72x256xf32, #tpu.memory_space<vmem>>, vector<6x256xf32>
    tpu.vector_store %arg16[%c58_227, %c0_228], %411 {strides = array<i32>} : memref<72x256xf32, #tpu.memory_space<vmem>>, vector<6x256xf32>,
    %c239_i32_229 = arith.constant 239 : i32
    %449 = tpu.dynamic_rotate %213 by %c239_i32_229 dim 1 : vector<2x256xf32>, i32 -> vector<2x256xf32>
    %450 = vector.broadcast %48 : vector<1x256xf32> to vector<2x256xf32>
    %451 = arith.mulf %449, %450 : vector<2x256xf32>
    %c64_230 = arith.constant 64 : index
    %c0_231 = arith.constant 0 : index
    %452 = vector.load %arg16[%c64_230, %c0_231] : memref<72x256xf32, #tpu.memory_space<vmem>>, vector<2x256xf32>
    tpu.vector_store %arg16[%c64_230, %c0_231], %451 {strides = array<i32>} : memref<72x256xf32, #tpu.memory_space<vmem>>, vector<2x256xf32>,
    %c66_232 = arith.constant 66 : index
    %c0_233 = arith.constant 0 : index
    %453 = vector.load %arg16[%c66_232, %c0_233] : memref<72x256xf32, #tpu.memory_space<vmem>>, vector<6x256xf32>
    tpu.vector_store %arg16[%c66_232, %c0_233], %411 {strides = array<i32>} : memref<72x256xf32, #tpu.memory_space<vmem>>, vector<6x256xf32>,
    %c0_234 = arith.constant 0 : index
    %c0_235 = arith.constant 0 : index
    %454 = vector.load %arg16[%c0_234, %c0_235] : memref<72x256xf32, #tpu.memory_space<vmem>>, vector<72x256xf32>
    %c0_236 = arith.constant 0 : index
    %c0_237 = arith.constant 0 : index
    %455 = vector.load %arg8[%c0_236, %c0_237] : memref<8x72xf32, #tpu.memory_space<vmem>>, vector<8x72xf32>
    %cst_238 = arith.constant dense<0.000000e+00> : vector<8x256xf32>
    %456 = tpu.matmul %455, %454, %cst_238 {dimension_numbers = #tpu.dot_dimension_numbers<[1], [0], [0], [1], [0, 0, 1, 1], [], []>} : vector<8x72xf32>, vector<72x256xf32>, vector<8x256xf32> -> vector<8x256xf32>
    %457 = vector.broadcast %410 : vector<8x1xf32> to vector<8x256xf32>
    %458 = arith.addf %456, %457 : vector<8x256xf32>
    %459 = vector.extract_strided_slice %458 {offsets = [0, 0], sizes = [4, 256], strides = [1, 1]} : vector<8x256xf32> to vector<4x256xf32>
    %460 = vector.extract_strided_slice %458 {offsets = [4, 0], sizes = [4, 256], strides = [1, 1]} : vector<8x256xf32> to vector<4x256xf32>
    %cst_239 = arith.constant 1.000000e+00 : f32
    %461 = vector.broadcast %cst_239 : f32 to vector<4x256xf32>
    %462 = arith.addf %461, %459 : vector<4x256xf32>
    %463 = arith.mulf %331, %462 : vector<4x256xf32>
    %464 = arith.addf %463, %460 : vector<4x256xf32>
    %465 = vector.broadcast %409 : vector<1x256xf32> to vector<4x256xf32>
    %466 = arith.mulf %465, %464 : vector<4x256xf32>
    %cst_240 = arith.constant 1.000000e+00 : f32
    %467 = vector.broadcast %cst_240 : f32 to vector<1x256xf32>
    %468 = arith.subf %467, %409 : vector<1x256xf32>
    %469 = vector.broadcast %468 : vector<1x256xf32> to vector<4x256xf32>
    %470 = arith.mulf %469, %299 : vector<4x256xf32>
    %471 = arith.addf %466, %470 : vector<4x256xf32>
    %472 = arith.addf %471, %300 : vector<4x256xf32>
    %c0_241 = arith.constant 0 : index
    %c0_242 = arith.constant 0 : index
    %c0_243 = arith.constant 0 : index
    %473 = vector.load %arg15[%c0_241, %c0_242, %c0_243] : memref<1x4x256xf32, #tpu.memory_space<vmem>>, vector<1x4x256xf32>
    %474 = vector.shape_cast %473 : vector<1x4x256xf32> to vector<4x256xf32>
    %475 = vector.shape_cast %472 : vector<4x256xf32> to vector<1x4x256xf32>
    tpu.vector_store %arg15[%c0_241, %c0_242, %c0_243], %475 {strides = array<i32>} : memref<1x4x256xf32, #tpu.memory_space<vmem>>, vector<1x4x256xf32>,
    return
  }
  func.func @transform_0(%arg0: i32) -> (i32, i32, i32) {
    %c0_i32 = arith.constant 0 : i32
    %c0_i32_0 = arith.constant 0 : i32
    %c0_i32_1 = arith.constant 0 : i32
    return %arg0, %c0_i32, %c0_i32_0 : i32, i32, i32
  }
  func.func @transform_1(%arg0: i32) -> (i32, i32) {
    %c0_i32 = arith.constant 0 : i32
    %c0_i32_0 = arith.constant 0 : i32
    %c0_i32_1 = arith.constant 0 : i32
    return %c0_i32, %c0_i32_0 : i32, i32
  }
  func.func @transform_2(%arg0: i32) -> (i32, i32) {
    %c0_i32 = arith.constant 0 : i32
    %c0_i32_0 = arith.constant 0 : i32
    %c0_i32_1 = arith.constant 0 : i32
    return %c0_i32, %c0_i32_0 : i32, i32
  }
  func.func @transform_3(%arg0: i32) -> (i32, i32, i32) {
    %c0_i32 = arith.constant 0 : i32
    %c0_i32_0 = arith.constant 0 : i32
    %c0_i32_1 = arith.constant 0 : i32
    %c0_i32_2 = arith.constant 0 : i32
    return %c0_i32, %c0_i32_0, %c0_i32_1 : i32, i32, i32
  }
  func.func @transform_4(%arg0: i32) -> (i32, i32) {
    %c0_i32 = arith.constant 0 : i32
    %c0_i32_0 = arith.constant 0 : i32
    %c0_i32_1 = arith.constant 0 : i32
    return %c0_i32, %c0_i32_0 : i32, i32
  }
  func.func @transform_5(%arg0: i32) -> (i32, i32) {
    %c0_i32 = arith.constant 0 : i32
    %c0_i32_0 = arith.constant 0 : i32
    %c0_i32_1 = arith.constant 0 : i32
    return %c0_i32, %c0_i32_0 : i32, i32
  }
  func.func @transform_6(%arg0: i32) -> (i32, i32) {
    %c0_i32 = arith.constant 0 : i32
    %c0_i32_0 = arith.constant 0 : i32
    %c0_i32_1 = arith.constant 0 : i32
    return %c0_i32, %c0_i32_0 : i32, i32
  }
  func.func @transform_7(%arg0: i32) -> (i32, i32) {
    %c0_i32 = arith.constant 0 : i32
    %c0_i32_0 = arith.constant 0 : i32
    %c0_i32_1 = arith.constant 0 : i32
    return %c0_i32, %c0_i32_0 : i32, i32
  }
  func.func @transform_8(%arg0: i32) -> (i32, i32) {
    %c0_i32 = arith.constant 0 : i32
    %c0_i32_0 = arith.constant 0 : i32
    %c0_i32_1 = arith.constant 0 : i32
    return %c0_i32, %c0_i32_0 : i32, i32
  }
  func.func @transform_9(%arg0: i32) -> (i32, i32, i32) {
    %c0_i32 = arith.constant 0 : i32
    %c0_i32_0 = arith.constant 0 : i32
    %c0_i32_1 = arith.constant 0 : i32
    %c0_i32_2 = arith.constant 0 : i32
    return %c0_i32, %c0_i32_0, %c0_i32_1 : i32, i32, i32
  }
  func.func @transform_10(%arg0: i32) -> (i32, i32) {
    %c0_i32 = arith.constant 0 : i32
    %c0_i32_0 = arith.constant 0 : i32
    %c0_i32_1 = arith.constant 0 : i32
    return %c0_i32, %c0_i32_0 : i32, i32
  }
  func.func @transform_11(%arg0: i32) -> (i32, i32) {
    %c0_i32 = arith.constant 0 : i32
    %c0_i32_0 = arith.constant 0 : i32
    %c0_i32_1 = arith.constant 0 : i32
    return %c0_i32, %c0_i32_0 : i32, i32
  }
  func.func @transform_12(%arg0: i32) -> (i32, i32) {
    %c0_i32 = arith.constant 0 : i32
    %c0_i32_0 = arith.constant 0 : i32
    %c0_i32_1 = arith.constant 0 : i32
    return %c0_i32, %c0_i32_0 : i32, i32
  }
  func.func @transform_13(%arg0: i32) -> (i32, i32) {
    %c0_i32 = arith.constant 0 : i32
    %c0_i32_0 = arith.constant 0 : i32
    %c0_i32_1 = arith.constant 0 : i32
    return %c0_i32, %c0_i32_0 : i32, i32
  }
  func.func @transform_14(%arg0: i32) -> (i32, i32, i32) {
    %c0_i32 = arith.constant 0 : i32
    %c0_i32_0 = arith.constant 0 : i32
    %c0_i32_1 = arith.constant 0 : i32
    return %arg0, %c0_i32, %c0_i32_0 : i32, i32, i32
  }
}

</mosaic_0001>

<bundles_post_ra>
// kernel: tpu_custom_call.1
= control target key start
LH: loop header
LB: loop body
LE: loop exit
PB: predicated region body
PF: predicated region fallthrough
CT: control target
= control target key end

     0   :  { %s3690_s0 = inlined_call_operand.vmem [shape: f32[2,4,256], index: 0, kind: input, shape index: {}]   ;;  %s3691_s1 = inlined_call_operand.vmem [shape: f32[2,256], index: 1, kind: input, shape index: {}]   ;;  %s3692_s2 = inlined_call_operand.vmem [shape: bf16[8,4], index: 2, kind: input, shape index: {}]   ;;  %s3693_s3 = inlined_call_operand.vmem [shape: f32[9,8,1], index: 3, kind: input, shape index: {}]   ;;  %s3694_s4 = inlined_call_operand.vmem [shape: bf16[4,4], index: 4, kind: input, shape index: {}]   ;;  %s3695_s5 = inlined_call_operand.vmem [shape: bf16[4,4], index: 5, kind: input, shape index: {}]   ;;  %s3696_s6 = inlined_call_operand.vmem [shape: f32[5,72], index: 6, kind: input, shape index: {}]   ;;  %s3697_s7 = inlined_call_operand.vmem [shape: f32[8,72], index: 7, kind: input, shape index: {}]   ;;  %s3698_s8 = inlined_call_operand.vmem [shape: f32[8,72], index: 8, kind: input, shape index: {}]   ;;  %s3699_s9 = inlined_call_operand.vmem [shape: f32[9,4,1], index: 9, kind: input, shape index: {}]   ;;  %s3700_s10 = inlined_call_operand.vmem [shape: bf16[8,4], index: 10, kind: input, shape index: {}]   ;;  %s3701_s11 = inlined_call_operand.vmem [shape: bf16[4,4], index: 11, kind: input, shape index: {}]   ;;  %s3702_s12 = inlined_call_operand.vmem [shape: bf16[8,2], index: 12, kind: input, shape index: {}]   ;;  %s3703_s13 = inlined_call_operand.vmem [shape: f32[88,1], index: 13, kind: input, shape index: {}]   ;;  %s3704_s14 = inlined_call_operand.hbm [shape: f32[2,4,256], index: 14, kind: output, shape index: {}]  }
   0x1   :  { %3725 = sst [smem:[#allocation10_spill]] %s3690_s0 }
   0x2   :  { %3726 = sst [smem:[#allocation11_spill]] %s3691_s1 }
   0x3   :  { %3727 = sst [smem:[#allocation12_spill]] %s3692_s2 }
   0x4   :  { %3728 = sst [smem:[#allocation13_spill]] %s3693_s3 }
   0x5   :  { %3729 = sst [smem:[#allocation14_spill]] %s3694_s4 }
   0x6   :  { %3730 = sst [smem:[#allocation15_spill]] %s3695_s5 }
   0x7   :  { %3731 = sst [smem:[#allocation16_spill]] %s3696_s6 }
   0x8   :  { %19 = vsyncpa [#allocation4], 0 }
   0x9   :  { %21 = vsyncpa [#allocation4 + $0x1], 0  ;;  %s2746_s29 = smov 0   ;;  %s2748_s30 = smov 0  }
   0xa   :  { %s2750_s15 = smov 0   ;;  %s2752_s16 = smov 0  }
   0xb LB: > { %3732 = sst [smem:[#allocation6_spill]] %s2653_s15  ;;  %s2767_s17 = sadd.s32 4294967295, %s2657_s16   ;;  %s2657_s16 = sphi %s2752_s16, %s3754_s16   ;;  %s2653_s15 = sphi %s2750_s15, %s3756_s15   ;;  %s2649_s30 = sphi %s2748_s30, %s3758_s30   ;;  %s2645_s29 = sphi %s2746_s29, %s3757_s29  }
   0xc   : > { %s2392_s18 = sadd.s32 4294967294, %s2657_s16   ;;  %s2771_s19 = sadd.s32 1, %s2657_s16  }
   0xd   : > { %3733 = sst [smem:[#allocation7_spill]] %s2771_s19  ;;  %s333_s20 = sadd.s32 1, %s2653_s15 }
   0xe   : > { %s330_s21 = ssub.s32 %s2657_s16, %s2771_s19  ;;  %p343_p0 = scmp.ne.s32.totalorder %s2653_s15, %s2649_s30 }
   0xf   : > { %p331_p1 = scmp.eq.s32.totalorder %s330_s21, 0  ;;  %p344_p2 = scmp.eq.s32.totalorder %s2767_s17, 1 }
  0x10   : > { %p349_p3 = scmp.ne.s32.totalorder %s2649_s30, %s2645_s29  ;;  %p350_p4 = scmp.eq.s32.totalorder %s2392_s18, 1 }
  0x11   : > { %s2782_s22 = scalar_select %p331_p1, %s2653_s15, %s333_s20  }
  0x12   : > { %p2784_p5 = por %p344_p2, %p343_p0  ;;  %p2788_p6 = por %p350_p4, %p349_p3 }
  0x13   : > { %3734 = sst [smem:[#allocation8_spill]] %s2782_s22  ;;  %p2395_p7 = scmp.ge.s32.totalorder %s2657_s16, 1 }
  0x14   : > { %s3736_s24 = scalar_select %p2788_p6, 1, 0 }
  0x15   : > { %p415_p8 = scmp.lt.s32.totalorder %s2657_s16, 3 }
  0x16   : > { %3737 = sst [smem:[#allocation9_spill]] %s3736_s24 }
  0x17   : > { %p416_p9 = pnand %p2395_p7, %p415_p8 }
  0x18   : > { %p461_p10 = scmp.lt.s32.totalorder (!%p416_p9), %s2767_s17, 1  ;;  %v2659_v0 = vmov (!%p416_p9), 0.0   ;;  %v467_v1 = vld [vmem:[%s3703_s13] sm:$0xff] (!%p416_p9)  ;;  %v2660_v2 = vmov (!%p416_p9), 0   ;;  %s3738_s3 = sld [smem:[#allocation13_spill]] (!%p416_p9)  ;;  %vm508_vm0 = vcmask (!%p416_p9), 1043456  }
  0x19   : > { %419 = sbr.rel (%p416_p9) target bundleno = 2789 (0xae5), region = 76  ;;  %641 = vmatprep.mubr.f32.mxu1 (!%p416_p9), %v2659_v0  ;;  %1110 = vst [vmem:[#allocation2] sm:$0xf0] (!%p416_p9), %v2659_v0  ;;  %1111 = vst [vmem:[#allocation2 + $0x8] sm:$0xf0] (!%p416_p9), %v2659_v0  ;;  %2463 = vmatprep.subr.mxu0 (!%p416_p9), %v2659_v0  ;;  %s3739_s0 = sld [smem:[#allocation10_spill]] (!%p416_p9) }
  0x1a   : > { %1122 = vst [vmem:[#allocation2 + $0x10] sm:$0xf0] (!%p416_p9), %v2659_v0  ;;  %1123 = vst [vmem:[#allocation2 + $0x18] sm:$0xf0] (!%p416_p9), %v2659_v0  ;;  %2566 = vset.pattern.permute.xlu0 (!%p416_p9), %v2660_v2  ;;  %2567 = vset.pattern.permute.xlu1 (!%p416_p9), %v2660_v2  ;;  %s3740_s2 = sld [smem:[#allocation12_spill]] (!%p416_p9)  ;;  %vm569_vm1 = vcmask (!%p416_p9), 31744  }
  0x1b   : > { %1134 = vst [vmem:[#allocation2 + $0x20] sm:$0xf0] (!%p416_p9), %v2659_v0  ;;  %1135 = vst [vmem:[#allocation2 + $0x28] sm:$0xf0] (!%p416_p9), %v2659_v0  ;;  %564 = vperm.xlu0 (!%p416_p9), %2566, %v467_v1   ;;  %s3717_s15 = smov (!%p416_p9), 16   ;;  %s3723_s19 = smov (!%p416_p9), 17  }
  0x1c   : > { %1146 = vst [vmem:[#allocation2 + $0x30] sm:$0xf0] (!%p416_p9), %v2659_v0  ;;  %1147 = vst [vmem:[#allocation2 + $0x38] sm:$0xf0] (!%p416_p9), %v2659_v0  ;;  %s3715_s21 = smov (!%p416_p9), 15   ;;  %s3709_s25 = smov (!%p416_p9), 113  }
  0x1d   : > { %1150 = vst [vmem:[#allocation2 + $0x40] sm:$0xf0] (!%p416_p9), %v2659_v0  ;;  %1151 = vst [vmem:[#allocation2 + $0x48] sm:$0xf0] (!%p416_p9), %v2659_v0  ;;  %s3711_s26 = smov (!%p416_p9), 127   ;;  %s3719_s22 = smov (!%p416_p9), 112  }
  0x1e   : > { %1162 = vst [vmem:[#allocation2 + $0x50] sm:$0xf0] (!%p416_p9), %v2659_v0  ;;  %1163 = vst [vmem:[#allocation2 + $0x58] sm:$0xf0] (!%p416_p9), %v2659_v0  ;;  %v657_v3 = vld [vmem:[%s3738_s3] sm:$0xff] (!%p416_p9)  ;;  %v2412_v5 = vld [vmem:[%s3738_s3 + $0x8] sm:$0xff] (!%p416_p9) }
  0x1f   : > { %1174 = vst [vmem:[#allocation2 + $0x60] sm:$0xf0] (!%p416_p9), %v2659_v0  ;;  %1175 = vst [vmem:[#allocation2 + $0x68] sm:$0xf0] (!%p416_p9), %v2659_v0  ;;  %682 = vperm.xlu1 (!%p416_p9), %2567, %v657_v3   ;;  %v2411_v4 = vld [vmem:[%s3738_s3 + $0x20] sm:$0xff] (!%p416_p9)  ;;  %v2413_v10 = vld [vmem:[%s3738_s3 + $0x10] sm:$0xff] (!%p416_p9) }
  0x20   : > { %1186 = vst [vmem:[#allocation2 + $0x70] sm:$0xf0] %v2659_v0  ;;  %1187 = vst [vmem:[#allocation2 + $0x78] sm:$0xf0] %v2659_v0  ;;  %s462_s27 = scalar_select %p461_p10, %s2767_s17, 1  ;;  %652 = vperm.xlu0 %2566, %v2411_v4   ;;  %v2414_v11 = vld [vmem:[%s3738_s3 + $0x18] sm:$0xff] }
  0x21   : > { %1198 = vst [vmem:[#allocation2 + $0x80] sm:$0xf0] %v2659_v0  ;;  %1199 = vst [vmem:[#allocation2 + $0x88] sm:$0xf0] %v2659_v0  ;;  %v2415_v17 = vld [vmem:[%s3738_s3 + $0x28] sm:$0xff]  ;;  %v2416_v18 = vld [vmem:[%s3738_s3 + $0x30] sm:$0xff] }
  0x22   : > { %s2452_s20 = sshll.u32 %s462_s27, 3  ;;  %v2417_v23 = vld [vmem:[%s3738_s3 + $0x38] sm:$0xff]  ;;  %v2418_v24 = vld [vmem:[%s3738_s3 + $0x40] sm:$0xff]  ;;  %s3713_s27 = smov 111   ;;  %v468_v1 = vld [vmem:[%s3703_s13 + $0x8] sm:$0xff] }
  0x23   : > { %s2833_s24 = scalar_lea.vmem %s3739_s0, %s2452_s20  ;;  %713 = vperm.xlu1 %2567, %v2412_v5   ;;  %v560_v55 = vld [vmem:[%s3740_s2] sm:$0xf]  ;;  %s3721_s20 = smov 1  }
  0x24   : > { %v466_v6 = vld [vmem:[%s2833_s24] sm:$0xff]  ;;  %744 = vperm.xlu0 %2566, %v2413_v10   ;;  %v561_v58 = vunpack.c.l.bf16 %v560_v55  ;;  %s3741_s1 = sld [smem:[#allocation11_spill]]  ;;  %s3742_s5 = sld [smem:[#allocation15_spill]] }
  0x25   : > { %v2836_v7 = vcombine.high %v466_v6, %v466_v6  ;;  %v509_v8 = vsel %vm508_vm0, %v466_v6, 0.0  ;;  %s3743_s4 = sld [smem:[#allocation14_spill]]  ;;  %s3748_s6 = sld [smem:[#allocation16_spill]] }
  0x26   : > { %v510_v9 = vrot.slane %v509_v8, 4  ;;  %s3750_s0 = smov 16   ;;  %s3751_s28 = smov 1  }
  0x27   : > { %v516_v12 = vsel %vm508_vm0, %v2836_v7, 0.0  ;;  %775 = vperm.xlu1 %2567, %v2414_v11  }
  0x28   : > { %v511_v13 = vadd.f32 %v510_v9, %v509_v8  ;;  %v517_v14 = vrot.slane %v516_v12, 4  ;;  %806 = vperm.xlu0 %2566, %v2415_v17  }
  0x2a   : > { %v512_v15 = vrot.slane %v511_v13, 2  ;;  %v518_v16 = vadd.f32 %v517_v14, %v516_v12  ;;  %v2914_v14 = vld [vmem:[%s3741_s1] ss:$2 sm:$0x3] }
  0x2b   : > { %837 = vperm.xlu1 %2567, %v2416_v18   ;;  %vm481_vm2 = vcmp.ge.f32.partialorder %v2914_v14, 1.0  ;;  %vm496_vm8 = vcmp.lt.f32.partialorder %v2914_v14, 15.0 }
  0x2c   : > { %v513_v19 = vadd.f32 %v512_v15, %v511_v13  ;;  %v519_v20 = vrot.slane %v518_v16, 2  ;;  %868 = vperm.xlu0 %2566, %v2417_v23   ;;  %v2919_v15 = vld [vmem:[%s3741_s1 + $0x1] ss:$2 sm:$0x3] }
  0x2d   : > { %vm482_vm3 = vcmp.ge.f32.partialorder %v2919_v15, 1.0  ;;  %vm488_vm5 = vcmp.lt.f32.partialorder %v2919_v15, 15.0 }
  0x2e   : > { %v514_v21 = vrot.slane %v513_v19, 1  ;;  %v520_v22 = vadd.f32 %v519_v20, %v518_v16  ;;  %v662_v16 = vlaneseq  ;;  %vm483_vm4 = vmand %vm481_vm2, %vm482_vm3 }
  0x2f   : > { %899 = vperm.xlu1 %2567, %v2418_v24   ;;  %vm489_vm7 = vmand %vm481_vm2, %vm488_vm5 }
  0x30   : > { %v515_v25 = vadd.f32 %v514_v21, %v513_v19  ;;  %v521_v26 = vrot.slane %v520_v22, 1  ;;  %v2925_v19 = vshrl.u32 %v662_v16, 7  ;;  %v2931_v20 = vand.u32 127, %v662_v16  ;;  %vm497_vm14 = vmand %vm496_vm8, %vm482_vm3 }
  0x32   : > { %v522_v27 = vadd.f32 %v521_v26, %v520_v22  ;;  %v524_v28 = vmul.f32 0.25, %v515_v25  ;;  %v2937_v23 = vsub.s32 0, %v2925_v19  ;;  %v2940_v24 = vsub.s32 1, %v2925_v19 }
  0x33   : > { %v2400_v25 = vsel %vm483_vm4, 1.0, %v2659_v0  ;;  %vm664_vm6 = vcmp.lt.s32.totalorder %v2931_v20, 17  ;;  %vm726_vm9 = vcmp.lt.s32.totalorder %v2931_v20, 15  ;;  %vm788_vm10 = vcmp.lt.s32.totalorder %v2931_v20, 127 }
  0x34   : > { %v525_v29 = vmul.f32 0.25, %v522_v27  ;;  %v2949_v26 = vrot.slane %v2400_v25, %v2937_v23  ;;  %v2952_v27 = vrot.slane %v2400_v25, %v2940_v24  ;;  %vm695_vm11 = vcmp.lt.s32.totalorder %v2931_v20, 16 }
  0x35   : > { %vm850_vm12 = vcmp.lt.s32.totalorder %v2931_v20, 112  ;;  %vm757_vm13 = vcmp.lt.s32.totalorder %v2931_v20, 1  ;;  %vm819_vm15 = vcmp.lt.s32.totalorder %v2931_v20, 113  ;;  %vm2669_vm4 = vmmov 0  }
  0x36   : > { %v528_v30 = vcombine.low %v524_v28, %v525_v29  ;;  %2465 = vmatprep.mubr.msk.f32.mxu0 %vm2669_vm4, %v2659_v0 }
  0x38   : > { %v530_v31 = vsub.f32 %v466_v6, %v528_v30 }
  0x3a   : > { %v531_v32 = vmul.f32 %v530_v31, %v530_v31 }
  0x3c   : > { %v533_v33 = vcombine.high %v531_v32, %v531_v32  ;;  %v535_v34 = vsel %vm508_vm0, %v531_v32, 0.0  ;;  %v2402_v32 = vsel %vm489_vm7, 1.0, %v2659_v0  ;;  %vm1313_vm7 = vcmask 1041408  }
  0x3d   : > { %v536_v35 = vrot.slane %v535_v34, 4 }
  0x3e   : > { %v542_v36 = vsel %vm508_vm0, %v533_v33, 0.0 }
  0x3f   : > { %v537_v37 = vadd.f32 %v536_v35, %v535_v34  ;;  %v543_v38 = vrot.slane %v542_v36, 4  ;;  %v2401_v35 = vsel %vm481_vm2, 1.0, %v2659_v0  ;;  %vm502_vm2 = vmand %vm496_vm8, %vm488_vm5 }
  0x41   : > { %v538_v39 = vrot.slane %v537_v37, 2  ;;  %v544_v40 = vadd.f32 %v543_v38, %v542_v36  ;;  %v2970_v38 = vrot.slane %v2402_v32, %v2937_v23 }
  0x43   : > { %v539_v41 = vadd.f32 %v538_v39, %v537_v37  ;;  %v545_v42 = vrot.slane %v544_v40, 2 }
  0x45   : > { %v540_v43 = vrot.slane %v539_v41, 1  ;;  %v546_v44 = vadd.f32 %v545_v42, %v544_v40  ;;  %v2978_v42 = vrot.slane %v2402_v32, %v2940_v24 }
  0x47   : > { %v541_v45 = vadd.f32 %v540_v43, %v539_v41  ;;  %v547_v46 = vrot.slane %v546_v44, 1  ;;  %v2404_v41 = vsel %vm488_vm5, 1.0, %v2659_v0  ;;  %v2406_v43 = vsel %vm496_vm8, 1.0, %v2659_v0 }
  0x48   : > { %v3006_v55 = vrot.slane %v2406_v43, %v2937_v23  ;;  %v3058_v14 = vrot.slane %v2406_v43, %v2940_v24  ;;  %vm1224_vm5 = vcmask 588800   ;;  %vm1322_vm8 = vcmask 15360  }
  0x49   : > { %v548_v47 = vadd.f32 %v547_v46, %v546_v44  ;;  %v549_v48 = vmul.f32 0.25, %v541_v45  ;;  %v2990_v46 = vrot.slane %v2401_v35, %v2937_v23 }
  0x4b   : > { %v550_v49 = vmul.f32 0.25, %v548_v47  ;;  %v551_v50 = vadd.f32 1e-06, %v549_v48  ;;  %v2993_v47 = vrot.slane %v2401_v35, %v2940_v24  ;;  %v2996_v48 = vrot.slane %v2404_v41, %v2937_v23 }
  0x4d   : > { %v552_v51 = vadd.f32 1e-06, %v550_v49  ;;  %2570 = vrsqrt.f32 %v551_v50  ;;  %v2999_v49 = vrot.slane %v2404_v41, %v2940_v24  ;;  %v2403_v50 = vsel %vm482_vm3, 1.0, %v2659_v0 }
  0x4e   : > { %vm881_vm3 = vcmp.lt.s32.totalorder %v2931_v20, 111 }
  0x4f   : > { %2572 = vrsqrt.f32 %v552_v51 }
  0x57   : > { %v2571_v52 = vpop.eup %2570 }
  0x59   : > { %v2573_v53 = vpop.eup %2572 }
  0x5a   : > { %v557_v54 = vcombine.low %v2571_v52, %v2573_v53 }
  0x5c   : > { %v559_v56 = vmul.f32 %v557_v54, %v530_v31 }
  0x5e   : > { %v568_v57 = vcombine.high %v559_v56, %v559_v56 }
  0x60   : > { %2408 = vmatprep.subr.msk.mxu1 %vm508_vm0, %v568_v57 }
  0x61   : > { %2409 = vmatpush1.msk.msra.mxu1 %vm508_vm0, %v559_v56 }
  0x62   : > { %2410 = vmatmul.mubr.msk.f32.vlgmr.msra.gmra.mrb[0].mxu1 %vm569_vm1, %v561_v58  ;;  %2458 = vmatprep.subr.mxu1 %v2659_v0 }
  0x63   : > { %2460 = vmatprep.mubr.msk.f32.mxu1 %vm2669_vm4, %v2659_v0 }
  0x9a   : > { %v565_v59 = vpop.permute.xlu0 %564 }
  0x9e   : > { %v683_v2 = vpop.permute.xlu1 %682 }
  0x9f   : > { %v653_v3 = vpop.permute.xlu0 %652 }
  0xa2   : > { %v2897_v4 = vpop.permute.xlu1 %713 }
  0xa3   : > { %v2899_v5 = vpop.permute.xlu0 %744 }
  0xa6   : > { %v2901_v6 = vpop.permute.xlu1 %775 }
  0xa7   : > { %v2903_v8 = vpop.permute.xlu0 %806 }
  0xaa   : > { %v2905_v9 = vpop.permute.xlu1 %837 }
  0xab   : > { %v2907_v10 = vpop.permute.xlu0 %868 }
  0xae   : > { %v2909_v11 = vpop.permute.xlu1 %899 }
 0x135   : > { %v643_v60 = vpop.f32.mrb[0].mxu1 }
 0x136   : > { %v2868_v61 = vadd.f32 %v643_v60, %v565_v59  ;;  %v645_v62 = vpop.f32.mrb[1].mxu1 }
 0x137   : > { %v646_v63 = vadd.f32 %v645_v62, %v565_v59 }
 0x138   : > { %691 = vrot.lane.b32.xlu1 %v2868_v61, %s3717_s15  ;;  %658 = vrot.lane.b32.xlu0 %v2868_v61, %s3723_s19  ;;  %v655_v34 = vmul.f32 %v653_v3, %v2868_v61 }
 0x139   : > { %v656_v33 = vmul.f32 %v653_v3, %v646_v63  ;;  %v2405_v3 = vsel %vm497_vm14, 1.0, %v2659_v0 }
 0x13c   : > { %753 = vrot.lane.b32.xlu1 %v2868_v61, %s3721_s20  ;;  %722 = vrot.lane.b32.xlu0 %v2868_v61, %s3715_s21 }
 0x140   : > { %815 = vrot.lane.b32.xlu1 %v2868_v61, %s3709_s25  ;;  %784 = vrot.lane.b32.xlu0 %v2868_v61, %s3711_s26 }
 0x144   : > { %660 = vrot.lane.b32.xlu1 %v646_v63, %s3723_s19  ;;  %846 = vrot.lane.b32.xlu0 %v2868_v61, %s3719_s22 }
 0x148   : > { %724 = vrot.lane.b32.xlu1 %v646_v63, %s3715_s21  ;;  %877 = vrot.lane.b32.xlu0 %v2868_v61, %s3713_s27  ;;  %s3744_s21 = smov 15  }
 0x14c   : > { %786 = vrot.lane.b32.xlu1 %v646_v63, %s3711_s26  ;;  %693 = vrot.lane.b32.xlu0 %v646_v63, %s3717_s15  ;;  %s3747_s26 = smov 113  }
 0x150   : > { %848 = vrot.lane.b32.xlu1 %v646_v63, %s3719_s22  ;;  %755 = vrot.lane.b32.xlu0 %v646_v63, %s3721_s20 }
 0x154   : > { %879 = vrot.lane.b32.xlu1 %v646_v63, %s3713_s27  ;;  %817 = vrot.lane.b32.xlu0 %v646_v63, %s3709_s25  ;;  %s3745_s27 = smov 111   ;;  %s3746_s25 = smov 127  }
 0x158   : > { %908 = vperm.xlu0 %2566, %v468_v1   ;;  %v3026_v1 = vrot.slane %v2403_v50, %v2937_v23 }
 0x1aa   : > { %v692_v12 = vpop.permute.xlu1 %691  ;;  %v659_v13 = vpop.permute.xlu0 %658 }
 0x1ae   : > { %v2923_v17 = vpop.permute.xlu1 %753  ;;  %v723_v18 = vpop.permute.xlu0 %722 }
 0x1b2   : > { %v2934_v21 = vpop.permute.xlu1 %815  ;;  %v785_v22 = vpop.permute.xlu0 %784 }
 0x1b6   : > { %v661_v28 = vpop.permute.xlu1 %660  ;;  %v2954_v29 = vpop.permute.xlu0 %846 }
 0x1b7   : > { %v665_v30 = vsel %vm664_vm6, %v659_v13, %v661_v28  ;;  %v666_v31 = vsel %vm664_vm6, %v661_v28, %v659_v13 }
 0x1b8   : > { %v678_v36 = vmul.f32 %v2949_v26, %v666_v31  ;;  %v679_v37 = vmul.f32 %v2952_v27, %v665_v30 }
 0x1ba   : > { %v725_v39 = vpop.permute.xlu1 %724  ;;  %v2972_v40 = vpop.permute.xlu0 %877  ;;  %v685_v51 = vmul.f32 %v683_v2, %v678_v36  ;;  %v686_v52 = vmul.f32 %v683_v2, %v679_v37  ;;  %v3029_v2 = vrot.slane %v2403_v50, %v2940_v24 }
 0x1bb   : > { %v727_v44 = vsel %vm726_vm9, %v723_v18, %v725_v39  ;;  %v728_v45 = vsel %vm726_vm9, %v725_v39, %v723_v18  ;;  %v3052_v39 = vrot.slane %v2405_v3, %v2937_v23 }
 0x1bc   : > { %v740_v56 = vmul.f32 %v2970_v38, %v728_v45  ;;  %v741_v57 = vmul.f32 %v2978_v42, %v727_v44  ;;  %v688_v13 = vadd.f32 %v686_v52, %v656_v33 }
 0x1be   : > { %v787_v53 = vpop.permute.xlu1 %786  ;;  %v694_v54 = vpop.permute.xlu0 %693  ;;  %v748_v32 = vmul.f32 %v2899_v5, %v741_v57 }
 0x1bf   : > { %v696_v58 = vsel %vm695_vm11, %v692_v12, %v694_v54  ;;  %v697_v59 = vsel %vm695_vm11, %v694_v54, %v692_v12  ;;  %v789_v60 = vsel %vm788_vm10, %v785_v22, %v787_v53  ;;  %v790_v61 = vsel %vm788_vm10, %v787_v53, %v785_v22 }
 0x1c0   : > { %v709_v62 = vmul.f32 %v2990_v46, %v697_v59  ;;  %v710_v63 = vmul.f32 %v2993_v47, %v696_v58  ;;  %v687_v12 = vadd.f32 %v685_v51, %v655_v34  ;;  %v802_v25 = vmul.f32 %v2996_v48, %v789_v60 }
 0x1c1   : > { %v803_v28 = vmul.f32 %v2999_v49, %v790_v61 }
 0x1c2   : > { %v716_v16 = vmul.f32 %v2897_v4, %v709_v62  ;;  %v717_v18 = vmul.f32 %v2897_v4, %v710_v63  ;;  %v756_v22 = vpop.permute.xlu0 %755  ;;  %v747_v4 = vmul.f32 %v2899_v5, %v740_v56  ;;  %v849_v35 = vpop.permute.xlu1 %848  ;;  %v2407_v5 = vsel %vm502_vm2, 1.0, %v2659_v0 }
 0x1c3   : > { %v758_v30 = vsel %vm757_vm13, %v2923_v17, %v756_v22  ;;  %v759_v31 = vsel %vm757_vm13, %v756_v22, %v2923_v17  ;;  %v3055_v17 = vrot.slane %v2405_v3, %v2940_v24  ;;  %v809_v45 = vmul.f32 %v2903_v8, %v802_v25 }
 0x1c4   : > { %v718_v33 = vadd.f32 %v716_v16, %v687_v12  ;;  %v719_v34 = vadd.f32 %v717_v18, %v688_v13  ;;  %v771_v36 = vmul.f32 %v3026_v1, %v759_v31  ;;  %v772_v37 = vmul.f32 %v3029_v2, %v758_v30 }
 0x1c5   : > { %v810_v50 = vmul.f32 %v2903_v8, %v803_v28  ;;  %v851_v53 = vsel %vm850_vm12, %v2954_v29, %v849_v35  ;;  %v852_v43 = vsel %vm850_vm12, %v849_v35, %v2954_v29  ;;  %v3088_v12 = vrot.slane %v2407_v5, %v2940_v24 }
 0x1c6   : > { %v750_v15 = vadd.f32 %v748_v32, %v719_v34  ;;  %v749_v41 = vadd.f32 %v747_v4, %v718_v33  ;;  %v818_v44 = vpop.permute.xlu0 %817  ;;  %v778_v51 = vmul.f32 %v2901_v6, %v771_v36  ;;  %v779_v52 = vmul.f32 %v2901_v6, %v772_v37  ;;  %v880_v59 = vpop.permute.xlu1 %879 }
 0x1c7   : > { %v820_v54 = vsel %vm819_vm15, %v2934_v21, %v818_v44  ;;  %v821_v8 = vsel %vm819_vm15, %v818_v44, %v2934_v21  ;;  %v864_v63 = vmul.f32 %v3006_v55, %v851_v53  ;;  %v865_v3 = vmul.f32 %v3058_v14, %v852_v43  ;;  %v470_v53 = vld [vmem:[%s3703_s13 + $0x18] sm:$0xff] }
 0x1c8   : > { %v780_v56 = vadd.f32 %v778_v51, %v749_v41  ;;  %v781_v57 = vadd.f32 %v779_v52, %v750_v15  ;;  %v833_v6 = vmul.f32 %v3052_v39, %v820_v54  ;;  %v834_v58 = vmul.f32 %v3055_v17, %v821_v8 }
 0x1c9   : > { %v3085_v21 = vrot.slane %v2407_v5, %v2937_v23  ;;  %v882_v13 = vsel %vm881_vm3, %v2972_v40, %v880_v59  ;;  %v883_v16 = vsel %vm881_vm3, %v880_v59, %v2972_v40  ;;  %v871_v22 = vmul.f32 %v2907_v10, %v864_v63 }
 0x1ca   : > { %v812_v60 = vadd.f32 %v810_v50, %v781_v57  ;;  %v811_v61 = vadd.f32 %v809_v45, %v780_v56  ;;  %v840_v29 = vmul.f32 %v2905_v9, %v833_v6  ;;  %v841_v62 = vmul.f32 %v2905_v9, %v834_v58  ;;  %v469_v56 = vld [vmem:[%s3703_s13 + $0x10] sm:$0xff]  ;;  %v1013_v57 = vld [vmem:[%s3743_s4] sm:$0x3] }
 0x1cb   : > { %v872_v25 = vmul.f32 %v2907_v10, %v865_v3  ;;  %v895_v28 = vmul.f32 %v3085_v21, %v882_v13  ;;  %v896_v30 = vmul.f32 %v3088_v12, %v883_v16 }
 0x1cc   : > { %v842_v18 = vadd.f32 %v840_v29, %v811_v61  ;;  %v843_v9 = vadd.f32 %v841_v62, %v812_v60  ;;  %v1014_v60 = vunpack.c.l.bf16 %v1013_v57 }
 0x1cd   : > { %v902_v4 = vmul.f32 %v2909_v11, %v895_v28  ;;  %v903_v32 = vmul.f32 %v2909_v11, %v896_v30  ;;  %v928_v11 = vld [vmem:[%s3742_s5] sm:$0x3] }
 0x1ce   : > { %v874_v24 = vadd.f32 %v872_v25, %v843_v9  ;;  %v873_v31 = vadd.f32 %v871_v22, %v842_v18  ;;  %v929_v51 = vunpack.c.l.bf16 %v928_v11  ;;  %v471_v18 = vld [vmem:[%s3703_s13 + $0x20] sm:$0xff] }
 0x1d0   : > { %v905_v33 = vadd.f32 %v903_v32, %v874_v24  ;;  %v904_v34 = vadd.f32 %v902_v4, %v873_v31 }
 0x1d7   : > { %v909_v35 = vpop.permute.xlu0 %908 }
 0x1d8   : > { %v911_v40 = vadd.f32 %v909_v35, %v904_v34  ;;  %v912_v36 = vadd.f32 %v909_v35, %v905_v33 }
 0x1da   : > { %v915_v37 = vrot.slane %v911_v40, 4  ;;  %v916_v15 = vrot.slane %v912_v36, 4 }
 0x1dc   : > { %v919_v41 = vmul.f32 %v915_v37, %v911_v40  ;;  %v920_v5 = vmul.f32 %v916_v15, %v912_v36 }
 0x1de   : > { %v921_v10 = vsel %vm508_vm0, %v919_v41, 0.0  ;;  %v922_v44 = vsel %vm508_vm0, %v920_v5, 0.0 }
 0x1df   : > { %v923_v45 = vadd.f32 %v922_v44, %v921_v10 }
 0x1e1   : > { %924 = vadd.xlane.f32.xlu1 %v923_v45 }
 0x26e   : > { %v925_v50 = vpop.xlane.xlu1 %924 }
 0x26f   : > { %v927_v52 = vmul.f32 0.00390625, %v925_v50 }
 0x271   : > { %2459 = vmatpush3.msk.msra.mxu1 %vm508_vm0, %v927_v52 }
 0x272   : > { %2461 = vmatmul.mubr.msk.f32.vlgmr.msra.gmra.mrb[2].mxu1 %vm569_vm1, %v929_v51 }
 0x273   : > { %1093 = vmatprep.mubr.f32.mxu1 %v2659_v0 }
 0x345   : > { %v1002_v43 = vpop.f32.mrb[2].mxu1 }
 0x346   : > { %v1003_v54 = vadd.f32 %v1002_v43, %v470_v53  ;;  %v2462_v8 = vpop.f32.mrb[3].mxu1 }
 0x348   : > { %1008 = vperm.xlu0 %2566, %v1003_v54  }
 0x34c   : > { %1017 = vperm.xlu0 %2566, %v469_v56  }
 0x3c7   : > { %v1009_v6 = vpop.permute.xlu0 %1008 }
 0x3c8   : > { %v1011_v58 = vmul.f32 %v1009_v6, %v919_v41  ;;  %v1012_v59 = vmul.f32 %v1009_v6, %v920_v5 }
 0x3ca   : > { %2421 = vmatprep.subr.msk.mxu1 %vm508_vm0, %v1012_v59 }
 0x3cb   : > { %2422 = vmatpush1.msk.msra.mxu1 %vm508_vm0, %v1011_v58  ;;  %v1018_v61 = vpop.permute.xlu0 %1017 }
 0x3cc   : > { %2423 = vmatmul.mubr.msk.f32.vlgmr.msra.gmra.mrb[4].mxu1 %vm569_vm1, %v1014_v60 }
 0x3cd   : > { %1292 = vmatprep.mubr.f32.mxu1 %v2659_v0 }
 0x49f   : > { %v1095_v29 = vpop.f32.mrb[4].mxu1 }
 0x4a0   : > { %v3125_v62 = vadd.f32 %v1095_v29, %v1018_v61  ;;  %v1097_v63 = vpop.f32.mrb[5].mxu1 }
 0x4a1   : > { %v3127_v3 = vadd.f32 %v1097_v63, %v1018_v61 }
 0x4a2   : > { %1148 = vst [vmem:[#allocation2 + $0x40] sm:$0xf] %v3125_v62  ;;  %1100 = vrot.lane.b32.xlu0 %v3125_v62, %s3723_s19 }
 0x4a3   : > { %1149 = vst [vmem:[#allocation2 + $0x48] sm:$0xf] %v3127_v3  ;;  %1138 = vrot.lane.b32.xlu1 %v3127_v3, %s3721_s20 }
 0x4a6   : > { %1112 = vrot.lane.b32.xlu0 %v3125_v62, %s3717_s15 }
 0x4a7   : > { %1176 = vrot.lane.b32.xlu1 %v3125_v62, %s3719_s22 }
 0x4a9   : > { %v3139_v13 = vld [vmem:[#allocation2 + $0x40] sm:$0xff] }
 0x4aa   : > { %1124 = vrot.lane.b32.xlu0 %v3125_v62, %s3744_s21  ;;  %v3143_v16 = vld [vmem:[#allocation2 + $0x48] sm:$0xff]  ;;  %1455 = vst [vmem:[#allocation2 + $0x40] sm:$0xfc] %v2659_v0 }
 0x4ab   : > { %1188 = vrot.lane.b32.xlu1 %v3125_v62, %s3745_s27  ;;  %1456 = vst [vmem:[#allocation2 + $0x48] sm:$0xfc] %v2659_v0 }
 0x4ae   : > { %1136 = vrot.lane.b32.xlu0 %v3125_v62, %s3721_s20 }
 0x4af   : > { %1221 = vperm.xlu1 %2567, %v471_v18  }
 0x4b2   : > { %1102 = vrot.lane.b32.xlu0 %v3127_v3, %s3723_s19 }
 0x4b6   : > { %1114 = vrot.lane.b32.xlu0 %v3127_v3, %s3717_s15 }
 0x4ba   : > { %1126 = vrot.lane.b32.xlu0 %v3127_v3, %s3744_s21 }
 0x4be   : > { %1152 = vrot.lane.b32.xlu0 %v3125_v62, %s3746_s25 }
 0x4c2   : > { %1164 = vrot.lane.b32.xlu0 %v3125_v62, %s3747_s26 }
 0x4c6   : > { %1154 = vrot.lane.b32.xlu0 %v3127_v3, %s3746_s25 }
 0x4ca   : > { %1166 = vrot.lane.b32.xlu0 %v3127_v3, %s3747_s26 }
 0x4ce   : > { %1178 = vrot.lane.b32.xlu0 %v3127_v3, %s3719_s22 }
 0x4d2   : > { %1190 = vrot.lane.b32.xlu0 %v3127_v3, %s3745_s27 }
 0x514   : > { %v1101_v9 = vpop.permute.xlu0 %1100 }
 0x515   : > { %v1139_v28 = vpop.permute.xlu1 %1138 }
 0x518   : > { %v1113_v22 = vpop.permute.xlu0 %1112 }
 0x51c   : > { %v1125_v25 = vpop.permute.xlu0 %1124 }
 0x520   : > { %v1137_v30 = vpop.permute.xlu0 %1136 }
 0x521   : > { %v1140_v24 = vsel %vm757_vm13, %v1137_v30, %v1139_v28  ;;  %v1141_v31 = vsel %vm757_vm13, %v1139_v28, %v1137_v30 }
 0x522   : > { %v1142_v4 = vmul.f32 %v1141_v31, %v3026_v1  ;;  %v1143_v32 = vmul.f32 %v1140_v24, %v3029_v2 }
 0x524   : > { %1144 = vst [vmem:[#allocation2 + $0x30] sm:$0xf] %v1142_v4  ;;  %1145 = vst [vmem:[#allocation2 + $0x38] sm:$0xf] %v1143_v32  ;;  %v1103_v33 = vpop.permute.xlu0 %1102  ;;  %v1177_v4 = vpop.permute.xlu1 %1176 }
 0x525   : > { %v1104_v34 = vsel %vm664_vm6, %v1101_v9, %v1103_v33  ;;  %v1105_v35 = vsel %vm664_vm6, %v1103_v33, %v1101_v9 }
 0x526   : > { %v1106_v40 = vmul.f32 %v1105_v35, %v2949_v26  ;;  %v1107_v36 = vmul.f32 %v1104_v34, %v2952_v27 }
 0x528   : > { %1108 = vst [vmem:[#allocation2] sm:$0xf] %v1106_v40  ;;  %1109 = vst [vmem:[#allocation2 + $0x8] sm:$0xf] %v1107_v36  ;;  %v1115_v37 = vpop.permute.xlu0 %1114 }
 0x529   : > { %v1116_v15 = vsel %vm695_vm11, %v1113_v22, %v1115_v37  ;;  %v1117_v41 = vsel %vm695_vm11, %v1115_v37, %v1113_v22 }
 0x52a   : > { %v1118_v5 = vmul.f32 %v1117_v41, %v2990_v46  ;;  %v1119_v10 = vmul.f32 %v1116_v15, %v2993_v47 }
 0x52b   : > { %v1206_v44 = vld [vmem:[#allocation2 + $0x30] sm:$0xff]  ;;  %v1207_v45 = vld [vmem:[#allocation2 + $0x38] sm:$0xff] }
 0x52c   : > { %1451 = vst [vmem:[#allocation2 + $0x30] sm:$0xfc] %v2659_v0  ;;  %1452 = vst [vmem:[#allocation2 + $0x38] sm:$0xfc] %v2659_v0  ;;  %v1127_v11 = vpop.permute.xlu0 %1126 }
 0x52d   : > { %1120 = vst [vmem:[#allocation2 + $0x10] sm:$0xf] %v1118_v5  ;;  %1121 = vst [vmem:[#allocation2 + $0x18] sm:$0xf] %v1119_v10  ;;  %v1128_v50 = vsel %vm726_vm9, %v1125_v25, %v1127_v11  ;;  %v1129_v51 = vsel %vm726_vm9, %v1127_v11, %v1125_v25  ;;  %v1189_v5 = vpop.permute.xlu1 %1188 }
 0x52e   : > { %v1130_v52 = vmul.f32 %v1129_v51, %v2970_v38  ;;  %v1131_v53 = vmul.f32 %v1128_v50, %v2978_v42 }
 0x52f   : > { %v1200_v43 = vld [vmem:[#allocation2] sm:$0xff]  ;;  %v1201_v54 = vld [vmem:[#allocation2 + $0x8] sm:$0xff] }
 0x530   : > { %1415 = vst [vmem:[#allocation2] sm:$0xfc] %v2659_v0  ;;  %1416 = vst [vmem:[#allocation2 + $0x8] sm:$0xfc] %v2659_v0  ;;  %v1153_v8 = vpop.permute.xlu0 %1152 }
 0x531   : > { %1132 = vst [vmem:[#allocation2 + $0x20] sm:$0xf] %v1130_v52  ;;  %1133 = vst [vmem:[#allocation2 + $0x28] sm:$0xf] %v1131_v53 }
 0x534   : > { %v1202_v56 = vld [vmem:[#allocation2 + $0x10] sm:$0xff]  ;;  %v1203_v57 = vld [vmem:[#allocation2 + $0x18] sm:$0xff]  ;;  %v1165_v6 = vpop.permute.xlu0 %1164 }
 0x535   : > { %1427 = vst [vmem:[#allocation2 + $0x10] sm:$0xfc] %v2659_v0  ;;  %1428 = vst [vmem:[#allocation2 + $0x18] sm:$0xfc] %v2659_v0  ;;  %v2468_v58 = vpack.c.bf16 %v1203_v57, %v1201_v54  ;;  %v2470_v59 = vpack.c.bf16 %v1202_v56, %v1200_v43 }
 0x537   : > { %2469 = vmatprep.subr.bf16.mxu1 %v2468_v58  ;;  %v1222_v58 = vpop.permute.xlu1 %1221 }
 0x538   : > { %v1204_v60 = vld [vmem:[#allocation2 + $0x20] sm:$0xff]  ;;  %v1205_v61 = vld [vmem:[#allocation2 + $0x28] sm:$0xff]  ;;  %2471 = vmatpush1.bf16.msra.mxu1 %v2470_v59  ;;  %v1155_v29 = vpop.permute.xlu0 %1154 }
 0x539   : > { %1439 = vst [vmem:[#allocation2 + $0x20] sm:$0xfc] %v2659_v0  ;;  %1440 = vst [vmem:[#allocation2 + $0x28] sm:$0xfc] %v2659_v0  ;;  %v2472_v63 = vpack.c.bf16 %v1207_v45, %v1205_v61  ;;  %v2474_v18 = vpack.c.bf16 %v1206_v44, %v1204_v60  ;;  %v1156_v9 = vsel %vm788_vm10, %v1153_v8, %v1155_v29 }
 0x53a   : > { %v1157_v22 = vsel %vm788_vm10, %v1155_v29, %v1153_v8  ;;  %v1158_v25 = vmul.f32 %v1156_v9, %v2996_v48 }
 0x53b   : > { %v1159_v28 = vmul.f32 %v1157_v22, %v2999_v49  ;;  %2473 = vmatprep.subr.bf16.mxu1 %v2472_v63 }
 0x53c   : > { %2475 = vmatpush1.bf16.msra.mxu1 %v2474_v18  ;;  %1160 = vst [vmem:[#allocation2 + $0x50] sm:$0xf] %v1158_v25  ;;  %v1167_v30 = vpop.permute.xlu0 %1166 }
 0x53d   : > { %1161 = vst [vmem:[#allocation2 + $0x58] sm:$0xf] %v1159_v28  ;;  %v1168_v24 = vsel %vm819_vm15, %v1165_v6, %v1167_v30  ;;  %v1169_v31 = vsel %vm819_vm15, %v1167_v30, %v1165_v6  ;;  %v1218_v6 = vld [vmem:[%s3748_s6] sm:$0x1f] }
 0x53e   : > { %v1170_v32 = vmul.f32 %v1168_v24, %v3052_v39  ;;  %v1171_v33 = vmul.f32 %v1169_v31, %v3055_v17 }
 0x540   : > { %1172 = vst [vmem:[#allocation2 + $0x60] sm:$0xf] %v1170_v32  ;;  %1173 = vst [vmem:[#allocation2 + $0x68] sm:$0xf] %v1171_v33  ;;  %v1179_v34 = vpop.permute.xlu0 %1178  ;;  %v476_v32 = vld [vmem:[%s3703_s13 + $0x48] sm:$0xff] }
 0x541   : > { %v1180_v35 = vsel %vm850_vm12, %v1177_v4, %v1179_v34  ;;  %v1181_v40 = vsel %vm850_vm12, %v1179_v34, %v1177_v4  ;;  %v473_v4 = vld [vmem:[%s3703_s13 + $0x30] sm:$0xff]  ;;  %v2437_v34 = vld [vmem:[%s3699_s9 + $0x4] sm:$0xf] }
 0x542   : > { %v1182_v36 = vmul.f32 %v1180_v35, %v3006_v55  ;;  %v1183_v37 = vmul.f32 %v1181_v40, %v3058_v14  ;;  %v2436_v33 = vld [vmem:[%s3699_s9 + $0x10] sm:$0xf]  ;;  %v2439_v35 = vld [vmem:[%s3699_s9 + $0xc] sm:$0xf]  ;;  %v2441_v40 = vld [vmem:[%s3699_s9 + $0x18] sm:$0xf] }
 0x543   : > { %v1210_v15 = vld [vmem:[#allocation2 + $0x50] sm:$0xff] }
 0x544   : > { %v1211_v41 = vld [vmem:[#allocation2 + $0x58] sm:$0xff]  ;;  %1467 = vst [vmem:[#allocation2 + $0x50] sm:$0xfc] %v2659_v0  ;;  %1184 = vst [vmem:[#allocation2 + $0x70] sm:$0xf] %v1182_v36  ;;  %v1191_v10 = vpop.permute.xlu0 %1190  ;;  %v2478_v45 = vpack.c.bf16 %v1210_v15, %v3139_v13 }
 0x545   : > { %1468 = vst [vmem:[#allocation2 + $0x58] sm:$0xfc] %v2659_v0  ;;  %1185 = vst [vmem:[#allocation2 + $0x78] sm:$0xf] %v1183_v37  ;;  %v2476_v44 = vpack.c.bf16 %v1211_v41, %v3143_v16  ;;  %v1192_v11 = vsel %vm881_vm3, %v1189_v5, %v1191_v10  ;;  %v1193_v50 = vsel %vm881_vm3, %v1191_v10, %v1189_v5  ;;  %v2443_v36 = vld [vmem:[%s3699_s9 + $0x20] sm:$0xf] }
 0x546   : > { %v1194_v51 = vmul.f32 %v1192_v11, %v3085_v21  ;;  %v1195_v52 = vmul.f32 %v1193_v50, %v3088_v12 }
 0x547   : > { %2477 = vmatprep.subr.bf16.mxu1 %v2476_v44  ;;  %v1212_v53 = vld [vmem:[#allocation2 + $0x60] sm:$0xff]  ;;  %v1213_v43 = vld [vmem:[#allocation2 + $0x68] sm:$0xff] }
 0x548   : > { %2479 = vmatpush1.bf16.msra.mxu1 %v2478_v45  ;;  %1479 = vst [vmem:[#allocation2 + $0x60] sm:$0xfc] %v2659_v0  ;;  %1480 = vst [vmem:[#allocation2 + $0x68] sm:$0xfc] %v2659_v0 }
 0x549   : > { %1196 = vst [vmem:[#allocation2 + $0x80] sm:$0xf] %v1194_v51  ;;  %1197 = vst [vmem:[#allocation2 + $0x88] sm:$0xf] %v1195_v52 }
 0x54b   : > { %v1214_v13 = vld [vmem:[#allocation2 + $0x70] sm:$0xff] }
 0x54c   : > { %v1215_v16 = vld [vmem:[#allocation2 + $0x78] sm:$0xff]  ;;  %1491 = vst [vmem:[#allocation2 + $0x70] sm:$0xfc] %v2659_v0  ;;  %v2482_v8 = vpack.c.bf16 %v1214_v13, %v1212_v53 }
 0x54d   : > { %1492 = vst [vmem:[#allocation2 + $0x78] sm:$0xfc] %v2659_v0  ;;  %v2480_v54 = vpack.c.bf16 %v1215_v16, %v1213_v43 }
 0x54f   : > { %2481 = vmatprep.subr.bf16.mxu1 %v2480_v54 }
 0x550   : > { %2483 = vmatpush1.bf16.msra.mxu1 %v2482_v8  ;;  %v1217_v56 = vld [vmem:[#allocation2 + $0x88] sm:$0xff]  ;;  %v1216_v57 = vld [vmem:[#allocation2 + $0x80] sm:$0xff] }
 0x551   : > { %1244 = vmatprep.subr.mxu1 %v1217_v56  ;;  %1504 = vst [vmem:[#allocation2 + $0x88] sm:$0xfc] %v2659_v0  ;;  %1503 = vst [vmem:[#allocation2 + $0x80] sm:$0xfc] %v2659_v0 }
 0x554   : > { %1245 = vmatpush1.msra.mxu1 %v1216_v57 }
 0x555   : > { %2424 = vmatmul.mubr.msk.f32.vlgmr.msra.gmra.mrb[6].mxu1 %vm1224_vm5, %v1218_v6 }
 0x556   : > { %1782 = vmatprep.mubr.f32.mxu1 %v2659_v0 }
 0x628   : > { %v1294_v59 = vpop.f32.mrb[6].mxu1 }
 0x629   : > { %v3243_v60 = vadd.f32 %v1294_v59, %v1222_v58  ;;  %v1296_v61 = vpop.f32.mrb[7].mxu1 }
 0x62a   : > { %v3245_v29 = vadd.f32 %v1296_v61, %v1222_v58 }
 0x62b   : > { %v3248_v63 = vmax.f32 %v3243_v60, 0.0 }
 0x62c   : > { %v1300_v18 = vmax.f32 %v3245_v29, 0.0 }
 0x62d   : > { %v1401_v9 = vrot.slane %v3248_v63, 2  ;;  %v1314_v22 = vsel %vm1313_vm7, %v3248_v63, 0.0 }
 0x62e   : > { %v1315_v25 = vsel %vm1313_vm7, %v1300_v18, 0.0  ;;  %v1402_v28 = vrot.slane %v1300_v18, 2 }
 0x62f   : > { %1405 = vrot.lane.b32.xlu1 %v1401_v9, %s3723_s19  ;;  %1453 = vst [vmem:[#allocation2 + $0x40] sm:$0x3] %v1401_v9  ;;  %v1316_v30 = vadd.f32 %v1315_v25, %v1314_v22 }
 0x630   : > { %1454 = vst [vmem:[#allocation2 + $0x48] sm:$0x3] %v1402_v28 }
 0x631   : > { %1317 = vadd.xlane.f32.xlu0 %v1316_v30 }
 0x633   : > { %1407 = vrot.lane.b32.xlu1 %v1402_v28, %s3723_s19 }
 0x636   : > { %v3257_v24 = vld [vmem:[#allocation2 + $0x40] sm:$0xff] }
 0x637   : > { %1417 = vrot.lane.b32.xlu1 %v1401_v9, %s3717_s15  ;;  %v3260_v31 = vld [vmem:[#allocation2 + $0x48] sm:$0xff]  ;;  %2125 = vst [vmem:[#allocation2 + $0x40] sm:$0x3] %v3248_v63  ;;  %2127 = vst [vmem:[#allocation2 + $0x40] sm:$0xfc] %v2659_v0 }
 0x638   : > { %2126 = vst [vmem:[#allocation2 + $0x48] sm:$0x3] %v1300_v18  ;;  %2128 = vst [vmem:[#allocation2 + $0x48] sm:$0xfc] %v2659_v0 }
 0x63b   : > { %1419 = vrot.lane.b32.xlu1 %v1402_v28, %s3717_s15 }
 0x63f   : > { %1429 = vrot.lane.b32.xlu1 %v1401_v9, %s3744_s21 }
 0x643   : > { %1431 = vrot.lane.b32.xlu1 %v1402_v28, %s3744_s21 }
 0x647   : > { %1441 = vrot.lane.b32.xlu1 %v1401_v9, %s3721_s20  ;;  %1457 = vrot.lane.b32.xlu0 %v1401_v9, %s3746_s25 }
 0x64b   : > { %1443 = vrot.lane.b32.xlu1 %v1402_v28, %s3721_s20  ;;  %1493 = vrot.lane.b32.xlu0 %v1401_v9, %s3745_s27  ;;  %s3749_s20 = smov 112  }
 0x64f   : > { %1459 = vrot.lane.b32.xlu1 %v1402_v28, %s3746_s25  ;;  %1526 = vperm.xlu0 %2566, %v473_v4  }
 0x653   : > { %1469 = vrot.lane.b32.xlu1 %v1401_v9, %s3747_s26  ;;  %1706 = vperm.xlu0 %2566, %v476_v32  }
 0x657   : > { %1471 = vrot.lane.b32.xlu1 %v1402_v28, %s3747_s26  ;;  %2079 = vrot.lane.b32.xlu0 %v1300_v18, %s3723_s19  ;;  %s3752_s19 = smov 17  }
 0x65b   : > { %1481 = vrot.lane.b32.xlu1 %v1401_v9, %s3749_s20  ;;  %2091 = vrot.lane.b32.xlu0 %v1300_v18, %s3750_s0 }
 0x65f   : > { %1483 = vrot.lane.b32.xlu1 %v1402_v28, %s3749_s20  ;;  %2103 = vrot.lane.b32.xlu0 %v1300_v18, %s3744_s21 }
 0x663   : > { %1495 = vrot.lane.b32.xlu1 %v1402_v28, %s3745_s27  ;;  %2115 = vrot.lane.b32.xlu0 %v1300_v18, %s3751_s28 }
 0x667   : > { %2131 = vrot.lane.b32.xlu0 %v1300_v18, %s3746_s25 }
 0x66b   : > { %2143 = vrot.lane.b32.xlu0 %v1300_v18, %s3747_s26 }
 0x66f   : > { %2155 = vrot.lane.b32.xlu0 %v1300_v18, %s3749_s20 }
 0x673   : > { %2167 = vrot.lane.b32.xlu0 %v1300_v18, %s3745_s27  ;;  %v1320_v18 = vld [vmem:[%s3702_s12] sm:$0xf] }
 0x674   : > { %v1321_v30 = vunpack.c.l.bf16 %v1320_v18 }
 0x677   : > { %1888 = vperm.xlu0 %2566, %v2436_v33  }
 0x67b   : > { %1923 = vperm.xlu0 %2566, %v2437_v34  }
 0x67f   : > { %1961 = vperm.xlu0 %2566, %v2439_v35  }
 0x683   : > { %1999 = vperm.xlu0 %2566, %v2441_v40  }
 0x687   : > { %2037 = vperm.xlu0 %2566, %v2443_v36  }
 0x6a1   : > { %v1406_v37 = vpop.permute.xlu1 %1405 }
 0x6a5   : > { %v1408_v15 = vpop.permute.xlu1 %1407 }
 0x6a6   : > { %v1409_v41 = vsel %vm664_vm6, %v1406_v37, %v1408_v15  ;;  %v1410_v5 = vsel %vm664_vm6, %v1408_v15, %v1406_v37 }
 0x6a7   : > { %v1411_v10 = vmul.f32 %v1410_v5, %v2949_v26  ;;  %v1412_v44 = vmul.f32 %v1409_v41, %v2952_v27 }
 0x6a9   : > { %1413 = vst [vmem:[#allocation2] sm:$0x3] %v1411_v10  ;;  %1414 = vst [vmem:[#allocation2 + $0x8] sm:$0x3] %v1412_v44  ;;  %v1418_v45 = vpop.permute.xlu1 %1417 }
 0x6ad   : > { %v1420_v11 = vpop.permute.xlu1 %1419 }
 0x6ae   : > { %v1421_v50 = vsel %vm695_vm11, %v1418_v45, %v1420_v11  ;;  %v1422_v51 = vsel %vm695_vm11, %v1420_v11, %v1418_v45 }
 0x6af   : > { %v1423_v52 = vmul.f32 %v1422_v51, %v2990_v46  ;;  %v1424_v53 = vmul.f32 %v1421_v50, %v2993_v47 }
 0x6b0   : > { %v1506_v43 = vld [vmem:[#allocation2 + $0x8] sm:$0xff]  ;;  %v1505_v13 = vld [vmem:[#allocation2] sm:$0xff] }
 0x6b1   : > { %1425 = vst [vmem:[#allocation2 + $0x10] sm:$0x3] %v1423_v52  ;;  %1426 = vst [vmem:[#allocation2 + $0x18] sm:$0x3] %v1424_v53  ;;  %v1430_v16 = vpop.permute.xlu1 %1429 }
 0x6b2   : > { %2088 = vst [vmem:[#allocation2 + $0x8] sm:$0xfc] %v2659_v0  ;;  %2087 = vst [vmem:[#allocation2] sm:$0xfc] %v2659_v0 }
 0x6b5   : > { %v1432_v54 = vpop.permute.xlu1 %1431 }
 0x6b6   : > { %v1433_v8 = vsel %vm726_vm9, %v1430_v16, %v1432_v54  ;;  %v1434_v56 = vsel %vm726_vm9, %v1432_v54, %v1430_v16 }
 0x6b7   : > { %v1435_v57 = vmul.f32 %v1434_v56, %v2970_v38  ;;  %v1436_v6 = vmul.f32 %v1433_v8, %v2978_v42 }
 0x6b8   : > { %v1508_v58 = vld [vmem:[#allocation2 + $0x18] sm:$0xff]  ;;  %v1507_v59 = vld [vmem:[#allocation2 + $0x10] sm:$0xff] }
 0x6b9   : > { %1437 = vst [vmem:[#allocation2 + $0x20] sm:$0x3] %v1435_v57  ;;  %1438 = vst [vmem:[#allocation2 + $0x28] sm:$0x3] %v1436_v6  ;;  %v1442_v61 = vpop.permute.xlu1 %1441  ;;  %v2484_v34 = vpack.c.bf16 %v1508_v58, %v1506_v43  ;;  %v2486_v37 = vpack.c.bf16 %v1507_v59, %v1505_v13 }
 0x6ba   : > { %2100 = vst [vmem:[#allocation2 + $0x18] sm:$0xfc] %v2659_v0  ;;  %2099 = vst [vmem:[#allocation2 + $0x10] sm:$0xfc] %v2659_v0 }
 0x6bd   : > { %v1444_v9 = vpop.permute.xlu1 %1443 }
 0x6be   : > { %v1445_v22 = vsel %vm757_vm13, %v1442_v61, %v1444_v9  ;;  %v1446_v25 = vsel %vm757_vm13, %v1444_v9, %v1442_v61  ;;  %v1318_v28 = vpop.xlane.xlu0 %1317 }
 0x6bf   : > { %v1447_v4 = vmul.f32 %v1446_v25, %v3026_v1  ;;  %v1448_v32 = vmul.f32 %v1445_v22, %v3029_v2  ;;  %v1319_v33 = vmul.f32 0.00390625, %v1318_v28 }
 0x6c0   : > { %v1510_v35 = vld [vmem:[#allocation2 + $0x28] sm:$0xff]  ;;  %v1509_v40 = vld [vmem:[#allocation2 + $0x20] sm:$0xff] }
 0x6c1   : > { %1449 = vst [vmem:[#allocation2 + $0x30] sm:$0x3] %v1447_v4  ;;  %1450 = vst [vmem:[#allocation2 + $0x38] sm:$0x3] %v1448_v32  ;;  %v1460_v36 = vpop.permute.xlu1 %1459  ;;  %2464 = vmatpush3.msk.msra.mxu0 %vm1313_vm7, %v1319_v33 }
 0x6c2   : > { %2112 = vst [vmem:[#allocation2 + $0x28] sm:$0xfc] %v2659_v0  ;;  %2111 = vst [vmem:[#allocation2 + $0x20] sm:$0xfc] %v2659_v0  ;;  %2466 = vmatmul.mubr.msk.f32.vlgmr.msra.gmra.mrb[0].mxu0 %vm1322_vm8, %v1321_v30  ;;  %2485 = vmatprep.subr.bf16.mxu0 %v2484_v34  ;;  %v1458_v15 = vpop.permute.xlu0 %1457 }
 0x6c3   : > { %v1461_v41 = vsel %vm788_vm10, %v1458_v15, %v1460_v36  ;;  %v1462_v5 = vsel %vm788_vm10, %v1460_v36, %v1458_v15  ;;  %2487 = vmatpush1.bf16.msra.mxu0 %v2486_v37  ;;  %1596 = vmatprep.mubr.f32.mxu0 %v2659_v0 }
 0x6c4   : > { %v1463_v10 = vmul.f32 %v1461_v41, %v2996_v48  ;;  %v1464_v44 = vmul.f32 %v1462_v5, %v2999_v49  ;;  %v1523_v41 = vld [vmem:[%s3698_s8] sm:$0xff] }
 0x6c5   : > { %v1470_v45 = vpop.permute.xlu1 %1469  ;;  %v475_v5 = vld [vmem:[%s3703_s13 + $0x40] sm:$0xff] }
 0x6c6   : > { %1465 = vst [vmem:[#allocation2 + $0x50] sm:$0x3] %v1463_v10  ;;  %1466 = vst [vmem:[#allocation2 + $0x58] sm:$0x3] %v1464_v44  ;;  %v1494_v28 = vpop.permute.xlu0 %1493 }
 0x6c8   : > { %v1512_v11 = vld [vmem:[#allocation2 + $0x38] sm:$0xff]  ;;  %v1511_v50 = vld [vmem:[#allocation2 + $0x30] sm:$0xff] }
 0x6c9   : > { %v1472_v51 = vpop.permute.xlu1 %1471  ;;  %v2488_v52 = vpack.c.bf16 %v1512_v11, %v1510_v35  ;;  %2124 = vst [vmem:[#allocation2 + $0x38] sm:$0xfc] %v2659_v0  ;;  %v2490_v53 = vpack.c.bf16 %v1511_v50, %v1509_v40  ;;  %2123 = vst [vmem:[#allocation2 + $0x30] sm:$0xfc] %v2659_v0  ;;  %v2425_v11 = vmul.f32 -1.442695, %v3243_v60 }
 0x6ca   : > { %v1473_v43 = vsel %vm819_vm15, %v1470_v45, %v1472_v51  ;;  %v1474_v13 = vsel %vm819_vm15, %v1472_v51, %v1470_v45  ;;  %v2426_v50 = vmul.f32 -1.442695, %v3245_v29 }
 0x6cb   : > { %v1475_v16 = vmul.f32 %v1473_v43, %v3052_v39  ;;  %v1476_v54 = vmul.f32 %v1474_v13, %v3055_v17  ;;  %2489 = vmatprep.subr.bf16.mxu0 %v2488_v52  ;;  %2574 = vpow2.f32 %v2425_v11 }
 0x6cc   : > { %2491 = vmatpush1.bf16.msra.mxu0 %v2490_v53  ;;  %2576 = vpow2.f32 %v2426_v50 }
 0x6cd   : > { %1477 = vst [vmem:[#allocation2 + $0x60] sm:$0x3] %v1475_v16  ;;  %1478 = vst [vmem:[#allocation2 + $0x68] sm:$0x3] %v1476_v54  ;;  %v1482_v8 = vpop.permute.xlu1 %1481  ;;  %v1516_v56 = vld [vmem:[#allocation2 + $0x58] sm:$0xff]  ;;  %v1515_v57 = vld [vmem:[#allocation2 + $0x50] sm:$0xff] }
 0x6ce   : > { %v2492_v6 = vpack.c.bf16 %v1516_v56, %v3260_v31  ;;  %2140 = vst [vmem:[#allocation2 + $0x58] sm:$0xfc] %v2659_v0  ;;  %v2494_v58 = vpack.c.bf16 %v1515_v57, %v3257_v24  ;;  %2139 = vst [vmem:[#allocation2 + $0x50] sm:$0xfc] %v2659_v0  ;;  %v1527_v43 = vpop.permute.xlu0 %1526  ;;  %v477_v56 = vld [vmem:[%s3703_s13 + $0x50] sm:$0xff] }
 0x6d0   : > { %2493 = vmatprep.subr.bf16.mxu0 %v2492_v6 }
 0x6d1   : > { %v1484_v59 = vpop.permute.xlu1 %1483  ;;  %2495 = vmatpush1.bf16.msra.mxu0 %v2494_v58 }
 0x6d2   : > { %v1485_v61 = vsel %vm850_vm12, %v1482_v8, %v1484_v59  ;;  %v1486_v18 = vsel %vm850_vm12, %v1484_v59, %v1482_v8 }
 0x6d3   : > { %v1487_v9 = vmul.f32 %v1485_v61, %v3006_v55  ;;  %v1488_v22 = vmul.f32 %v1486_v18, %v3058_v14 }
 0x6d4   : > { %v1518_v31 = vld [vmem:[#allocation2 + $0x68] sm:$0xff]  ;;  %v1517_v25 = vld [vmem:[#allocation2 + $0x60] sm:$0xff] }
 0x6d5   : > { %1489 = vst [vmem:[#allocation2 + $0x70] sm:$0x3] %v1487_v9  ;;  %1490 = vst [vmem:[#allocation2 + $0x78] sm:$0x3] %v1488_v22  ;;  %v1496_v24 = vpop.permute.xlu1 %1495  ;;  %v2575_v51 = vpop.eup %2574  ;;  %v1632_v22 = vsub.s32 4, %v2925_v19 }
 0x6d6   : > { %2152 = vst [vmem:[#allocation2 + $0x68] sm:$0xfc] %v2659_v0  ;;  %2151 = vst [vmem:[#allocation2 + $0x60] sm:$0xfc] %v2659_v0  ;;  %v1497_v30 = vsel %vm881_vm3, %v1494_v28, %v1496_v24  ;;  %v1498_v4 = vsel %vm881_vm3, %v1496_v24, %v1494_v28  ;;  %v2577_v52 = vpop.eup %2576  ;;  %v1307_v53 = vadd.f32 1.0, %v2575_v51 }
 0x6d7   : > { %v1499_v32 = vmul.f32 %v1497_v30, %v3085_v21  ;;  %v1500_v33 = vmul.f32 %v1498_v4, %v3088_v12  ;;  %v1308_v60 = vadd.f32 1.0, %v2577_v52  ;;  %v2440_v19 = vld [vmem:[%s3699_s9 + $0x14] sm:$0xf] }
 0x6d8   : > { %2578 = vrcp.f32 %v1307_v53 }
 0x6d9   : > { %1501 = vst [vmem:[#allocation2 + $0x80] sm:$0x3] %v1499_v32  ;;  %1502 = vst [vmem:[#allocation2 + $0x88] sm:$0x3] %v1500_v33  ;;  %2580 = vrcp.f32 %v1308_v60 }
 0x6dc   : > { %v1520_v34 = vld [vmem:[#allocation2 + $0x78] sm:$0xff]  ;;  %v1519_v35 = vld [vmem:[#allocation2 + $0x70] sm:$0xff] }
 0x6dd   : > { %v2496_v40 = vpack.c.bf16 %v1520_v34, %v1518_v31  ;;  %2164 = vst [vmem:[#allocation2 + $0x78] sm:$0xfc] %v2659_v0  ;;  %v2498_v36 = vpack.c.bf16 %v1519_v35, %v1517_v25  ;;  %2163 = vst [vmem:[#allocation2 + $0x70] sm:$0xfc] %v2659_v0  ;;  %v3422_v34 = vpop.permute.xlu0 %1706 }
 0x6df   : > { %2497 = vmatprep.subr.bf16.mxu0 %v2496_v40 }
 0x6e0   : > { %2499 = vmatpush1.bf16.msra.mxu0 %v2498_v36  ;;  %v1522_v37 = vld [vmem:[#allocation2 + $0x88] sm:$0xff]  ;;  %v1521_v15 = vld [vmem:[#allocation2 + $0x80] sm:$0xff] }
 0x6e1   : > { %1548 = vmatprep.subr.mxu0 %v1522_v37  ;;  %2176 = vst [vmem:[#allocation2 + $0x88] sm:$0xfc] %v2659_v0  ;;  %2175 = vst [vmem:[#allocation2 + $0x80] sm:$0xfc] %v2659_v0  ;;  %v2080_v35 = vpop.permute.xlu0 %2079  ;;  %v2594_v36 = vld [vmem:[%s2833_s24] sm:$0xff] }
 0x6e2   : > { %v2579_v29 = vpop.eup %2578  ;;  %v1620_v37 = vcombine.low %v2594_v36, %v2594_v36 }
 0x6e3   : > { %v2581_v16 = vpop.eup %2580  ;;  %v1628_v58 = vsub.f32 1.0, %v2579_v29 }
 0x6e4   : > { %1549 = vmatpush1.msra.mxu0 %v1521_v15  ;;  %v1629_v61 = vsub.f32 1.0, %v2581_v16  ;;  %v1647_v11 = vrot.slane %v2581_v16, %v1632_v22 }
 0x6e5   : > { %2429 = vmatmul.mubr.msk.f32.vlgmr.msra.gmra.mrb[2].mxu0 %vm1224_vm5, %v1523_v41  ;;  %v1633_v24 = vrot.slane %v1628_v58, %v1632_v22  ;;  %v2092_v40 = vpop.permute.xlu0 %2091 }
 0x6e6   : > { %2268 = vmatprep.mubr.f32.mxu0 %v2659_v0  ;;  %v1637_v4 = vrot.slane %v1629_v61, %v1632_v22 }
 0x795   : > { %v1395_v10 = vpop.f32.mrb[0].mxu0 }
 0x796   : > { %v1396_v44 = vadd.f32 %v1395_v10, %v475_v5  ;;  %v2467_v45 = vpop.f32.mrb[1].mxu0 }
 0x797   : > { %v1643_v45 = vrot.slane %v2579_v29, %v1632_v22 }
 0x798   : > { %1617 = vperm.xlu1 %2567, %v1396_v44   ;;  %v2104_v44 = vpop.permute.xlu0 %2103 }
 0x79c   : > { %2077 = vrot.lane.b32.xlu1 %v3248_v63, %s3752_s19 }
 0x7a0   : > { %2089 = vrot.lane.b32.xlu1 %v3248_v63, %s3750_s0 }
 0x7a4   : > { %2101 = vrot.lane.b32.xlu1 %v3248_v63, %s3744_s21 }
 0x7a8   : > { %2113 = vrot.lane.b32.xlu1 %v3248_v63, %s3751_s28 }
 0x7ac   : > { %2129 = vrot.lane.b32.xlu1 %v3248_v63, %s3746_s25 }
 0x7b0   : > { %2141 = vrot.lane.b32.xlu1 %v3248_v63, %s3747_s26 }
 0x7b4   : > { %2153 = vrot.lane.b32.xlu1 %v3248_v63, %s3749_s20 }
 0x7b8   : > { %2165 = vrot.lane.b32.xlu1 %v3248_v63, %s3745_s27  ;;  %v1598_v13 = vpop.f32.mrb[2].mxu0  ;;  %v1893_v63 = vld [vmem:[%s3699_s9] sm:$0xf] }
 0x7b9   : > { %v1599_v54 = vadd.f32 %v1598_v13, %v1527_v43  ;;  %v1600_v8 = vpop.f32.mrb[3].mxu0 }
 0x7ba   : > { %v1601_v57 = vadd.f32 %v1600_v8, %v1527_v43 }
 0x7bb   : > { %v1603_v6 = vadd.f32 1.0, %v1599_v54  ;;  %v1609_v9 = vrot.slane %v1599_v54, 4 }
 0x7bc   : > { %v1604_v59 = vadd.f32 1.0, %v1601_v57  ;;  %1801 = vperm.xlu1 %2567, %v477_v56   ;;  %v1610_v25 = vrot.slane %v1601_v57, 4 }
 0x7bd   : > { %v1605_v18 = vmul.f32 %v1603_v6, %v3125_v62  ;;  %v2438_v62 = vld [vmem:[%s3699_s9 + $0x8] sm:$0xf]  ;;  %v2116_v6 = vpop.permute.xlu0 %2115 }
 0x7be   : > { %v1606_v31 = vmul.f32 %v1604_v59, %v3127_v3  ;;  %v2442_v3 = vld [vmem:[%s3699_s9 + $0x1c] sm:$0xf] }
 0x7bf   : > { %v1613_v28 = vadd.f32 %v1609_v9, %v1605_v18 }
 0x7c0   : > { %v1614_v30 = vadd.f32 %v1610_v25, %v1606_v31  ;;  %1904 = vperm.xlu1 %2567, %v1893_v63  }
 0x7c1   : > { %v1638_v32 = vmul.f32 %v1633_v24, %v1613_v28 }
 0x7c2   : > { %v1639_v33 = vmul.f32 %v1637_v4, %v1614_v30  ;;  %v2132_v4 = vpop.permute.xlu0 %2131 }
 0x7c4   : > { %1942 = vperm.xlu1 %2567, %v2438_v62  }
 0x7c8   : > { %1980 = vperm.xlu1 %2567, %v2440_v19  }
 0x7cc   : > { %2018 = vperm.xlu1 %2567, %v2442_v3  }
 0x817   : > { %v1618_v15 = vpop.permute.xlu1 %1617 }
 0x818   : > { %v1622_v41 = vmul.f32 %v1620_v37, %v1618_v15  ;;  %v1623_v5 = vmul.f32 %v2594_v36, %v1618_v15  ;;  %v1624_v10 = vrot.slane %v1618_v15, 4 }
 0x81a   : > { %v1626_v50 = vadd.f32 %v1624_v10, %v1622_v41  ;;  %v1627_v51 = vadd.f32 %v1624_v10, %v1623_v5 }
 0x81b   : > { %v2078_v52 = vpop.permute.xlu1 %2077 }
 0x81c   : > { %v1648_v53 = vmul.f32 %v1643_v45, %v1626_v50  ;;  %v1649_v60 = vmul.f32 %v1647_v11, %v1627_v51  ;;  %v2081_v43 = vsel %vm664_vm6, %v2078_v52, %v2080_v35  ;;  %v2082_v13 = vsel %vm664_vm6, %v2080_v35, %v2078_v52  ;;  %v2144_v50 = vpop.permute.xlu0 %2143 }
 0x81d   : > { %v2083_v54 = vmul.f32 %v2082_v13, %v2949_v26  ;;  %v2084_v8 = vmul.f32 %v2081_v43, %v2952_v27 }
 0x81e   : > { %v1652_v56 = vrot.slane %v1648_v53, 4  ;;  %v1653_v57 = vrot.slane %v1649_v60, 4 }
 0x81f   : > { %2085 = vst [vmem:[#allocation2] sm:$0x3] %v2083_v54  ;;  %2086 = vst [vmem:[#allocation2 + $0x8] sm:$0x3] %v2084_v8  ;;  %v2090_v29 = vpop.permute.xlu1 %2089 }
 0x820   : > { %v3431_v16 = vadd.f32 %v1652_v56, %v1638_v32  ;;  %v3433_v58 = vadd.f32 %v1653_v57, %v1639_v33  ;;  %v2093_v59 = vsel %vm695_vm11, %v2090_v29, %v2092_v40  ;;  %v2094_v61 = vsel %vm695_vm11, %v2092_v40, %v2090_v29 }
 0x821   : > { %v2095_v18 = vmul.f32 %v2094_v61, %v2990_v46  ;;  %v2096_v9 = vmul.f32 %v2093_v59, %v2993_v47 }
 0x822   : > { %v3442_v22 = vadd.f32 %v2594_v36, %v3431_v16  ;;  %v3446_v63 = vadd.f32 %v3433_v58, %v2836_v7 }
 0x823   : > { %2097 = vst [vmem:[#allocation2 + $0x10] sm:$0x3] %v2095_v18  ;;  %2098 = vst [vmem:[#allocation2 + $0x18] sm:$0x3] %v2096_v9  ;;  %v2102_v31 = vpop.permute.xlu1 %2101 }
 0x824   : > { %v1660_v25 = vsel %vm508_vm0, %v3442_v22, 0.0  ;;  %v1667_v28 = vsel %vm508_vm0, %v3446_v63, 0.0  ;;  %v2105_v24 = vsel %vm726_vm9, %v2102_v31, %v2104_v44  ;;  %v2106_v30 = vsel %vm726_vm9, %v2104_v44, %v2102_v31  ;;  %v2156_v31 = vpop.permute.xlu0 %2155 }
 0x825   : > { %v1661_v32 = vrot.slane %v1660_v25, 4  ;;  %v1668_v62 = vrot.slane %v1667_v28, 4  ;;  %v2107_v7 = vmul.f32 %v2106_v30, %v2970_v38  ;;  %v2108_v33 = vmul.f32 %v2105_v24, %v2978_v42 }
 0x826   : > { %v2178_v5 = vld [vmem:[#allocation2 + $0x8] sm:$0xff]  ;;  %v2177_v45 = vld [vmem:[#allocation2] sm:$0xff] }
 0x827   : > { %v1662_v19 = vadd.f32 %v1661_v32, %v1660_v25  ;;  %2109 = vst [vmem:[#allocation2 + $0x20] sm:$0x3] %v2107_v7  ;;  %2110 = vst [vmem:[#allocation2 + $0x28] sm:$0x3] %v2108_v33  ;;  %v2114_v3 = vpop.permute.xlu1 %2113  ;;  %v1669_v35 = vadd.f32 %v1668_v62, %v1667_v28 }
 0x828   : > { %v2117_v40 = vsel %vm757_vm13, %v2114_v3, %v2116_v6  ;;  %v2118_v36 = vsel %vm757_vm13, %v2116_v6, %v2114_v3 }
 0x829   : > { %v1663_v37 = vrot.slane %v1662_v19, 2  ;;  %v2119_v15 = vmul.f32 %v2118_v36, %v3026_v1  ;;  %v2120_v41 = vmul.f32 %v2117_v40, %v3029_v2  ;;  %v1670_v10 = vrot.slane %v1669_v35, 2 }
 0x82a   : > { %v2180_v44 = vld [vmem:[#allocation2 + $0x18] sm:$0xff]  ;;  %v2179_v11 = vld [vmem:[#allocation2 + $0x10] sm:$0xff] }
 0x82b   : > { %2121 = vst [vmem:[#allocation2 + $0x30] sm:$0x3] %v2119_v15  ;;  %2122 = vst [vmem:[#allocation2 + $0x38] sm:$0x3] %v2120_v41  ;;  %v2130_v51 = vpop.permute.xlu1 %2129  ;;  %v2500_v52 = vpack.c.bf16 %v2180_v44, %v2178_v5  ;;  %v2502_v53 = vpack.c.bf16 %v2179_v11, %v2177_v45  ;;  %v1671_v60 = vadd.f32 %v1670_v10, %v1669_v35  ;;  %v2185_v5 = vld [vmem:[#allocation2 + $0x40] sm:$0xff]  ;;  %v2186_v45 = vld [vmem:[#allocation2 + $0x48] sm:$0xff] }
 0x82c   : > { %v1664_v43 = vadd.f32 %v1663_v37, %v1662_v19  ;;  %v2133_v13 = vsel %vm788_vm10, %v2130_v51, %v2132_v4  ;;  %v2134_v54 = vsel %vm788_vm10, %v2132_v4, %v2130_v51  ;;  %v2168_v51 = vpop.permute.xlu0 %2167 }
 0x82d   : > { %v2135_v8 = vmul.f32 %v2133_v13, %v2996_v48  ;;  %v2136_v56 = vmul.f32 %v2134_v54, %v2999_v49  ;;  %2501 = vmatprep.subr.bf16.mxu0 %v2500_v52  ;;  %v1672_v57 = vrot.slane %v1671_v60, 1 }
 0x82e   : > { %v1665_v6 = vrot.slane %v1664_v43, 1  ;;  %2503 = vmatpush1.bf16.msra.mxu0 %v2502_v53  ;;  %v2182_v24 = vld [vmem:[#allocation2 + $0x28] sm:$0xff]  ;;  %v2181_v62 = vld [vmem:[#allocation2 + $0x20] sm:$0xff] }
 0x82f   : > { %2137 = vst [vmem:[#allocation2 + $0x50] sm:$0x3] %v2135_v8  ;;  %2138 = vst [vmem:[#allocation2 + $0x58] sm:$0x3] %v2136_v56  ;;  %v2142_v29 = vpop.permute.xlu1 %2141  ;;  %v1673_v59 = vadd.f32 %v1672_v57, %v1671_v60 }
 0x830   : > { %v1666_v61 = vadd.f32 %v1665_v6, %v1664_v43  ;;  %v2145_v18 = vsel %vm819_vm15, %v2142_v29, %v2144_v50  ;;  %v2146_v9 = vsel %vm819_vm15, %v2144_v50, %v2142_v29 }
 0x831   : > { %v2147_v25 = vmul.f32 %v2145_v18, %v3052_v39  ;;  %v2148_v28 = vmul.f32 %v2146_v9, %v3055_v17  ;;  %v1675_v30 = vmul.f32 0.25, %v1673_v59 }
 0x832   : > { %v1674_v4 = vmul.f32 0.25, %v1666_v61  ;;  %v2184_v32 = vld [vmem:[#allocation2 + $0x38] sm:$0xff]  ;;  %v2183_v7 = vld [vmem:[#allocation2 + $0x30] sm:$0xff] }
 0x833   : > { %2149 = vst [vmem:[#allocation2 + $0x60] sm:$0x3] %v2147_v25  ;;  %2150 = vst [vmem:[#allocation2 + $0x68] sm:$0x3] %v2148_v28  ;;  %v2154_v33 = vpop.permute.xlu1 %2153  ;;  %v2504_v19 = vpack.c.bf16 %v2184_v32, %v2182_v24  ;;  %v2506_v3 = vpack.c.bf16 %v2183_v7, %v2181_v62  ;;  %v3477_v35 = vsub.f32 %v3446_v63, %v1675_v30 }
 0x834   : > { %v3480_v40 = vsub.f32 %v3442_v22, %v1674_v4  ;;  %v2157_v36 = vsel %vm850_vm12, %v2154_v33, %v2156_v31  ;;  %v2158_v37 = vsel %vm850_vm12, %v2156_v31, %v2154_v33 }
 0x835   : > { %v2159_v15 = vmul.f32 %v2157_v36, %v3006_v55  ;;  %v2160_v41 = vmul.f32 %v2158_v37, %v3058_v14  ;;  %2505 = vmatprep.subr.bf16.mxu0 %v2504_v19  ;;  %v1679_v10 = vmul.f32 %v3477_v35, %v3477_v35 }
 0x836   : > { %v1678_v44 = vmul.f32 %v3480_v40, %v3480_v40  ;;  %2507 = vmatpush1.bf16.msra.mxu0 %v2506_v3  ;;  %v2188_v11 = vld [vmem:[#allocation2 + $0x58] sm:$0xff]  ;;  %v2187_v50 = vld [vmem:[#allocation2 + $0x50] sm:$0xff] }
 0x837   : > { %2161 = vst [vmem:[#allocation2 + $0x70] sm:$0x3] %v2159_v15  ;;  %2162 = vst [vmem:[#allocation2 + $0x78] sm:$0x3] %v2160_v41  ;;  %v2166_v52 = vpop.permute.xlu1 %2165  ;;  %v2508_v53 = vpack.c.bf16 %v2188_v11, %v2186_v45  ;;  %v2510_v60 = vpack.c.bf16 %v2187_v50, %v2185_v5  ;;  %v1687_v43 = vsel %vm508_vm0, %v1679_v10, 0.0 }
 0x838   : > { %v1680_v13 = vsel %vm508_vm0, %v1678_v44, 0.0  ;;  %v2169_v54 = vsel %vm881_vm3, %v2166_v52, %v2168_v51  ;;  %v2170_v8 = vsel %vm881_vm3, %v2168_v51, %v2166_v52  ;;  %v1688_v56 = vrot.slane %v1687_v43, 4  ;;  %v1702_v44 = vld [vmem:[%s3700_s10] sm:$0xf] }
 0x839   : > { %v1681_v57 = vrot.slane %v1680_v13, 4  ;;  %v2171_v6 = vmul.f32 %v2169_v54, %v3085_v21  ;;  %v2172_v29 = vmul.f32 %v2170_v8, %v3088_v12  ;;  %2509 = vmatprep.subr.bf16.mxu0 %v2508_v53  ;;  %v1703_v51 = vunpack.c.l.bf16 %v1702_v44  ;;  %v2195_v53 = vld [vmem:[%s3697_s7] sm:$0xff] }
 0x83a   : > { %2511 = vmatpush1.bf16.msra.mxu0 %v2510_v60  ;;  %v1689_v59 = vadd.f32 %v1688_v56, %v1687_v43  ;;  %v2190_v31 = vld [vmem:[#allocation2 + $0x68] sm:$0xff]  ;;  %v2189_v28 = vld [vmem:[#allocation2 + $0x60] sm:$0xff] }
 0x83b   : > { %v1682_v61 = vadd.f32 %v1681_v57, %v1680_v13  ;;  %2173 = vst [vmem:[#allocation2 + $0x80] sm:$0x3] %v2171_v6  ;;  %2174 = vst [vmem:[#allocation2 + $0x88] sm:$0x3] %v2172_v29  ;;  %v1797_v54 = vld [vmem:[%s3701_s11] sm:$0x3]  ;;  %v1802_v6 = vpop.permute.xlu1 %1801 }
 0x83c   : > { %v1690_v18 = vrot.slane %v1689_v59, 2 }
 0x83d   : > { %v1683_v9 = vrot.slane %v1682_v61, 2 }
 0x83e   : > { %v2192_v25 = vld [vmem:[#allocation2 + $0x78] sm:$0xff]  ;;  %v2191_v24 = vld [vmem:[#allocation2 + $0x70] sm:$0xff]  ;;  %v1691_v30 = vadd.f32 %v1690_v18, %v1689_v59 }
 0x83f   : > { %v1684_v4 = vadd.f32 %v1683_v9, %v1682_v61  ;;  %v2512_v32 = vpack.c.bf16 %v2192_v25, %v2190_v31  ;;  %v2514_v62 = vpack.c.bf16 %v2191_v24, %v2189_v28  ;;  %v472_v9 = vld [vmem:[%s3703_s13 + $0x28] sm:$0xff]  ;;  %v474_v31 = vld [vmem:[%s3703_s13 + $0x38] sm:$0xff]  ;;  %v1889_v28 = vpop.permute.xlu0 %1888 }
 0x840   : > { %v1692_v7 = vrot.slane %v1691_v30, 1 }
 0x841   : > { %v1685_v33 = vrot.slane %v1684_v4, 1  ;;  %2513 = vmatprep.subr.bf16.mxu0 %v2512_v32 }
 0x842   : > { %2515 = vmatpush1.bf16.msra.mxu0 %v2514_v62  ;;  %v2194_v19 = vld [vmem:[#allocation2 + $0x88] sm:$0xff]  ;;  %v1693_v3 = vadd.f32 %v1692_v7, %v1691_v30  ;;  %v2193_v41 = vld [vmem:[#allocation2 + $0x80] sm:$0xff]  ;;  %v1905_v30 = vpop.permute.xlu1 %1904 }
 0x843   : > { %v1686_v36 = vadd.f32 %v1685_v33, %v1684_v4  ;;  %2220 = vmatprep.subr.mxu0 %v2194_v19  ;;  %v1924_v24 = vpop.permute.xlu0 %1923 }
 0x844   : > { %v1695_v37 = vmul.f32 0.25, %v1693_v3 }
 0x845   : > { %v1694_v15 = vmul.f32 0.25, %v1686_v36 }
 0x846   : > { %2221 = vmatpush1.msra.mxu0 %v2193_v41  ;;  %v1697_v5 = vadd.f32 1e-06, %v1695_v37  ;;  %v1943_v32 = vpop.permute.xlu1 %1942 }
 0x847   : > { %v1696_v10 = vadd.f32 1e-06, %v1694_v15  ;;  %2446 = vmatmul.mubr.msk.f32.vlgmr.msra.gmra.mrb[4].mxu0 %vm1224_vm5, %v2195_v53  ;;  %v1962_v4 = vpop.permute.xlu0 %1961 }
 0x848   : > { %2582 = vrsqrt.f32 %v1697_v5 }
 0x849   : > { %2584 = vrsqrt.f32 %v1696_v10 }
 0x84a   : > { %v1981_v7 = vpop.permute.xlu1 %1980 }
 0x84b   : > { %v3567_v62 = vpop.permute.xlu0 %1999 }
 0x84e   : > { %v3571_v19 = vpop.permute.xlu1 %2018 }
 0x84f   : > { %v3569_v33 = vpop.permute.xlu0 %2037 }
 0x852   : > { %v2583_v45 = vpop.eup %2582 }
 0x853   : > { %v2585_v11 = vpop.eup %2584  ;;  %v1701_v50 = vmul.f32 %v2583_v45, %v3477_v35 }
 0x854   : > { %v1700_v52 = vmul.f32 %v2585_v11, %v3480_v40 }
 0x855   : > { %2430 = vmatprep.subr.msk.mxu1 %vm508_vm0, %v1701_v50 }
 0x856   : > { %2431 = vmatpush1.msk.msra.mxu1 %vm508_vm0, %v1700_v52 }
 0x857   : > { %2432 = vmatmul.mubr.msk.f32.vlgmr.msra.gmra.mrb[8].mxu1 %vm569_vm1, %v1703_v51 }
 0x858   : > { %1877 = vmatprep.mubr.f32.mxu1 %v2659_v0  ;;  %v1798_v0 = vunpack.c.l.bf16 %v1797_v54 }
 0x91a   : > { %v3549_v18 = vpop.f32.mrb[4].mxu0 }
 0x91b   : > { %v3565_v25 = vpop.f32.mrb[5].mxu0 }
 0x92a   : > { %v1784_v60 = vpop.f32.mrb[8].mxu1 }
 0x92b   : > { %v1785_v35 = vadd.f32 %v1784_v60, %v3422_v34  ;;  %v1786_v43 = vpop.f32.mrb[9].mxu1 }
 0x92c   : > { %v1787_v40 = vadd.f32 %v1786_v43, %v3422_v34 }
 0x92d   : > { %v1791_v13 = vrot.slane %v1785_v35, 4 }
 0x92e   : > { %v1792_v8 = vrot.slane %v1787_v40, 4 }
 0x92f   : > { %v1795_v57 = vmul.f32 %v1791_v13, %v1785_v35 }
 0x930   : > { %v1796_v56 = vmul.f32 %v1792_v8, %v1787_v40 }
 0x932   : > { %2433 = vmatprep.subr.msk.mxu1 %vm508_vm0, %v1796_v56 }
 0x933   : > { %2434 = vmatpush1.msk.msra.mxu1 %vm508_vm0, %v1795_v57 }
 0x934   : > { %2435 = vmatmul.mubr.msk.f32.vlgmr.msra.gmra.mrb[10].mxu1 %vm569_vm1, %v1798_v0 }
 0xa07   : > { %v1879_v29 = vpop.f32.mrb[10].mxu1 }
 0xa08   : > { %v3521_v59 = vadd.f32 %v1879_v29, %v1802_v6  ;;  %v1881_v34 = vpop.f32.mrb[11].mxu1 }
 0xa09   : > { %v3535_v61 = vadd.f32 %v1881_v34, %v1802_v6 }
 0xa0a   : > { %1913 = vrot.lane.b32.xlu0 %v3521_v59, %s3750_s0  ;;  %1894 = vrot.lane.b32.xlu1 %v3521_v59, %s3752_s19 }
 0xa0e   : > { %1951 = vrot.lane.b32.xlu0 %v3521_v59, %s3751_s28  ;;  %1932 = vrot.lane.b32.xlu1 %v3521_v59, %s3744_s21 }
 0xa12   : > { %1989 = vrot.lane.b32.xlu0 %v3521_v59, %s3747_s26  ;;  %1970 = vrot.lane.b32.xlu1 %v3521_v59, %s3746_s25 }
 0xa16   : > { %1896 = vrot.lane.b32.xlu0 %v3535_v61, %s3752_s19  ;;  %2008 = vrot.lane.b32.xlu1 %v3521_v59, %s3749_s20 }
 0xa1a   : > { %1934 = vrot.lane.b32.xlu0 %v3535_v61, %s3744_s21  ;;  %1915 = vrot.lane.b32.xlu1 %v3535_v61, %s3750_s0 }
 0xa1e   : > { %1972 = vrot.lane.b32.xlu0 %v3535_v61, %s3746_s25  ;;  %1953 = vrot.lane.b32.xlu1 %v3535_v61, %s3751_s28 }
 0xa22   : > { %2010 = vrot.lane.b32.xlu0 %v3535_v61, %s3749_s20  ;;  %1991 = vrot.lane.b32.xlu1 %v3535_v61, %s3747_s26  ;;  %s458_s20 = sand.u32 1, %s2649_s30   ;;  %s2453_s26 = sshll.u32 %s2767_s17, 7 }
 0xa23   : > { %s3648_s15 = scalar_lea.hbm %s3704_s14, %s2453_s26  ;;  %s2319_s24 = scalar_lea.sflag [#allocation4], %s458_s20 }
 0xa24   : > { %s2670_s17 = smov [#allocation3]  }
 0xa25   : > { %s2599_s18 = sshll.u32 %s2670_s17, 4  ;;  %s2600_s18 = int_to_ptr.vmem [resolvable:$false] %s2599_s18 }
 0xa26   : > { %2029 = vrot.lane.b32.xlu0 %v3535_v61, %s3745_s27  ;;  %2027 = vrot.lane.b32.xlu1 %v3521_v59, %s3745_s27  ;;  %s2396_s27 = sshll.u32 %s458_s20, 3  ;;  %s2601_s1 = scalar_lea.vmem %s2600_s18, 256 }
 0xa27   : > { %s460_s19 = scalar_lea.vmem [#allocation3], %s2396_s27 }
 0xa28   : > { %s2333_s4 = sshll.u32 %s460_s19, 4  ;;  %s3650_s4 = int_to_ptr.vmem [resolvable:$true] %s2333_s4 }
 0xa29   : > { %s2595_s22 = scalar_lea.vmem %s3650_s4, 128  ;;  %p2602_p0 = scmp.lt.s32.totalorder %s3650_s4, %s2600_s18 }
 0xa2a   : > { %2198 = vperm.xlu0 %2566, %v472_v9   ;;  %2060 = vperm.xlu1 %2567, %v474_v31   ;;  %p2596_p11 = scmp.ne.s32.totalorder %s3650_s4, %s2595_s22  ;;  %p2603_p1 = scmp.lt.s32.totalorder %s2601_s1, %s2595_s22 }
 0xa2c   : > { %p2597_p12 = pnand %p2596_p11, %p2784_p5  ;;  %p2604_p2 = por %p2603_p1, %p2602_p0 }
 0xa2e   : > { %p2598_p13 = pneg %p2597_p12 }
 0xa30   : > { %p2605_p3 = pnand %p2604_p2, %p2598_p13 }
 0xa7c   : > { %v1895_v3 = vpop.permute.xlu1 %1894  ;;  %v1914_v36 = vpop.permute.xlu0 %1913 }
 0xa80   : > { %v1933_v37 = vpop.permute.xlu1 %1932  ;;  %v1952_v15 = vpop.permute.xlu0 %1951 }
 0xa84   : > { %v1971_v41 = vpop.permute.xlu1 %1970  ;;  %v1990_v5 = vpop.permute.xlu0 %1989 }
 0xa88   : > { %v2009_v10 = vpop.permute.xlu1 %2008  ;;  %v1897_v44 = vpop.permute.xlu0 %1896 }
 0xa89   : > { %v1898_v45 = vsel %vm664_vm6, %v1895_v3, %v1897_v44  ;;  %v1899_v11 = vsel %vm664_vm6, %v1897_v44, %v1895_v3 }
 0xa8a   : > { %v1900_v50 = vmul.f32 %v1899_v11, %v2949_v26  ;;  %v1901_v51 = vmul.f32 %v1898_v45, %v2952_v27  ;;  %v1891_v26 = vmul.f32 %v1889_v28, %v3521_v59  ;;  %v1892_v27 = vmul.f32 %v1889_v28, %v3535_v61 }
 0xa8c   : > { %v1907_v52 = vmul.f32 %v1905_v30, %v1900_v50  ;;  %v1908_v53 = vmul.f32 %v1905_v30, %v1901_v51  ;;  %v1916_v60 = vpop.permute.xlu1 %1915  ;;  %v1935_v35 = vpop.permute.xlu0 %1934 }
 0xa8d   : > { %v1917_v43 = vsel %vm695_vm11, %v1914_v36, %v1916_v60  ;;  %v1918_v40 = vsel %vm695_vm11, %v1916_v60, %v1914_v36  ;;  %v1936_v13 = vsel %vm726_vm9, %v1933_v37, %v1935_v35  ;;  %v1937_v54 = vsel %vm726_vm9, %v1935_v35, %v1933_v37 }
 0xa8e   : > { %v1919_v8 = vmul.f32 %v1918_v40, %v2990_v46  ;;  %v1920_v56 = vmul.f32 %v1917_v43, %v2993_v47  ;;  %v1938_v0 = vmul.f32 %v1937_v54, %v2970_v38  ;;  %v1939_v57 = vmul.f32 %v1936_v13, %v2978_v42 }
 0xa8f   : > { %v1909_v6 = vadd.f32 %v1907_v52, %v1891_v26  ;;  %v1910_v29 = vadd.f32 %v1908_v53, %v1892_v27 }
 0xa90   : > { %v1926_v34 = vmul.f32 %v1924_v24, %v1919_v8  ;;  %v1927_v9 = vmul.f32 %v1924_v24, %v1920_v56  ;;  %v1954_v31 = vpop.permute.xlu1 %1953  ;;  %v1973_v30 = vpop.permute.xlu0 %1972  ;;  %v1945_v3 = vmul.f32 %v1943_v32, %v1938_v0  ;;  %v1946_v36 = vmul.f32 %v1943_v32, %v1939_v57 }
 0xa91   : > { %v1955_v37 = vsel %vm757_vm13, %v1952_v15, %v1954_v31  ;;  %v1956_v46 = vsel %vm757_vm13, %v1954_v31, %v1952_v15  ;;  %v1974_v44 = vsel %vm788_vm10, %v1971_v41, %v1973_v30  ;;  %v1975_v24 = vsel %vm788_vm10, %v1973_v30, %v1971_v41 }
 0xa92   : > { %v1928_v28 = vadd.f32 %v1926_v34, %v1909_v6  ;;  %v1929_v47 = vadd.f32 %v1927_v9, %v1910_v29  ;;  %v1957_v38 = vmul.f32 %v1956_v46, %v3026_v1  ;;  %v1958_v42 = vmul.f32 %v1955_v37, %v3029_v2 }
 0xa93   : > { %v1976_v15 = vmul.f32 %v1974_v44, %v2996_v48  ;;  %v1977_v53 = vmul.f32 %v1975_v24, %v2999_v49 }
 0xa94   : > { %v1947_v45 = vadd.f32 %v1945_v3, %v1928_v28  ;;  %v1948_v32 = vadd.f32 %v1946_v36, %v1929_v47  ;;  %v1964_v11 = vmul.f32 %v1962_v4, %v1957_v38  ;;  %v1965_v50 = vmul.f32 %v1962_v4, %v1958_v42  ;;  %v1992_v51 = vpop.permute.xlu1 %1991  ;;  %v2011_v52 = vpop.permute.xlu0 %2010 }
 0xa95   : > { %v1993_v1 = vsel %vm819_vm15, %v1990_v5, %v1992_v51  ;;  %v1994_v2 = vsel %vm819_vm15, %v1992_v51, %v1990_v5  ;;  %v1983_v40 = vmul.f32 %v1981_v7, %v1976_v15  ;;  %v1984_v4 = vmul.f32 %v1981_v7, %v1977_v53 }
 0xa96   : > { %v1966_v60 = vadd.f32 %v1964_v11, %v1947_v45  ;;  %v1967_v35 = vadd.f32 %v1965_v50, %v1948_v32  ;;  %v1995_v41 = vmul.f32 %v1993_v1, %v3052_v39  ;;  %v1996_v43 = vmul.f32 %v1994_v2, %v3055_v17 }
 0xa97   : > { %v2012_v13 = vsel %vm850_vm12, %v2009_v10, %v2011_v52  ;;  %v2013_v48 = vsel %vm850_vm12, %v2011_v52, %v2009_v10 }
 0xa98   : > { %v2002_v49 = vmul.f32 %v3567_v62, %v1995_v41  ;;  %v2003_v54 = vmul.f32 %v3567_v62, %v1996_v43  ;;  %v2014_v5 = vmul.f32 %v2012_v13, %v3006_v55  ;;  %v2015_v26 = vmul.f32 %v2013_v48, %v3058_v14  ;;  %v2028_v27 = vpop.permute.xlu1 %2027  ;;  %v2030_v39 = vpop.permute.xlu0 %2029 }
 0xa99   : > { %v1985_v8 = vadd.f32 %v1983_v40, %v1966_v60  ;;  %v1986_v17 = vadd.f32 %v1984_v4, %v1967_v35  ;;  %v2031_v7 = vsel %vm881_vm3, %v2028_v27, %v2030_v39  ;;  %v2032_v56 = vsel %vm881_vm3, %v2030_v39, %v2028_v27 }
 0xa9a   : > { %v2033_v10 = vmul.f32 %v2031_v7, %v3085_v21  ;;  %v2034_v0 = vmul.f32 %v2032_v56, %v3088_v12  ;;  %v2021_v55 = vmul.f32 %v3571_v19, %v2014_v5  ;;  %v2022_v14 = vmul.f32 %v3571_v19, %v2015_v26 }
 0xa9b   : > { %v2004_v57 = vadd.f32 %v2002_v49, %v1985_v8  ;;  %v2005_v62 = vadd.f32 %v2003_v54, %v1986_v17 }
 0xa9c   : > { %v2040_v6 = vmul.f32 %v3569_v33, %v2033_v10  ;;  %v2041_v29 = vmul.f32 %v3569_v33, %v2034_v0 }
 0xa9d   : > { %v2023_v34 = vadd.f32 %v2021_v55, %v2004_v57  ;;  %v2024_v9 = vadd.f32 %v2022_v14, %v2005_v62 }
 0xa9f   : > { %v2042_v31 = vadd.f32 %v2040_v6, %v2023_v34  ;;  %v2043_v30 = vadd.f32 %v2041_v29, %v2024_v9 }
 0xaa1   : > { %v2044_v20 = vsel %vm508_vm0, %v2042_v31, 0.0  ;;  %v2051_v21 = vsel %vm508_vm0, %v2043_v30, 0.0 }
 0xaa2   : > { %v2045_v3 = vrot.slane %v2044_v20, 4  ;;  %v2052_v12 = vrot.slane %v2051_v21, 4 }
 0xaa4   : > { %v2046_v36 = vadd.f32 %v2045_v3, %v2044_v20  ;;  %v2053_v37 = vadd.f32 %v2052_v12, %v2051_v21 }
 0xaa6   : > { %v2047_v46 = vrot.slane %v2046_v36, 2  ;;  %v2054_v28 = vrot.slane %v2053_v37, 2 }
 0xaa8   : > { %v2048_v47 = vadd.f32 %v2047_v46, %v2046_v36  ;;  %v2055_v19 = vadd.f32 %v2054_v28, %v2053_v37 }
 0xaa9   : > { %v2061_v24 = vpop.permute.xlu1 %2060  ;;  %v2199_v53 = vpop.permute.xlu0 %2198 }
 0xaaa   : > { %v2049_v38 = vrot.slane %v2048_v47, 1  ;;  %v2056_v42 = vrot.slane %v2055_v19, 1  ;;  %v2271_v2 = vadd.f32 %v3549_v18, %v2199_v53  ;;  %v2273_v60 = vadd.f32 %v3565_v25, %v2199_v53 }
 0xaac   : > { %v2050_v44 = vadd.f32 %v2049_v38, %v2048_v47  ;;  %v2057_v33 = vadd.f32 %v2056_v42, %v2055_v19  ;;  %v2275_v35 = vadd.f32 1.0, %v2271_v2  ;;  %v2276_v41 = vadd.f32 1.0, %v2273_v60 }
 0xaad   : > { %v2281_v54 = vrot.slane %v2271_v2, 4  ;;  %v2282_v18 = vrot.slane %v2273_v60, 4 }
 0xaae   : > { %v2063_v45 = vadd.f32 %v2061_v24, %v2050_v44  ;;  %v2064_v32 = vadd.f32 %v2061_v24, %v2057_v33  ;;  %v2277_v43 = vmul.f32 %v2275_v35, %v3521_v59  ;;  %v2278_v4 = vmul.f32 %v2276_v41, %v3535_v61 }
 0xab0   : > { %v2444_v11 = vmul.f32 -1.442695, %v2063_v45  ;;  %v2445_v50 = vmul.f32 -1.442695, %v2064_v32  ;;  %v2285_v27 = vadd.f32 %v2281_v54, %v2277_v43  ;;  %v2286_v39 = vadd.f32 %v2282_v18, %v2278_v4 }
 0xab2   : > { %2586 = vpow2.f32 %v2444_v11 }
 0xab3   : > { %2588 = vpow2.f32 %v2445_v50 }
 0xabc   : > { %v2587_v51 = vpop.eup %2586 }
 0xabd   : > { %v2589_v52 = vpop.eup %2588  ;;  %v2071_v15 = vadd.f32 1.0, %v2587_v51 }
 0xabe   : > { %v2072_v1 = vadd.f32 1.0, %v2589_v52 }
 0xabf   : > { %2590 = vrcp.f32 %v2071_v15 }
 0xac0   : > { %2592 = vrcp.f32 %v2072_v1 }
 0xac9   : > { %v2591_v40 = vpop.eup %2590 }
 0xaca   : > { %v2593_v13 = vpop.eup %2592  ;;  %v2290_v48 = vrot.slane %v2591_v40, %v2937_v23  ;;  %v2297_v49 = vsub.f32 1.0, %v2591_v40 }
 0xacb   : > { %v2294_v5 = vrot.slane %v2593_v13, %v2937_v23  ;;  %v2298_v26 = vsub.f32 1.0, %v2593_v13 }
 0xacc   : > { %v2302_v25 = vrot.slane %v2297_v49, %v2937_v23  ;;  %v2295_v8 = vmul.f32 %v2290_v48, %v2285_v27 }
 0xacd   : > { %v2306_v59 = vrot.slane %v2298_v26, %v2937_v23  ;;  %v2296_v7 = vmul.f32 %v2294_v5, %v2286_v39 }
 0xace   : > { %v2307_v61 = vmul.f32 %v2302_v25, %v3431_v16 }
 0xacf   : > { %v2308_v17 = vmul.f32 %v2306_v59, %v3433_v58 }
 0xad0   : > { %v2309_v56 = vadd.f32 %v2307_v61, %v2295_v8 }
 0xad1   : > { %v2310_v10 = vadd.f32 %v2308_v17, %v2296_v7 }
 0xad2   : > { %v2311_v0 = vadd.f32 %v2309_v56, %v3442_v22 }
 0xad3   : > { %v2312_v57 = vadd.f32 %v2310_v10, %v3446_v63 }
 0xad5   : > { %v2315_v62 = vcombine.low %v2311_v0, %v2312_v57 }
 0xad7   : > { %2317 = vst [vmem:[%s460_s19] sm:$0xff] %v2315_v62 }
 0xad8   : > { %2608 = shalt.err (!%p2605_p3)
}
 0xad9   : > { %s2609_s2 = scalar_lea.hbm %s3648_s15, 128  ;;  %s2613_s21 = scalar_lea.hbm %s3704_s14, 256 }
 0xada   : > { %p2610_p4 = scmp.ne.s32.totalorder %s3648_s15, %s2609_s2  ;;  %p2614_p9 = scmp.lt.u32.totalorder %s3648_s15, %s3704_s14 }
 0xadb   : > { %p2615_p10 = scmp.lt.u32.totalorder %s2613_s21, %s2609_s2  ;;  %p2617_p12 = scmp.lt.u32.totalorder %s2609_s2, %s3648_s15 }
 0xadc   : > { %p2611_p7 = pnand %p2610_p4, %p2784_p5 }
 0xadd   : > { %p2616_p11 = por %p2615_p10, %p2614_p9 }
 0xade   : > { %p2612_p8 = pneg %p2611_p7 }
 0xadf   : > { %p2618_p13 = por %p2617_p12, %p2616_p11 }
 0xae1   : > { %p2619_p0 = pnand %p2618_p13, %p2612_p8 }
 0xae3   : > { %2622 = shalt.err (!%p2619_p0)
}
 0xae4   : > { %2516 = dma.vmem_to_hbm [thread:$0]  (%p2784_p5), %s3650_s4, 128, %s3648_s15, %s2319_s24  }
 0xae5 PF: > { %p2522_p1 = scmp.ge.s32.totalorder %s2657_s16, 2  ;;  %s2345_s27 = sand.u32 1, %s2645_s29  }
 0xae6   : > { %s2346_s26 = scalar_lea.sflag [#allocation4], %s2345_s27 }
 0xae7   : > { %p2519_p2 = pnand %p2522_p1, %p2788_p6 }
 0xae9   : > { %2640 = dma.done.wait (!%p2519_p2), %s2346_s26, 128  }
 0xaea   : > { %2642 = vsyncadd (!%p2519_p2), %s2346_s26, 4294967168  ;;  %s3754_s16 = sld [smem:[#allocation7_spill]]  ;;  %s3755_s19 = sld [smem:[#allocation6_spill]] }
 0xaeb   : > { %s3756_s15 = sld [smem:[#allocation8_spill]]  ;;  %s3757_s29 = smov %s2649_s30 }
 0xaf0   : > { %p24_p3 = scmp.ge.s32.totalorder %s3754_s16, 4   ;;  %s3758_s30 = smov %s3755_s19 }
 0xaf2   :  { %26 = sbr.rel (!%p24_p3) target bundleno = 11 (0xb), region = 128 }
 0xaf9   :  { %2351 = vsyncpa [#allocation4], 1 }
 0xafa   :  { %2353 = vsyncpa [#allocation4 + $0x1], 1 }

</bundles_post_ra>
